<compile_context>
chip_gen: v7x
topology: tpu7x:2x2x1
jax: 0.10.0
libtpu: 0.0.40
codegen_flags: <defaults>
</compile_context>

<pallas_src>
import jax
import jax.numpy as jnp
from jax.experimental import pallas as pl
from jax.experimental.pallas import tpu as pltpu


def _round_up(x, m):
    return (x + m - 1) // m * m


_VMEM = pl.BlockSpec(memory_space=pltpu.MemorySpace.VMEM)


# ---------------------------------------------------------------------------
# Fused Encoder kernel
# ---------------------------------------------------------------------------
def _make_fused_kernel(T, B, L, H, Lc, C, Cp, Hcp):
    nsteps = T * B
    Gc = 4 * Hcp                        # char gate width (lanes, multiple of 128)
    f32 = jnp.float32
    bf16 = jnp.bfloat16

    def kernel(*refs):
        it = iter(refs)
        xw_ref = next(it)               # (T*B, ninp)        f32
        h0_ref = next(it)               # (L, B, H)          f32
        c0_ref = next(it)               # (L, B, H)          f32
        ec_ref = next(it)               # (T*B*Cp, E)        f32
        hch0_ref = next(it)             # (Lc, Cp, Hcp)      f32
        hcc0_ref = next(it)             # (Lc, Cp, Hcp)      f32
        m_wih = [next(it) for _ in range(L)]        # (in_l, 4H)   bf16
        m_whh = [next(it) for _ in range(L)]        # (H, 4H)      bf16
        m_b = [next(it) for _ in range(L)]          # (1, 4H)      f32
        w0e_ref = next(it)              # (E, Gc)            bf16
        w0h_ref = next(it)              # (H, Gc)            bf16
        c_wih = [next(it) for _ in range(Lc - 1)]   # layers 1..Lc-1 (Hcp, Gc) bf16
        c_whh = [next(it) for _ in range(Lc - 1)]   # layers 0..Lc-2 (Hcp, Gc) bf16
        wm_ref = next(it)               # (Hcp, Gc + NCp) bf16  [Whh_last | dec_w]
        c_b = [next(it) for _ in range(Lc)]         # (1, Gc)      f32
        decb_ref = next(it)             # (1, NCp)           f32
        out_ref = next(it)              # (nsteps, Cp, NCp)  f32
        hlast_ref = next(it)            # (L, B, H)          f32
        clast_ref = next(it)            # (L, B, H)          f32
        hcf_ref = next(it)              # (Lc, Cp, Hcp)      f32
        ccf_ref = next(it)              # (Lc, Cp, Hcp)      f32

        # ---- main word-level LSTM: all T timesteps batched (independent; the
        # reference re-runs the LSTM from the same rnn_hidden each timestep).
        # The h2h + bias term is identical for every timestep -> computed once
        # per layer at rank B and replicated to T*B rows.
        x = xw_ref[...]
        h_top = None
        for l in range(L):
            gh = (jnp.dot(h0_ref[l].astype(bf16), m_whh[l][...],
                          preferred_element_type=f32) + m_b[l][...])        # (B,4H)
            gx = jnp.dot(x.astype(bf16), m_wih[l][...],
                         preferred_element_type=f32)                        # (T*B,4H)
            g = gx + jnp.concatenate([gh] * T, axis=0)     # row t*B+b -> gh[b]
            i_g = jax.nn.sigmoid(g[:, 0 * H:1 * H])
            f_g = jax.nn.sigmoid(g[:, 1 * H:2 * H])
            g_g = jnp.tanh(g[:, 2 * H:3 * H])
            o_g = jax.nn.sigmoid(g[:, 3 * H:4 * H])
            c_prev = jnp.concatenate([c0_ref[l]] * T, axis=0)               # (T*B,H)
            c_new = f_g * c_prev + i_g * g_g
            h_new = o_g * jnp.tanh(c_new)
            # only the consumed outputs leave the kernel: last-timestep state.
            hlast_ref[l] = h_new[(T - 1) * B:, :]
            clast_ref[l] = c_new[(T - 1) * B:, :]
            if l == 1:
                h_top = h_new            # hidden[0][1] of every timestep, (T*B,H)
            x = h_new                    # inter-layer dropout == identity (eval)

        # ---- CharGenerator layer-0 input-side gate pre-activations for every
        # (step, char row), hoisted off the sequential chain: one batched emb
        # matmul + one rank-(T*B) hidden projection (the torch
        # cat([hl]*char_len).reshape interleave is applied to the 128-lane
        # projected values below, in-register).
        emb_g = jnp.dot(ec_ref[...].astype(bf16), w0e_ref[...],
                        preferred_element_type=f32)                         # (T*B*Cp,Gc)
        hl_g = jnp.dot(h_top.astype(bf16), w0h_ref[...],
                       preferred_element_type=f32)                          # (T*B,Gc)

        # hoisted bias / weight broadcasts & loads (JAX does not CSE these).
        b0 = jnp.broadcast_to(c_b[0][...], (Cp, Gc))
        c_bias = [jnp.broadcast_to(c_b[l][...], (Cp, Gc)) for l in range(1, Lc)]
        dec_bias = jnp.broadcast_to(decb_ref[...], (Cp, decb_ref.shape[1]))
        wih_v = [w[...] for w in c_wih]
        whh_v = [w[...] for w in c_whh]
        wm = wm_ref[...]

        hs = [hch0_ref[l] for l in range(Lc)]
        cs = [hcc0_ref[l] for l in range(Lc)]

        # last char layer's h2h shares its operand with the decoder matmul of the
        # previous step -> merged weight, one dot per step feeding both.
        m = jnp.dot(hs[Lc - 1].astype(bf16), wm, preferred_element_type=f32)
        h2h_last = m[:, :Gc]

        reps = -(-Cp // B)
        # hidden_char is carried across every (timestep, word-batch) position,
        # so this chain is inherently sequential.  nsteps is small -> static
        # unroll for full scheduler visibility.
        for s in range(nsteps):
            t, i = divmod(s, B)
            # interleaved hidden part: row j uses hl_g[t*B + (i*C + j) % B]
            off = (i * C) % B
            blk = hl_g[t * B:(t + 1) * B]                                   # (B,Gc)
            if off:
                blk = jnp.concatenate([blk[off:], blk[:off]], axis=0)
            hl_s = jnp.concatenate([blk] * reps, axis=0)
            if reps * B != Cp:
                hl_s = hl_s[:Cp]
            g0 = emb_g[s * Cp:(s + 1) * Cp] + hl_s + b0                     # (Cp,Gc)

            xc = None
            for l in range(Lc):
                if l == 0:
                    gx = g0
                else:
                    gx = (jnp.dot(xc.astype(bf16), wih_v[l - 1],
                                  preferred_element_type=f32) + c_bias[l - 1])
                if l == Lc - 1:
                    gh = h2h_last
                else:
                    gh = jnp.dot(hs[l].astype(bf16), whh_v[l],
                                 preferred_element_type=f32)
                g = gx + gh
                i_g = jax.nn.sigmoid(g[:, 0 * Hcp:1 * Hcp])
                f_g = jax.nn.sigmoid(g[:, 1 * Hcp:2 * Hcp])
                g_g = jnp.tanh(g[:, 2 * Hcp:3 * Hcp])
                o_g = jax.nn.sigmoid(g[:, 3 * Hcp:4 * Hcp])
                cs[l] = f_g * cs[l] + i_g * g_g
                hs[l] = o_g * jnp.tanh(cs[l])
                xc = hs[l]                            # dropout == identity (eval)

            # merged (Whh_last | dec_w) dot: logits for THIS step + h2h gate
            # contribution for the NEXT step.
            m = jnp.dot(hs[Lc - 1].astype(bf16), wm, preferred_element_type=f32)
            h2h_last = m[:, :Gc]
            out_ref[s] = m[:, Gc:] + dec_bias         # full (8,128) unmasked store

        for l in range(Lc):
            hcf_ref[l] = hs[l]
            ccf_ref[l] = cs[l]

    return kernel


# ---------------------------------------------------------------------------
# Parameter initialization (deterministic, synthetic — no checkpoint loading)
# ---------------------------------------------------------------------------
def _uniform(key, shape, a):
    return jax.random.uniform(key, shape, dtype=jnp.float32, minval=-a, maxval=a)


def init_params(key, *, ntoken, ninp, nhid, nlayers,
                nchar, emb_size, nhid_char, nlayers_char):
    keys = iter(jax.random.split(key, 64))
    params = {}
    params["word_emb"] = _uniform(next(keys), (ntoken, ninp), 0.1)

    a_main = 1.0 / float(nhid) ** 0.5
    params["main_wih"], params["main_whh"], params["main_b"] = [], [], []
    for l in range(nlayers):
        in_dim = ninp if l == 0 else nhid
        params["main_wih"].append(_uniform(next(keys), (in_dim, 4 * nhid), a_main))
        params["main_whh"].append(_uniform(next(keys), (nhid, 4 * nhid), a_main))
        b_ih = _uniform(next(keys), (1, 4 * nhid), a_main)
        b_hh = _uniform(next(keys), (1, 4 * nhid), a_main)
        params["main_b"].append(b_ih + b_hh)

    char_emb = _uniform(next(keys), (nchar + 1, emb_size), 0.1)
    params["char_emb"] = char_emb.at[0].set(0.0)       # padding_idx=0 row is zero

    ninp_char = nhid + emb_size
    a_char = 1.0 / float(nhid_char) ** 0.5
    params["char_wih"], params["char_whh"], params["char_b"] = [], [], []
    for l in range(nlayers_char):
        in_dim = ninp_char if l == 0 else nhid_char
        params["char_wih"].append(_uniform(next(keys), (in_dim, 4 * nhid_char), a_char))
        params["char_whh"].append(_uniform(next(keys), (nhid_char, 4 * nhid_char), a_char))
        b_ih = _uniform(next(keys), (1, 4 * nhid_char), a_char)
        b_hh = _uniform(next(keys), (1, 4 * nhid_char), a_char)
        params["char_b"].append(b_ih + b_hh)

    params["dec_w"] = _uniform(next(keys), (nhid_char, nchar), 0.1)
    params["dec_b"] = jnp.zeros((1, nchar), jnp.float32)
    return params


def _pad_gate_dim(w, h, h_pad):
    """Zero-pad the trailing 4*h gate axis to 4*h_pad per gate block (i,f,g,o)."""
    if h_pad == h:
        return w
    lead = w.shape[:-1]
    w4 = jnp.reshape(w, lead + (4, h))
    w4 = jnp.pad(w4, [(0, 0)] * len(lead) + [(0, 0), (0, h_pad - h)])
    return jnp.reshape(w4, lead + (4 * h_pad,))


def prepare_params(params):
    """One-time weight prep: gate/row padding to lane-friendly widths, layer-0
    input-weight split (emb rows / hidden rows), last-Whh|decoder merge, and
    bf16 cast of all matmul weights.  Run ONCE, not per forward."""
    Hc = params["char_whh"][0].shape[0]
    nchar = params["dec_w"].shape[1]
    E = params["char_emb"].shape[1]
    Hcp = _round_up(Hc, 32)             # 4*Hcp is a multiple of 128 lanes
    NCp = _round_up(nchar, 128)
    bf16 = jnp.bfloat16

    p = {"word_emb": params["word_emb"], "char_emb": params["char_emb"]}
    p["m_wih"] = [w.astype(bf16) for w in params["main_wih"]]
    p["m_whh"] = [w.astype(bf16) for w in params["main_whh"]]
    p["m_b"] = list(params["main_b"])

    w0 = _pad_gate_dim(params["char_wih"][0], Hc, Hcp)      # (E + nhid, 4*Hcp)
    p["w0_emb"] = w0[:E].astype(bf16)
    p["w0_h"] = w0[E:].astype(bf16)
    p["c_wih"] = [jnp.pad(_pad_gate_dim(w, Hc, Hcp), ((0, Hcp - Hc), (0, 0))).astype(bf16)
                  for w in params["char_wih"][1:]]
    p["c_whh"] = [jnp.pad(_pad_gate_dim(w, Hc, Hcp), ((0, Hcp - Hc), (0, 0))).astype(bf16)
                  for w in params["char_whh"][:-1]]
    whh_last = jnp.pad(_pad_gate_dim(params["char_whh"][-1], Hc, Hcp),
                       ((0, Hcp - Hc), (0, 0)))
    dec_w = jnp.pad(params["dec_w"], ((0, Hcp - Hc), (0, NCp - nchar)))
    p["w_merged"] = jnp.concatenate([whh_last, dec_w], axis=1).astype(bf16)
    p["c_b"] = [_pad_gate_dim(b, Hc, Hcp) for b in params["char_b"]]
    p["dec_b"] = jnp.pad(params["dec_b"], ((0, 0), (0, NCp - nchar)))
    return p


# ---------------------------------------------------------------------------
# Encoder.forward equivalent
# ---------------------------------------------------------------------------
def encoder_forward(prepped, word_input, char_input, rnn_hidden, hidden_char,
                    *, nchar):
    """
    word_input : (bsz, word_len) int32
    char_input : (bsz, word_len, char_len) int32
    rnn_hidden : (h0, c0), each (nlayers, bsz, nhid)      -- reset every timestep
    hidden_char: (h0c, c0c), each (nlayers_char, char_len, nhid_char) -- carried
    """
    B, word_len = word_input.shape
    C = char_input.shape[2]
    T = word_len - 1
    h0, c0 = rnn_hidden
    hc_h0, hc_c0 = hidden_char
    L, _, H = h0.shape
    Lc, _, Hc = hc_h0.shape
    assert L >= 2, "reference indexes hidden[0][1] -> nlayers must be >= 2"

    Hcp = prepped["w0_h"].shape[1] // 4
    NCp = prepped["dec_b"].shape[1]
    Cp = _round_up(C, 8)
    nsteps = T * B

    # --- XLA glue: embedding gathers + layout for the kernel ---
    emb_word = jnp.take(prepped["word_emb"], word_input[:, :T], axis=0)      # (B,T,ninp)
    x_all = jnp.transpose(emb_word, (1, 0, 2)).reshape(T * B, -1)
    emb_char = jnp.take(prepped["char_emb"], char_input[:, :T, :], axis=0)   # (B,T,C,E)
    emb_char = jnp.transpose(emb_char, (1, 0, 2, 3))                         # (T,B,C,E)
    emb_char = jnp.pad(emb_char, ((0, 0), (0, 0), (0, Cp - C), (0, 0)))
    emb_flat = emb_char.reshape(T * B * Cp, -1)

    h_init = jnp.pad(hc_h0, ((0, 0), (0, Cp - C), (0, Hcp - Hc)))
    c_init = jnp.pad(hc_c0, ((0, 0), (0, Cp - C), (0, Hcp - Hc)))

    inputs = [x_all, h0, c0, emb_flat, h_init, c_init,
              *prepped["m_wih"], *prepped["m_whh"], *prepped["m_b"],
              prepped["w0_emb"], prepped["w0_h"],
              *prepped["c_wih"], *prepped["c_whh"],
              prepped["w_merged"], *prepped["c_b"], prepped["dec_b"]]

    out, h_last, c_last, hcf, ccf = pl.pallas_call(
        _make_fused_kernel(T=T, B=B, L=L, H=H, Lc=Lc, C=C, Cp=Cp, Hcp=Hcp),
        out_shape=(
            jax.ShapeDtypeStruct((nsteps, Cp, NCp), jnp.float32),
            jax.ShapeDtypeStruct((L, B, H), jnp.float32),
            jax.ShapeDtypeStruct((L, B, H), jnp.float32),
            jax.ShapeDtypeStruct((Lc, Cp, Hcp), jnp.float32),
            jax.ShapeDtypeStruct((Lc, Cp, Hcp), jnp.float32),
        ),
        in_specs=[_VMEM] * len(inputs),
        out_specs=(_VMEM,) * 5,
        compiler_params=pltpu.CompilerParams(vmem_limit_bytes=32 * 1024 * 1024),
    )(*inputs)

    hidden = (h_last, c_last)                       # last loop iteration's (h_n, c_n)
    hidden_char_out = (hcf[:, :C, :Hc], ccf[:, :C, :Hc])

    dec = out[:, :C, :nchar].reshape(T, B, C, nchar)
    # output_decoder.view(bsz, nchar, -1) is a raw reshape (not a transpose)
    out_all = dec.reshape(T, B, nchar, C)           # stacked outputs, index as out_all[t]
    return out_all, hidden, hidden_char_out


# ---------------------------------------------------------------------------
# Driver
# ---------------------------------------------------------------------------
if __name__ == "__main__":
    bsz = 2
    word_len = 5          # loop runs over word_len - 1 = 4 positions
    char_len = 6
    ntoken = 50
    ninp = 16             # word embedding / main LSTM input size
    nhid = 32             # main LSTM hidden size (== hl_size of CharGenerator)
    nlayers = 2           # must be >= 2 (reference indexes hidden[0][1])
    nchar = 20
    emb_size = 8
    nhid_char = 24
    nlayers_char = 2

    key = jax.random.PRNGKey(0)
    k_params, k_word, k_char = jax.random.split(key, 3)

    params = init_params(k_params, ntoken=ntoken, ninp=ninp, nhid=nhid,
                         nlayers=nlayers, nchar=nchar, emb_size=emb_size,
                         nhid_char=nhid_char, nlayers_char=nlayers_char)
    prepped = prepare_params(params)      # one-time padding / split / bf16 cast

    word_input = jax.random.randint(k_word, (bsz, word_len), 0, ntoken, dtype=jnp.int32)
    char_input = jax.random.randint(k_char, (bsz, word_len, char_len), 0, nchar + 1,
                                    dtype=jnp.int32)

    rnn_hidden = (jnp.zeros((nlayers, bsz, nhid), jnp.float32),
                  jnp.zeros((nlayers, bsz, nhid), jnp.float32))
    # char LSTM "batch" dim is char_len (batch_first=False on a (bsz, char_len, F) input)
    hidden_char = (jnp.zeros((nlayers_char, char_len, nhid_char), jnp.float32),
                   jnp.zeros((nlayers_char, char_len, nhid_char), jnp.float32))

    fwd = jax.jit(encoder_forward, static_argnames=("nchar",))
    outputs, hidden, hidden_char_out = fwd(prepped, word_input, char_input,
                                           rnn_hidden, hidden_char, nchar=nchar)
    jax.block_until_ready((outputs, hidden, hidden_char_out))

    assert len(outputs) == word_len - 1
    assert outputs[0].shape == (bsz, nchar, char_len)
    assert hidden[0].shape == (nlayers, bsz, nhid)
    assert hidden_char_out[0].shape == (nlayers_char, char_len, nhid_char)
    assert bool(jnp.all(jnp.isfinite(outputs[0])))
    assert bool(jnp.all(jnp.isfinite(hidden_char_out[0])))

    print("KERNEL_OK")
</pallas_src>

<mosaic_0001>
module attributes {stable_mosaic.version = 11 : i64} {
  func.func @kernel(%arg0: memref<8x16xf32, #tpu.memory_space<vmem>>, %arg1: memref<2x2x32xf32, #tpu.memory_space<vmem>>, %arg2: memref<2x2x32xf32, #tpu.memory_space<vmem>>, %arg3: memref<64x8xf32, #tpu.memory_space<vmem>>, %arg4: memref<2x8x32xf32, #tpu.memory_space<vmem>>, %arg5: memref<2x8x32xf32, #tpu.memory_space<vmem>>, %arg6: memref<16x128xbf16, #tpu.memory_space<vmem>>, %arg7: memref<32x128xbf16, #tpu.memory_space<vmem>>, %arg8: memref<32x128xbf16, #tpu.memory_space<vmem>>, %arg9: memref<32x128xbf16, #tpu.memory_space<vmem>>, %arg10: memref<1x128xf32, #tpu.memory_space<vmem>>, %arg11: memref<1x128xf32, #tpu.memory_space<vmem>>, %arg12: memref<8x128xbf16, #tpu.memory_space<vmem>>, %arg13: memref<32x128xbf16, #tpu.memory_space<vmem>>, %arg14: memref<32x128xbf16, #tpu.memory_space<vmem>>, %arg15: memref<32x128xbf16, #tpu.memory_space<vmem>>, %arg16: memref<32x256xbf16, #tpu.memory_space<vmem>>, %arg17: memref<1x128xf32, #tpu.memory_space<vmem>>, %arg18: memref<1x128xf32, #tpu.memory_space<vmem>>, %arg19: memref<1x128xf32, #tpu.memory_space<vmem>>, %arg20: memref<8x8x128xf32, #tpu.memory_space<vmem>>, %arg21: memref<2x2x32xf32, #tpu.memory_space<vmem>>, %arg22: memref<2x2x32xf32, #tpu.memory_space<vmem>>, %arg23: memref<2x8x32xf32, #tpu.memory_space<vmem>>, %arg24: memref<2x8x32xf32, #tpu.memory_space<vmem>>) attributes {dimension_semantics = [], scalar_prefetch = 0 : i64, scratch_operands = 0 : i64, tpu.core_type = #tpu.core_type<tc>} {
    %c0 = arith.constant 0 : index
    %c0_0 = arith.constant 0 : index
    %0 = vector.load %arg0[%c0, %c0_0] : memref<8x16xf32, #tpu.memory_space<vmem>>, vector<8x16xf32>
    %c0_1 = arith.constant 0 : index
    %c0_2 = arith.constant 0 : index
    %c0_3 = arith.constant 0 : index
    %1 = vector.load %arg1[%c0_1, %c0_2, %c0_3] : memref<2x2x32xf32, #tpu.memory_space<vmem>>, vector<1x2x32xf32>
    %2 = vector.shape_cast %1 : vector<1x2x32xf32> to vector<2x32xf32>
    %3 = arith.truncf %2 : vector<2x32xf32> to vector<2x32xbf16>
    %c0_4 = arith.constant 0 : index
    %c0_5 = arith.constant 0 : index
    %4 = vector.load %arg8[%c0_4, %c0_5] : memref<32x128xbf16, #tpu.memory_space<vmem>>, vector<32x128xbf16>
    %cst = arith.constant dense<0.000000e+00> : vector<2x128xf32>
    %5 = tpu.matmul %3, %4, %cst {dimension_numbers = #tpu.dot_dimension_numbers<[1], [0], [0], [1], [0, 0, 1, 1], [], []>} : vector<2x32xbf16>, vector<32x128xbf16>, vector<2x128xf32> -> vector<2x128xf32>
    %c0_6 = arith.constant 0 : index
    %c0_7 = arith.constant 0 : index
    %6 = vector.load %arg10[%c0_6, %c0_7] : memref<1x128xf32, #tpu.memory_space<vmem>>, vector<1x128xf32>
    %7 = vector.broadcast %6 : vector<1x128xf32> to vector<2x128xf32>
    %8 = arith.addf %5, %7 : vector<2x128xf32>
    %9 = arith.truncf %0 : vector<8x16xf32> to vector<8x16xbf16>
    %c0_8 = arith.constant 0 : index
    %c0_9 = arith.constant 0 : index
    %10 = vector.load %arg6[%c0_8, %c0_9] : memref<16x128xbf16, #tpu.memory_space<vmem>>, vector<16x128xbf16>
    %cst_10 = arith.constant dense<0.000000e+00> : vector<8x128xf32>
    %11 = tpu.matmul %9, %10, %cst_10 {dimension_numbers = #tpu.dot_dimension_numbers<[1], [0], [0], [1], [0, 0, 1, 1], [], []>} : vector<8x16xbf16>, vector<16x128xbf16>, vector<8x128xf32> -> vector<8x128xf32>
    %12 = tpu.concatenate %8, %8, %8, %8 in 0 : vector<2x128xf32>, vector<2x128xf32>, vector<2x128xf32>, vector<2x128xf32> -> vector<8x128xf32>
    %13 = arith.addf %11, %12 : vector<8x128xf32>
    %14 = vector.extract_strided_slice %13 {offsets = [0, 0], sizes = [8, 32], strides = [1, 1]} : vector<8x128xf32> to vector<8x32xf32>
    %15 = arith.negf %14 : vector<8x32xf32>
    %16 = math.exp %15 : vector<8x32xf32>
    %cst_11 = arith.constant 1.000000e+00 : f32
    %17 = vector.broadcast %cst_11 : f32 to vector<8x32xf32>
    %18 = arith.addf %17, %16 : vector<8x32xf32>
    %19 = arith.divf %17, %18 : vector<8x32xf32>
    %20 = vector.extract_strided_slice %13 {offsets = [0, 32], sizes = [8, 32], strides = [1, 1]} : vector<8x128xf32> to vector<8x32xf32>
    %21 = arith.negf %20 : vector<8x32xf32>
    %22 = math.exp %21 : vector<8x32xf32>
    %cst_12 = arith.constant 1.000000e+00 : f32
    %23 = vector.broadcast %cst_12 : f32 to vector<8x32xf32>
    %24 = arith.addf %23, %22 : vector<8x32xf32>
    %25 = arith.divf %23, %24 : vector<8x32xf32>
    %26 = vector.extract_strided_slice %13 {offsets = [0, 64], sizes = [8, 32], strides = [1, 1]} : vector<8x128xf32> to vector<8x32xf32>
    %27 = math.tanh %26 : vector<8x32xf32>
    %28 = vector.extract_strided_slice %13 {offsets = [0, 96], sizes = [8, 32], strides = [1, 1]} : vector<8x128xf32> to vector<8x32xf32>
    %29 = arith.negf %28 : vector<8x32xf32>
    %30 = math.exp %29 : vector<8x32xf32>
    %cst_13 = arith.constant 1.000000e+00 : f32
    %31 = vector.broadcast %cst_13 : f32 to vector<8x32xf32>
    %32 = arith.addf %31, %30 : vector<8x32xf32>
    %33 = arith.divf %31, %32 : vector<8x32xf32>
    %c0_14 = arith.constant 0 : index
    %c0_15 = arith.constant 0 : index
    %c0_16 = arith.constant 0 : index
    %34 = vector.load %arg2[%c0_14, %c0_15, %c0_16] : memref<2x2x32xf32, #tpu.memory_space<vmem>>, vector<1x2x32xf32>
    %35 = vector.shape_cast %34 : vector<1x2x32xf32> to vector<2x32xf32>
    %36 = tpu.concatenate %35, %35, %35, %35 in 0 : vector<2x32xf32>, vector<2x32xf32>, vector<2x32xf32>, vector<2x32xf32> -> vector<8x32xf32>
    %37 = arith.mulf %25, %36 : vector<8x32xf32>
    %38 = arith.mulf %19, %27 : vector<8x32xf32>
    %39 = arith.addf %37, %38 : vector<8x32xf32>
    %40 = math.tanh %39 : vector<8x32xf32>
    %41 = arith.mulf %33, %40 : vector<8x32xf32>
    %42 = vector.extract_strided_slice %41 {offsets = [6, 0], sizes = [2, 32], strides = [1, 1]} : vector<8x32xf32> to vector<2x32xf32>
    %c0_17 = arith.constant 0 : index
    %c0_18 = arith.constant 0 : index
    %c0_19 = arith.constant 0 : index
    %43 = vector.load %arg21[%c0_17, %c0_18, %c0_19] : memref<2x2x32xf32, #tpu.memory_space<vmem>>, vector<1x2x32xf32>
    %44 = vector.shape_cast %43 : vector<1x2x32xf32> to vector<2x32xf32>
    %45 = vector.shape_cast %42 : vector<2x32xf32> to vector<1x2x32xf32>
    tpu.vector_store %arg21[%c0_17, %c0_18, %c0_19], %45 {strides = array<i32>} : memref<2x2x32xf32, #tpu.memory_space<vmem>>, vector<1x2x32xf32>,
    %46 = vector.extract_strided_slice %39 {offsets = [6, 0], sizes = [2, 32], strides = [1, 1]} : vector<8x32xf32> to vector<2x32xf32>
    %c0_20 = arith.constant 0 : index
    %c0_21 = arith.constant 0 : index
    %c0_22 = arith.constant 0 : index
    %47 = vector.load %arg22[%c0_20, %c0_21, %c0_22] : memref<2x2x32xf32, #tpu.memory_space<vmem>>, vector<1x2x32xf32>
    %48 = vector.shape_cast %47 : vector<1x2x32xf32> to vector<2x32xf32>
    %49 = vector.shape_cast %46 : vector<2x32xf32> to vector<1x2x32xf32>
    tpu.vector_store %arg22[%c0_20, %c0_21, %c0_22], %49 {strides = array<i32>} : memref<2x2x32xf32, #tpu.memory_space<vmem>>, vector<1x2x32xf32>,
    %c1 = arith.constant 1 : index
    %c0_23 = arith.constant 0 : index
    %c0_24 = arith.constant 0 : index
    %50 = vector.load %arg1[%c1, %c0_23, %c0_24] : memref<2x2x32xf32, #tpu.memory_space<vmem>>, vector<1x2x32xf32>
    %51 = vector.shape_cast %50 : vector<1x2x32xf32> to vector<2x32xf32>
    %52 = arith.truncf %51 : vector<2x32xf32> to vector<2x32xbf16>
    %c0_25 = arith.constant 0 : index
    %c0_26 = arith.constant 0 : index
    %53 = vector.load %arg9[%c0_25, %c0_26] : memref<32x128xbf16, #tpu.memory_space<vmem>>, vector<32x128xbf16>
    %cst_27 = arith.constant dense<0.000000e+00> : vector<2x128xf32>
    %54 = tpu.matmul %52, %53, %cst_27 {dimension_numbers = #tpu.dot_dimension_numbers<[1], [0], [0], [1], [0, 0, 1, 1], [], []>} : vector<2x32xbf16>, vector<32x128xbf16>, vector<2x128xf32> -> vector<2x128xf32>
    %c0_28 = arith.constant 0 : index
    %c0_29 = arith.constant 0 : index
    %55 = vector.load %arg11[%c0_28, %c0_29] : memref<1x128xf32, #tpu.memory_space<vmem>>, vector<1x128xf32>
    %56 = vector.broadcast %55 : vector<1x128xf32> to vector<2x128xf32>
    %57 = arith.addf %54, %56 : vector<2x128xf32>
    %58 = arith.truncf %41 : vector<8x32xf32> to vector<8x32xbf16>
    %c0_30 = arith.constant 0 : index
    %c0_31 = arith.constant 0 : index
    %59 = vector.load %arg7[%c0_30, %c0_31] : memref<32x128xbf16, #tpu.memory_space<vmem>>, vector<32x128xbf16>
    %cst_32 = arith.constant dense<0.000000e+00> : vector<8x128xf32>
    %60 = tpu.matmul %58, %59, %cst_32 {dimension_numbers = #tpu.dot_dimension_numbers<[1], [0], [0], [1], [0, 0, 1, 1], [], []>} : vector<8x32xbf16>, vector<32x128xbf16>, vector<8x128xf32> -> vector<8x128xf32>
    %61 = tpu.concatenate %57, %57, %57, %57 in 0 : vector<2x128xf32>, vector<2x128xf32>, vector<2x128xf32>, vector<2x128xf32> -> vector<8x128xf32>
    %62 = arith.addf %60, %61 : vector<8x128xf32>
    %63 = vector.extract_strided_slice %62 {offsets = [0, 0], sizes = [8, 32], strides = [1, 1]} : vector<8x128xf32> to vector<8x32xf32>
    %64 = arith.negf %63 : vector<8x32xf32>
    %65 = math.exp %64 : vector<8x32xf32>
    %cst_33 = arith.constant 1.000000e+00 : f32
    %66 = vector.broadcast %cst_33 : f32 to vector<8x32xf32>
    %67 = arith.addf %66, %65 : vector<8x32xf32>
    %68 = arith.divf %66, %67 : vector<8x32xf32>
    %69 = vector.extract_strided_slice %62 {offsets = [0, 32], sizes = [8, 32], strides = [1, 1]} : vector<8x128xf32> to vector<8x32xf32>
    %70 = arith.negf %69 : vector<8x32xf32>
    %71 = math.exp %70 : vector<8x32xf32>
    %cst_34 = arith.constant 1.000000e+00 : f32
    %72 = vector.broadcast %cst_34 : f32 to vector<8x32xf32>
    %73 = arith.addf %72, %71 : vector<8x32xf32>
    %74 = arith.divf %72, %73 : vector<8x32xf32>
    %75 = vector.extract_strided_slice %62 {offsets = [0, 64], sizes = [8, 32], strides = [1, 1]} : vector<8x128xf32> to vector<8x32xf32>
    %76 = math.tanh %75 : vector<8x32xf32>
    %77 = vector.extract_strided_slice %62 {offsets = [0, 96], sizes = [8, 32], strides = [1, 1]} : vector<8x128xf32> to vector<8x32xf32>
    %78 = arith.negf %77 : vector<8x32xf32>
    %79 = math.exp %78 : vector<8x32xf32>
    %cst_35 = arith.constant 1.000000e+00 : f32
    %80 = vector.broadcast %cst_35 : f32 to vector<8x32xf32>
    %81 = arith.addf %80, %79 : vector<8x32xf32>
    %82 = arith.divf %80, %81 : vector<8x32xf32>
    %c1_36 = arith.constant 1 : index
    %c0_37 = arith.constant 0 : index
    %c0_38 = arith.constant 0 : index
    %83 = vector.load %arg2[%c1_36, %c0_37, %c0_38] : memref<2x2x32xf32, #tpu.memory_space<vmem>>, vector<1x2x32xf32>
    %84 = vector.shape_cast %83 : vector<1x2x32xf32> to vector<2x32xf32>
    %85 = tpu.concatenate %84, %84, %84, %84 in 0 : vector<2x32xf32>, vector<2x32xf32>, vector<2x32xf32>, vector<2x32xf32> -> vector<8x32xf32>
    %86 = arith.mulf %74, %85 : vector<8x32xf32>
    %87 = arith.mulf %68, %76 : vector<8x32xf32>
    %88 = arith.addf %86, %87 : vector<8x32xf32>
    %89 = math.tanh %88 : vector<8x32xf32>
    %90 = arith.mulf %82, %89 : vector<8x32xf32>
    %91 = vector.extract_strided_slice %90 {offsets = [6, 0], sizes = [2, 32], strides = [1, 1]} : vector<8x32xf32> to vector<2x32xf32>
    %c1_39 = arith.constant 1 : index
    %c0_40 = arith.constant 0 : index
    %c0_41 = arith.constant 0 : index
    %92 = vector.load %arg21[%c1_39, %c0_40, %c0_41] : memref<2x2x32xf32, #tpu.memory_space<vmem>>, vector<1x2x32xf32>
    %93 = vector.shape_cast %92 : vector<1x2x32xf32> to vector<2x32xf32>
    %94 = vector.shape_cast %91 : vector<2x32xf32> to vector<1x2x32xf32>
    tpu.vector_store %arg21[%c1_39, %c0_40, %c0_41], %94 {strides = array<i32>} : memref<2x2x32xf32, #tpu.memory_space<vmem>>, vector<1x2x32xf32>,
    %95 = vector.extract_strided_slice %88 {offsets = [6, 0], sizes = [2, 32], strides = [1, 1]} : vector<8x32xf32> to vector<2x32xf32>
    %c1_42 = arith.constant 1 : index
    %c0_43 = arith.constant 0 : index
    %c0_44 = arith.constant 0 : index
    %96 = vector.load %arg22[%c1_42, %c0_43, %c0_44] : memref<2x2x32xf32, #tpu.memory_space<vmem>>, vector<1x2x32xf32>
    %97 = vector.shape_cast %96 : vector<1x2x32xf32> to vector<2x32xf32>
    %98 = vector.shape_cast %95 : vector<2x32xf32> to vector<1x2x32xf32>
    tpu.vector_store %arg22[%c1_42, %c0_43, %c0_44], %98 {strides = array<i32>} : memref<2x2x32xf32, #tpu.memory_space<vmem>>, vector<1x2x32xf32>,
    %c0_45 = arith.constant 0 : index
    %c0_46 = arith.constant 0 : index
    %99 = vector.load %arg3[%c0_45, %c0_46] : memref<64x8xf32, #tpu.memory_space<vmem>>, vector<64x8xf32>
    %100 = arith.truncf %99 : vector<64x8xf32> to vector<64x8xbf16>
    %c0_47 = arith.constant 0 : index
    %c0_48 = arith.constant 0 : index
    %101 = vector.load %arg12[%c0_47, %c0_48] : memref<8x128xbf16, #tpu.memory_space<vmem>>, vector<8x128xbf16>
    %cst_49 = arith.constant dense<0.000000e+00> : vector<64x128xf32>
    %102 = tpu.matmul %100, %101, %cst_49 {dimension_numbers = #tpu.dot_dimension_numbers<[1], [0], [0], [1], [0, 0, 1, 1], [], []>} : vector<64x8xbf16>, vector<8x128xbf16>, vector<64x128xf32> -> vector<64x128xf32>
    %103 = arith.truncf %90 : vector<8x32xf32> to vector<8x32xbf16>
    %c0_50 = arith.constant 0 : index
    %c0_51 = arith.constant 0 : index
    %104 = vector.load %arg13[%c0_50, %c0_51] : memref<32x128xbf16, #tpu.memory_space<vmem>>, vector<32x128xbf16>
    %cst_52 = arith.constant dense<0.000000e+00> : vector<8x128xf32>
    %105 = tpu.matmul %103, %104, %cst_52 {dimension_numbers = #tpu.dot_dimension_numbers<[1], [0], [0], [1], [0, 0, 1, 1], [], []>} : vector<8x32xbf16>, vector<32x128xbf16>, vector<8x128xf32> -> vector<8x128xf32>
    %c0_53 = arith.constant 0 : index
    %c0_54 = arith.constant 0 : index
    %106 = vector.load %arg17[%c0_53, %c0_54] : memref<1x128xf32, #tpu.memory_space<vmem>>, vector<1x128xf32>
    %107 = vector.shape_cast %106 : vector<1x128xf32> to vector<1x128xf32>
    %108 = vector.broadcast %107 : vector<1x128xf32> to vector<8x128xf32>
    %c0_55 = arith.constant 0 : index
    %c0_56 = arith.constant 0 : index
    %109 = vector.load %arg18[%c0_55, %c0_56] : memref<1x128xf32, #tpu.memory_space<vmem>>, vector<1x128xf32>
    %110 = vector.shape_cast %109 : vector<1x128xf32> to vector<1x128xf32>
    %111 = vector.broadcast %110 : vector<1x128xf32> to vector<8x128xf32>
    %c0_57 = arith.constant 0 : index
    %c0_58 = arith.constant 0 : index
    %112 = vector.load %arg19[%c0_57, %c0_58] : memref<1x128xf32, #tpu.memory_space<vmem>>, vector<1x128xf32>
    %113 = vector.shape_cast %112 : vector<1x128xf32> to vector<1x128xf32>
    %114 = vector.broadcast %113 : vector<1x128xf32> to vector<8x128xf32>
    %c0_59 = arith.constant 0 : index
    %c0_60 = arith.constant 0 : index
    %115 = vector.load %arg14[%c0_59, %c0_60] : memref<32x128xbf16, #tpu.memory_space<vmem>>, vector<32x128xbf16>
    %c0_61 = arith.constant 0 : index
    %c0_62 = arith.constant 0 : index
    %116 = vector.load %arg15[%c0_61, %c0_62] : memref<32x128xbf16, #tpu.memory_space<vmem>>, vector<32x128xbf16>
    %c0_63 = arith.constant 0 : index
    %c0_64 = arith.constant 0 : index
    %117 = vector.load %arg16[%c0_63, %c0_64] : memref<32x256xbf16, #tpu.memory_space<vmem>>, vector<32x256xbf16>
    %c0_65 = arith.constant 0 : index
    %c0_66 = arith.constant 0 : index
    %c0_67 = arith.constant 0 : index
    %118 = vector.load %arg4[%c0_65, %c0_66, %c0_67] : memref<2x8x32xf32, #tpu.memory_space<vmem>>, vector<1x8x32xf32>
    %119 = vector.shape_cast %118 : vector<1x8x32xf32> to vector<8x32xf32>
    %c1_68 = arith.constant 1 : index
    %c0_69 = arith.constant 0 : index
    %c0_70 = arith.constant 0 : index
    %120 = vector.load %arg4[%c1_68, %c0_69, %c0_70] : memref<2x8x32xf32, #tpu.memory_space<vmem>>, vector<1x8x32xf32>
    %121 = vector.shape_cast %120 : vector<1x8x32xf32> to vector<8x32xf32>
    %c0_71 = arith.constant 0 : index
    %c0_72 = arith.constant 0 : index
    %c0_73 = arith.constant 0 : index
    %122 = vector.load %arg5[%c0_71, %c0_72, %c0_73] : memref<2x8x32xf32, #tpu.memory_space<vmem>>, vector<1x8x32xf32>
    %123 = vector.shape_cast %122 : vector<1x8x32xf32> to vector<8x32xf32>
    %c1_74 = arith.constant 1 : index
    %c0_75 = arith.constant 0 : index
    %c0_76 = arith.constant 0 : index
    %124 = vector.load %arg5[%c1_74, %c0_75, %c0_76] : memref<2x8x32xf32, #tpu.memory_space<vmem>>, vector<1x8x32xf32>
    %125 = vector.shape_cast %124 : vector<1x8x32xf32> to vector<8x32xf32>
    %126 = arith.truncf %121 : vector<8x32xf32> to vector<8x32xbf16>
    %cst_77 = arith.constant dense<0.000000e+00> : vector<8x256xf32>
    %127 = tpu.matmul %126, %117, %cst_77 {dimension_numbers = #tpu.dot_dimension_numbers<[1], [0], [0], [1], [0, 0, 1, 1], [], []>} : vector<8x32xbf16>, vector<32x256xbf16>, vector<8x256xf32> -> vector<8x256xf32>
    %128 = vector.extract_strided_slice %127 {offsets = [0, 0], sizes = [8, 128], strides = [1, 1]} : vector<8x256xf32> to vector<8x128xf32>
    %129 = vector.extract_strided_slice %105 {offsets = [0, 0], sizes = [2, 128], strides = [1, 1]} : vector<8x128xf32> to vector<2x128xf32>
    %130 = tpu.concatenate %129, %129, %129, %129 in 0 : vector<2x128xf32>, vector<2x128xf32>, vector<2x128xf32>, vector<2x128xf32> -> vector<8x128xf32>
    %131 = vector.extract_strided_slice %102 {offsets = [0, 0], sizes = [8, 128], strides = [1, 1]} : vector<64x128xf32> to vector<8x128xf32>
    %132 = arith.addf %131, %130 : vector<8x128xf32>
    %133 = arith.addf %132, %108 : vector<8x128xf32>
    %134 = arith.truncf %119 : vector<8x32xf32> to vector<8x32xbf16>
    %cst_78 = arith.constant dense<0.000000e+00> : vector<8x128xf32>
    %135 = tpu.matmul %134, %116, %cst_78 {dimension_numbers = #tpu.dot_dimension_numbers<[1], [0], [0], [1], [0, 0, 1, 1], [], []>} : vector<8x32xbf16>, vector<32x128xbf16>, vector<8x128xf32> -> vector<8x128xf32>
    %136 = arith.addf %133, %135 : vector<8x128xf32>
    %137 = vector.extract_strided_slice %136 {offsets = [0, 0], sizes = [8, 32], strides = [1, 1]} : vector<8x128xf32> to vector<8x32xf32>
    %138 = arith.negf %137 : vector<8x32xf32>
    %139 = math.exp %138 : vector<8x32xf32>
    %cst_79 = arith.constant 1.000000e+00 : f32
    %140 = vector.broadcast %cst_79 : f32 to vector<8x32xf32>
    %141 = arith.addf %140, %139 : vector<8x32xf32>
    %142 = arith.divf %140, %141 : vector<8x32xf32>
    %143 = vector.extract_strided_slice %136 {offsets = [0, 32], sizes = [8, 32], strides = [1, 1]} : vector<8x128xf32> to vector<8x32xf32>
    %144 = arith.negf %143 : vector<8x32xf32>
    %145 = math.exp %144 : vector<8x32xf32>
    %cst_80 = arith.constant 1.000000e+00 : f32
    %146 = vector.broadcast %cst_80 : f32 to vector<8x32xf32>
    %147 = arith.addf %146, %145 : vector<8x32xf32>
    %148 = arith.divf %146, %147 : vector<8x32xf32>
    %149 = vector.extract_strided_slice %136 {offsets = [0, 64], sizes = [8, 32], strides = [1, 1]} : vector<8x128xf32> to vector<8x32xf32>
    %150 = math.tanh %149 : vector<8x32xf32>
    %151 = vector.extract_strided_slice %136 {offsets = [0, 96], sizes = [8, 32], strides = [1, 1]} : vector<8x128xf32> to vector<8x32xf32>
    %152 = arith.negf %151 : vector<8x32xf32>
    %153 = math.exp %152 : vector<8x32xf32>
    %cst_81 = arith.constant 1.000000e+00 : f32
    %154 = vector.broadcast %cst_81 : f32 to vector<8x32xf32>
    %155 = arith.addf %154, %153 : vector<8x32xf32>
    %156 = arith.divf %154, %155 : vector<8x32xf32>
    %157 = arith.mulf %148, %123 : vector<8x32xf32>
    %158 = arith.mulf %142, %150 : vector<8x32xf32>
    %159 = arith.addf %157, %158 : vector<8x32xf32>
    %160 = math.tanh %159 : vector<8x32xf32>
    %161 = arith.mulf %156, %160 : vector<8x32xf32>
    %162 = arith.truncf %161 : vector<8x32xf32> to vector<8x32xbf16>
    %cst_82 = arith.constant dense<0.000000e+00> : vector<8x128xf32>
    %163 = tpu.matmul %162, %115, %cst_82 {dimension_numbers = #tpu.dot_dimension_numbers<[1], [0], [0], [1], [0, 0, 1, 1], [], []>} : vector<8x32xbf16>, vector<32x128xbf16>, vector<8x128xf32> -> vector<8x128xf32>
    %164 = arith.addf %163, %111 : vector<8x128xf32>
    %165 = arith.addf %164, %128 : vector<8x128xf32>
    %166 = vector.extract_strided_slice %165 {offsets = [0, 0], sizes = [8, 32], strides = [1, 1]} : vector<8x128xf32> to vector<8x32xf32>
    %167 = arith.negf %166 : vector<8x32xf32>
    %168 = math.exp %167 : vector<8x32xf32>
    %cst_83 = arith.constant 1.000000e+00 : f32
    %169 = vector.broadcast %cst_83 : f32 to vector<8x32xf32>
    %170 = arith.addf %169, %168 : vector<8x32xf32>
    %171 = arith.divf %169, %170 : vector<8x32xf32>
    %172 = vector.extract_strided_slice %165 {offsets = [0, 32], sizes = [8, 32], strides = [1, 1]} : vector<8x128xf32> to vector<8x32xf32>
    %173 = arith.negf %172 : vector<8x32xf32>
    %174 = math.exp %173 : vector<8x32xf32>
    %cst_84 = arith.constant 1.000000e+00 : f32
    %175 = vector.broadcast %cst_84 : f32 to vector<8x32xf32>
    %176 = arith.addf %175, %174 : vector<8x32xf32>
    %177 = arith.divf %175, %176 : vector<8x32xf32>
    %178 = vector.extract_strided_slice %165 {offsets = [0, 64], sizes = [8, 32], strides = [1, 1]} : vector<8x128xf32> to vector<8x32xf32>
    %179 = math.tanh %178 : vector<8x32xf32>
    %180 = vector.extract_strided_slice %165 {offsets = [0, 96], sizes = [8, 32], strides = [1, 1]} : vector<8x128xf32> to vector<8x32xf32>
    %181 = arith.negf %180 : vector<8x32xf32>
    %182 = math.exp %181 : vector<8x32xf32>
    %cst_85 = arith.constant 1.000000e+00 : f32
    %183 = vector.broadcast %cst_85 : f32 to vector<8x32xf32>
    %184 = arith.addf %183, %182 : vector<8x32xf32>
    %185 = arith.divf %183, %184 : vector<8x32xf32>
    %186 = arith.mulf %177, %125 : vector<8x32xf32>
    %187 = arith.mulf %171, %179 : vector<8x32xf32>
    %188 = arith.addf %186, %187 : vector<8x32xf32>
    %189 = math.tanh %188 : vector<8x32xf32>
    %190 = arith.mulf %185, %189 : vector<8x32xf32>
    %191 = arith.truncf %190 : vector<8x32xf32> to vector<8x32xbf16>
    %cst_86 = arith.constant dense<0.000000e+00> : vector<8x256xf32>
    %192 = tpu.matmul %191, %117, %cst_86 {dimension_numbers = #tpu.dot_dimension_numbers<[1], [0], [0], [1], [0, 0, 1, 1], [], []>} : vector<8x32xbf16>, vector<32x256xbf16>, vector<8x256xf32> -> vector<8x256xf32>
    %193 = vector.extract_strided_slice %192 {offsets = [0, 0], sizes = [8, 128], strides = [1, 1]} : vector<8x256xf32> to vector<8x128xf32>
    %194 = vector.extract_strided_slice %192 {offsets = [0, 128], sizes = [8, 128], strides = [1, 1]} : vector<8x256xf32> to vector<8x128xf32>
    %195 = arith.addf %194, %114 : vector<8x128xf32>
    %c0_87 = arith.constant 0 : index
    %c0_88 = arith.constant 0 : index
    %c0_89 = arith.constant 0 : index
    %196 = vector.load %arg20[%c0_87, %c0_88, %c0_89] : memref<8x8x128xf32, #tpu.memory_space<vmem>>, vector<1x8x128xf32>
    %197 = vector.shape_cast %196 : vector<1x8x128xf32> to vector<8x128xf32>
    %198 = vector.shape_cast %195 : vector<8x128xf32> to vector<1x8x128xf32>
    tpu.vector_store %arg20[%c0_87, %c0_88, %c0_89], %198 {strides = array<i32>} : memref<8x8x128xf32, #tpu.memory_space<vmem>>, vector<1x8x128xf32>,
    %199 = vector.extract_strided_slice %105 {offsets = [0, 0], sizes = [2, 128], strides = [1, 1]} : vector<8x128xf32> to vector<2x128xf32>
    %200 = tpu.concatenate %199, %199, %199, %199 in 0 : vector<2x128xf32>, vector<2x128xf32>, vector<2x128xf32>, vector<2x128xf32> -> vector<8x128xf32>
    %201 = vector.extract_strided_slice %102 {offsets = [8, 0], sizes = [8, 128], strides = [1, 1]} : vector<64x128xf32> to vector<8x128xf32>
    %202 = arith.addf %201, %200 : vector<8x128xf32>
    %203 = arith.addf %202, %108 : vector<8x128xf32>
    %204 = arith.truncf %161 : vector<8x32xf32> to vector<8x32xbf16>
    %cst_90 = arith.constant dense<0.000000e+00> : vector<8x128xf32>
    %205 = tpu.matmul %204, %116, %cst_90 {dimension_numbers = #tpu.dot_dimension_numbers<[1], [0], [0], [1], [0, 0, 1, 1], [], []>} : vector<8x32xbf16>, vector<32x128xbf16>, vector<8x128xf32> -> vector<8x128xf32>
    %206 = arith.addf %203, %205 : vector<8x128xf32>
    %207 = vector.extract_strided_slice %206 {offsets = [0, 0], sizes = [8, 32], strides = [1, 1]} : vector<8x128xf32> to vector<8x32xf32>
    %208 = arith.negf %207 : vector<8x32xf32>
    %209 = math.exp %208 : vector<8x32xf32>
    %cst_91 = arith.constant 1.000000e+00 : f32
    %210 = vector.broadcast %cst_91 : f32 to vector<8x32xf32>
    %211 = arith.addf %210, %209 : vector<8x32xf32>
    %212 = arith.divf %210, %211 : vector<8x32xf32>
    %213 = vector.extract_strided_slice %206 {offsets = [0, 32], sizes = [8, 32], strides = [1, 1]} : vector<8x128xf32> to vector<8x32xf32>
    %214 = arith.negf %213 : vector<8x32xf32>
    %215 = math.exp %214 : vector<8x32xf32>
    %cst_92 = arith.constant 1.000000e+00 : f32
    %216 = vector.broadcast %cst_92 : f32 to vector<8x32xf32>
    %217 = arith.addf %216, %215 : vector<8x32xf32>
    %218 = arith.divf %216, %217 : vector<8x32xf32>
    %219 = vector.extract_strided_slice %206 {offsets = [0, 64], sizes = [8, 32], strides = [1, 1]} : vector<8x128xf32> to vector<8x32xf32>
    %220 = math.tanh %219 : vector<8x32xf32>
    %221 = vector.extract_strided_slice %206 {offsets = [0, 96], sizes = [8, 32], strides = [1, 1]} : vector<8x128xf32> to vector<8x32xf32>
    %222 = arith.negf %221 : vector<8x32xf32>
    %223 = math.exp %222 : vector<8x32xf32>
    %cst_93 = arith.constant 1.000000e+00 : f32
    %224 = vector.broadcast %cst_93 : f32 to vector<8x32xf32>
    %225 = arith.addf %224, %223 : vector<8x32xf32>
    %226 = arith.divf %224, %225 : vector<8x32xf32>
    %227 = arith.mulf %218, %159 : vector<8x32xf32>
    %228 = arith.mulf %212, %220 : vector<8x32xf32>
    %229 = arith.addf %227, %228 : vector<8x32xf32>
    %230 = math.tanh %229 : vector<8x32xf32>
    %231 = arith.mulf %226, %230 : vector<8x32xf32>
    %232 = arith.truncf %231 : vector<8x32xf32> to vector<8x32xbf16>
    %cst_94 = arith.constant dense<0.000000e+00> : vector<8x128xf32>
    %233 = tpu.matmul %232, %115, %cst_94 {dimension_numbers = #tpu.dot_dimension_numbers<[1], [0], [0], [1], [0, 0, 1, 1], [], []>} : vector<8x32xbf16>, vector<32x128xbf16>, vector<8x128xf32> -> vector<8x128xf32>
    %234 = arith.addf %233, %111 : vector<8x128xf32>
    %235 = arith.addf %234, %193 : vector<8x128xf32>
    %236 = vector.extract_strided_slice %235 {offsets = [0, 0], sizes = [8, 32], strides = [1, 1]} : vector<8x128xf32> to vector<8x32xf32>
    %237 = arith.negf %236 : vector<8x32xf32>
    %238 = math.exp %237 : vector<8x32xf32>
    %cst_95 = arith.constant 1.000000e+00 : f32
    %239 = vector.broadcast %cst_95 : f32 to vector<8x32xf32>
    %240 = arith.addf %239, %238 : vector<8x32xf32>
    %241 = arith.divf %239, %240 : vector<8x32xf32>
    %242 = vector.extract_strided_slice %235 {offsets = [0, 32], sizes = [8, 32], strides = [1, 1]} : vector<8x128xf32> to vector<8x32xf32>
    %243 = arith.negf %242 : vector<8x32xf32>
    %244 = math.exp %243 : vector<8x32xf32>
    %cst_96 = arith.constant 1.000000e+00 : f32
    %245 = vector.broadcast %cst_96 : f32 to vector<8x32xf32>
    %246 = arith.addf %245, %244 : vector<8x32xf32>
    %247 = arith.divf %245, %246 : vector<8x32xf32>
    %248 = vector.extract_strided_slice %235 {offsets = [0, 64], sizes = [8, 32], strides = [1, 1]} : vector<8x128xf32> to vector<8x32xf32>
    %249 = math.tanh %248 : vector<8x32xf32>
    %250 = vector.extract_strided_slice %235 {offsets = [0, 96], sizes = [8, 32], strides = [1, 1]} : vector<8x128xf32> to vector<8x32xf32>
    %251 = arith.negf %250 : vector<8x32xf32>
    %252 = math.exp %251 : vector<8x32xf32>
    %cst_97 = arith.constant 1.000000e+00 : f32
    %253 = vector.broadcast %cst_97 : f32 to vector<8x32xf32>
    %254 = arith.addf %253, %252 : vector<8x32xf32>
    %255 = arith.divf %253, %254 : vector<8x32xf32>
    %256 = arith.mulf %247, %188 : vector<8x32xf32>
    %257 = arith.mulf %241, %249 : vector<8x32xf32>
    %258 = arith.addf %256, %257 : vector<8x32xf32>
    %259 = math.tanh %258 : vector<8x32xf32>
    %260 = arith.mulf %255, %259 : vector<8x32xf32>
    %261 = arith.truncf %260 : vector<8x32xf32> to vector<8x32xbf16>
    %cst_98 = arith.constant dense<0.000000e+00> : vector<8x256xf32>
    %262 = tpu.matmul %261, %117, %cst_98 {dimension_numbers = #tpu.dot_dimension_numbers<[1], [0], [0], [1], [0, 0, 1, 1], [], []>} : vector<8x32xbf16>, vector<32x256xbf16>, vector<8x256xf32> -> vector<8x256xf32>
    %263 = vector.extract_strided_slice %262 {offsets = [0, 0], sizes = [8, 128], strides = [1, 1]} : vector<8x256xf32> to vector<8x128xf32>
    %264 = vector.extract_strided_slice %262 {offsets = [0, 128], sizes = [8, 128], strides = [1, 1]} : vector<8x256xf32> to vector<8x128xf32>
    %265 = arith.addf %264, %114 : vector<8x128xf32>
    %c1_99 = arith.constant 1 : index
    %c0_100 = arith.constant 0 : index
    %c0_101 = arith.constant 0 : index
    %266 = vector.load %arg20[%c1_99, %c0_100, %c0_101] : memref<8x8x128xf32, #tpu.memory_space<vmem>>, vector<1x8x128xf32>
    %267 = vector.shape_cast %266 : vector<1x8x128xf32> to vector<8x128xf32>
    %268 = vector.shape_cast %265 : vector<8x128xf32> to vector<1x8x128xf32>
    tpu.vector_store %arg20[%c1_99, %c0_100, %c0_101], %268 {strides = array<i32>} : memref<8x8x128xf32, #tpu.memory_space<vmem>>, vector<1x8x128xf32>,
    %269 = vector.extract_strided_slice %105 {offsets = [2, 0], sizes = [2, 128], strides = [1, 1]} : vector<8x128xf32> to vector<2x128xf32>
    %270 = tpu.concatenate %269, %269, %269, %269 in 0 : vector<2x128xf32>, vector<2x128xf32>, vector<2x128xf32>, vector<2x128xf32> -> vector<8x128xf32>
    %271 = vector.extract_strided_slice %102 {offsets = [16, 0], sizes = [8, 128], strides = [1, 1]} : vector<64x128xf32> to vector<8x128xf32>
    %272 = arith.addf %271, %270 : vector<8x128xf32>
    %273 = arith.addf %272, %108 : vector<8x128xf32>
    %274 = arith.truncf %231 : vector<8x32xf32> to vector<8x32xbf16>
    %cst_102 = arith.constant dense<0.000000e+00> : vector<8x128xf32>
    %275 = tpu.matmul %274, %116, %cst_102 {dimension_numbers = #tpu.dot_dimension_numbers<[1], [0], [0], [1], [0, 0, 1, 1], [], []>} : vector<8x32xbf16>, vector<32x128xbf16>, vector<8x128xf32> -> vector<8x128xf32>
    %276 = arith.addf %273, %275 : vector<8x128xf32>
    %277 = vector.extract_strided_slice %276 {offsets = [0, 0], sizes = [8, 32], strides = [1, 1]} : vector<8x128xf32> to vector<8x32xf32>
    %278 = arith.negf %277 : vector<8x32xf32>
    %279 = math.exp %278 : vector<8x32xf32>
    %cst_103 = arith.constant 1.000000e+00 : f32
    %280 = vector.broadcast %cst_103 : f32 to vector<8x32xf32>
    %281 = arith.addf %280, %279 : vector<8x32xf32>
    %282 = arith.divf %280, %281 : vector<8x32xf32>
    %283 = vector.extract_strided_slice %276 {offsets = [0, 32], sizes = [8, 32], strides = [1, 1]} : vector<8x128xf32> to vector<8x32xf32>
    %284 = arith.negf %283 : vector<8x32xf32>
    %285 = math.exp %284 : vector<8x32xf32>
    %cst_104 = arith.constant 1.000000e+00 : f32
    %286 = vector.broadcast %cst_104 : f32 to vector<8x32xf32>
    %287 = arith.addf %286, %285 : vector<8x32xf32>
    %288 = arith.divf %286, %287 : vector<8x32xf32>
    %289 = vector.extract_strided_slice %276 {offsets = [0, 64], sizes = [8, 32], strides = [1, 1]} : vector<8x128xf32> to vector<8x32xf32>
    %290 = math.tanh %289 : vector<8x32xf32>
    %291 = vector.extract_strided_slice %276 {offsets = [0, 96], sizes = [8, 32], strides = [1, 1]} : vector<8x128xf32> to vector<8x32xf32>
    %292 = arith.negf %291 : vector<8x32xf32>
    %293 = math.exp %292 : vector<8x32xf32>
    %cst_105 = arith.constant 1.000000e+00 : f32
    %294 = vector.broadcast %cst_105 : f32 to vector<8x32xf32>
    %295 = arith.addf %294, %293 : vector<8x32xf32>
    %296 = arith.divf %294, %295 : vector<8x32xf32>
    %297 = arith.mulf %288, %229 : vector<8x32xf32>
    %298 = arith.mulf %282, %290 : vector<8x32xf32>
    %299 = arith.addf %297, %298 : vector<8x32xf32>
    %300 = math.tanh %299 : vector<8x32xf32>
    %301 = arith.mulf %296, %300 : vector<8x32xf32>
    %302 = arith.truncf %301 : vector<8x32xf32> to vector<8x32xbf16>
    %cst_106 = arith.constant dense<0.000000e+00> : vector<8x128xf32>
    %303 = tpu.matmul %302, %115, %cst_106 {dimension_numbers = #tpu.dot_dimension_numbers<[1], [0], [0], [1], [0, 0, 1, 1], [], []>} : vector<8x32xbf16>, vector<32x128xbf16>, vector<8x128xf32> -> vector<8x128xf32>
    %304 = arith.addf %303, %111 : vector<8x128xf32>
    %305 = arith.addf %304, %263 : vector<8x128xf32>
    %306 = vector.extract_strided_slice %305 {offsets = [0, 0], sizes = [8, 32], strides = [1, 1]} : vector<8x128xf32> to vector<8x32xf32>
    %307 = arith.negf %306 : vector<8x32xf32>
    %308 = math.exp %307 : vector<8x32xf32>
    %cst_107 = arith.constant 1.000000e+00 : f32
    %309 = vector.broadcast %cst_107 : f32 to vector<8x32xf32>
    %310 = arith.addf %309, %308 : vector<8x32xf32>
    %311 = arith.divf %309, %310 : vector<8x32xf32>
    %312 = vector.extract_strided_slice %305 {offsets = [0, 32], sizes = [8, 32], strides = [1, 1]} : vector<8x128xf32> to vector<8x32xf32>
    %313 = arith.negf %312 : vector<8x32xf32>
    %314 = math.exp %313 : vector<8x32xf32>
    %cst_108 = arith.constant 1.000000e+00 : f32
    %315 = vector.broadcast %cst_108 : f32 to vector<8x32xf32>
    %316 = arith.addf %315, %314 : vector<8x32xf32>
    %317 = arith.divf %315, %316 : vector<8x32xf32>
    %318 = vector.extract_strided_slice %305 {offsets = [0, 64], sizes = [8, 32], strides = [1, 1]} : vector<8x128xf32> to vector<8x32xf32>
    %319 = math.tanh %318 : vector<8x32xf32>
    %320 = vector.extract_strided_slice %305 {offsets = [0, 96], sizes = [8, 32], strides = [1, 1]} : vector<8x128xf32> to vector<8x32xf32>
    %321 = arith.negf %320 : vector<8x32xf32>
    %322 = math.exp %321 : vector<8x32xf32>
    %cst_109 = arith.constant 1.000000e+00 : f32
    %323 = vector.broadcast %cst_109 : f32 to vector<8x32xf32>
    %324 = arith.addf %323, %322 : vector<8x32xf32>
    %325 = arith.divf %323, %324 : vector<8x32xf32>
    %326 = arith.mulf %317, %258 : vector<8x32xf32>
    %327 = arith.mulf %311, %319 : vector<8x32xf32>
    %328 = arith.addf %326, %327 : vector<8x32xf32>
    %329 = math.tanh %328 : vector<8x32xf32>
    %330 = arith.mulf %325, %329 : vector<8x32xf32>
    %331 = arith.truncf %330 : vector<8x32xf32> to vector<8x32xbf16>
    %cst_110 = arith.constant dense<0.000000e+00> : vector<8x256xf32>
    %332 = tpu.matmul %331, %117, %cst_110 {dimension_numbers = #tpu.dot_dimension_numbers<[1], [0], [0], [1], [0, 0, 1, 1], [], []>} : vector<8x32xbf16>, vector<32x256xbf16>, vector<8x256xf32> -> vector<8x256xf32>
    %333 = vector.extract_strided_slice %332 {offsets = [0, 0], sizes = [8, 128], strides = [1, 1]} : vector<8x256xf32> to vector<8x128xf32>
    %334 = vector.extract_strided_slice %332 {offsets = [0, 128], sizes = [8, 128], strides = [1, 1]} : vector<8x256xf32> to vector<8x128xf32>
    %335 = arith.addf %334, %114 : vector<8x128xf32>
    %c2 = arith.constant 2 : index
    %c0_111 = arith.constant 0 : index
    %c0_112 = arith.constant 0 : index
    %336 = vector.load %arg20[%c2, %c0_111, %c0_112] : memref<8x8x128xf32, #tpu.memory_space<vmem>>, vector<1x8x128xf32>
    %337 = vector.shape_cast %336 : vector<1x8x128xf32> to vector<8x128xf32>
    %338 = vector.shape_cast %335 : vector<8x128xf32> to vector<1x8x128xf32>
    tpu.vector_store %arg20[%c2, %c0_111, %c0_112], %338 {strides = array<i32>} : memref<8x8x128xf32, #tpu.memory_space<vmem>>, vector<1x8x128xf32>,
    %339 = vector.extract_strided_slice %105 {offsets = [2, 0], sizes = [2, 128], strides = [1, 1]} : vector<8x128xf32> to vector<2x128xf32>
    %340 = tpu.concatenate %339, %339, %339, %339 in 0 : vector<2x128xf32>, vector<2x128xf32>, vector<2x128xf32>, vector<2x128xf32> -> vector<8x128xf32>
    %341 = vector.extract_strided_slice %102 {offsets = [24, 0], sizes = [8, 128], strides = [1, 1]} : vector<64x128xf32> to vector<8x128xf32>
    %342 = arith.addf %341, %340 : vector<8x128xf32>
    %343 = arith.addf %342, %108 : vector<8x128xf32>
    %344 = arith.truncf %301 : vector<8x32xf32> to vector<8x32xbf16>
    %cst_113 = arith.constant dense<0.000000e+00> : vector<8x128xf32>
    %345 = tpu.matmul %344, %116, %cst_113 {dimension_numbers = #tpu.dot_dimension_numbers<[1], [0], [0], [1], [0, 0, 1, 1], [], []>} : vector<8x32xbf16>, vector<32x128xbf16>, vector<8x128xf32> -> vector<8x128xf32>
    %346 = arith.addf %343, %345 : vector<8x128xf32>
    %347 = vector.extract_strided_slice %346 {offsets = [0, 0], sizes = [8, 32], strides = [1, 1]} : vector<8x128xf32> to vector<8x32xf32>
    %348 = arith.negf %347 : vector<8x32xf32>
    %349 = math.exp %348 : vector<8x32xf32>
    %cst_114 = arith.constant 1.000000e+00 : f32
    %350 = vector.broadcast %cst_114 : f32 to vector<8x32xf32>
    %351 = arith.addf %350, %349 : vector<8x32xf32>
    %352 = arith.divf %350, %351 : vector<8x32xf32>
    %353 = vector.extract_strided_slice %346 {offsets = [0, 32], sizes = [8, 32], strides = [1, 1]} : vector<8x128xf32> to vector<8x32xf32>
    %354 = arith.negf %353 : vector<8x32xf32>
    %355 = math.exp %354 : vector<8x32xf32>
    %cst_115 = arith.constant 1.000000e+00 : f32
    %356 = vector.broadcast %cst_115 : f32 to vector<8x32xf32>
    %357 = arith.addf %356, %355 : vector<8x32xf32>
    %358 = arith.divf %356, %357 : vector<8x32xf32>
    %359 = vector.extract_strided_slice %346 {offsets = [0, 64], sizes = [8, 32], strides = [1, 1]} : vector<8x128xf32> to vector<8x32xf32>
    %360 = math.tanh %359 : vector<8x32xf32>
    %361 = vector.extract_strided_slice %346 {offsets = [0, 96], sizes = [8, 32], strides = [1, 1]} : vector<8x128xf32> to vector<8x32xf32>
    %362 = arith.negf %361 : vector<8x32xf32>
    %363 = math.exp %362 : vector<8x32xf32>
    %cst_116 = arith.constant 1.000000e+00 : f32
    %364 = vector.broadcast %cst_116 : f32 to vector<8x32xf32>
    %365 = arith.addf %364, %363 : vector<8x32xf32>
    %366 = arith.divf %364, %365 : vector<8x32xf32>
    %367 = arith.mulf %358, %299 : vector<8x32xf32>
    %368 = arith.mulf %352, %360 : vector<8x32xf32>
    %369 = arith.addf %367, %368 : vector<8x32xf32>
    %370 = math.tanh %369 : vector<8x32xf32>
    %371 = arith.mulf %366, %370 : vector<8x32xf32>
    %372 = arith.truncf %371 : vector<8x32xf32> to vector<8x32xbf16>
    %cst_117 = arith.constant dense<0.000000e+00> : vector<8x128xf32>
    %373 = tpu.matmul %372, %115, %cst_117 {dimension_numbers = #tpu.dot_dimension_numbers<[1], [0], [0], [1], [0, 0, 1, 1], [], []>} : vector<8x32xbf16>, vector<32x128xbf16>, vector<8x128xf32> -> vector<8x128xf32>
    %374 = arith.addf %373, %111 : vector<8x128xf32>
    %375 = arith.addf %374, %333 : vector<8x128xf32>
    %376 = vector.extract_strided_slice %375 {offsets = [0, 0], sizes = [8, 32], strides = [1, 1]} : vector<8x128xf32> to vector<8x32xf32>
    %377 = arith.negf %376 : vector<8x32xf32>
    %378 = math.exp %377 : vector<8x32xf32>
    %cst_118 = arith.constant 1.000000e+00 : f32
    %379 = vector.broadcast %cst_118 : f32 to vector<8x32xf32>
    %380 = arith.addf %379, %378 : vector<8x32xf32>
    %381 = arith.divf %379, %380 : vector<8x32xf32>
    %382 = vector.extract_strided_slice %375 {offsets = [0, 32], sizes = [8, 32], strides = [1, 1]} : vector<8x128xf32> to vector<8x32xf32>
    %383 = arith.negf %382 : vector<8x32xf32>
    %384 = math.exp %383 : vector<8x32xf32>
    %cst_119 = arith.constant 1.000000e+00 : f32
    %385 = vector.broadcast %cst_119 : f32 to vector<8x32xf32>
    %386 = arith.addf %385, %384 : vector<8x32xf32>
    %387 = arith.divf %385, %386 : vector<8x32xf32>
    %388 = vector.extract_strided_slice %375 {offsets = [0, 64], sizes = [8, 32], strides = [1, 1]} : vector<8x128xf32> to vector<8x32xf32>
    %389 = math.tanh %388 : vector<8x32xf32>
    %390 = vector.extract_strided_slice %375 {offsets = [0, 96], sizes = [8, 32], strides = [1, 1]} : vector<8x128xf32> to vector<8x32xf32>
    %391 = arith.negf %390 : vector<8x32xf32>
    %392 = math.exp %391 : vector<8x32xf32>
    %cst_120 = arith.constant 1.000000e+00 : f32
    %393 = vector.broadcast %cst_120 : f32 to vector<8x32xf32>
    %394 = arith.addf %393, %392 : vector<8x32xf32>
    %395 = arith.divf %393, %394 : vector<8x32xf32>
    %396 = arith.mulf %387, %328 : vector<8x32xf32>
    %397 = arith.mulf %381, %389 : vector<8x32xf32>
    %398 = arith.addf %396, %397 : vector<8x32xf32>
    %399 = math.tanh %398 : vector<8x32xf32>
    %400 = arith.mulf %395, %399 : vector<8x32xf32>
    %401 = arith.truncf %400 : vector<8x32xf32> to vector<8x32xbf16>
    %cst_121 = arith.constant dense<0.000000e+00> : vector<8x256xf32>
    %402 = tpu.matmul %401, %117, %cst_121 {dimension_numbers = #tpu.dot_dimension_numbers<[1], [0], [0], [1], [0, 0, 1, 1], [], []>} : vector<8x32xbf16>, vector<32x256xbf16>, vector<8x256xf32> -> vector<8x256xf32>
    %403 = vector.extract_strided_slice %402 {offsets = [0, 0], sizes = [8, 128], strides = [1, 1]} : vector<8x256xf32> to vector<8x128xf32>
    %404 = vector.extract_strided_slice %402 {offsets = [0, 128], sizes = [8, 128], strides = [1, 1]} : vector<8x256xf32> to vector<8x128xf32>
    %405 = arith.addf %404, %114 : vector<8x128xf32>
    %c3 = arith.constant 3 : index
    %c0_122 = arith.constant 0 : index
    %c0_123 = arith.constant 0 : index
    %406 = vector.load %arg20[%c3, %c0_122, %c0_123] : memref<8x8x128xf32, #tpu.memory_space<vmem>>, vector<1x8x128xf32>
    %407 = vector.shape_cast %406 : vector<1x8x128xf32> to vector<8x128xf32>
    %408 = vector.shape_cast %405 : vector<8x128xf32> to vector<1x8x128xf32>
    tpu.vector_store %arg20[%c3, %c0_122, %c0_123], %408 {strides = array<i32>} : memref<8x8x128xf32, #tpu.memory_space<vmem>>, vector<1x8x128xf32>,
    %409 = vector.extract_strided_slice %105 {offsets = [4, 0], sizes = [2, 128], strides = [1, 1]} : vector<8x128xf32> to vector<2x128xf32>
    %410 = tpu.concatenate %409, %409, %409, %409 in 0 : vector<2x128xf32>, vector<2x128xf32>, vector<2x128xf32>, vector<2x128xf32> -> vector<8x128xf32>
    %411 = vector.extract_strided_slice %102 {offsets = [32, 0], sizes = [8, 128], strides = [1, 1]} : vector<64x128xf32> to vector<8x128xf32>
    %412 = arith.addf %411, %410 : vector<8x128xf32>
    %413 = arith.addf %412, %108 : vector<8x128xf32>
    %414 = arith.truncf %371 : vector<8x32xf32> to vector<8x32xbf16>
    %cst_124 = arith.constant dense<0.000000e+00> : vector<8x128xf32>
    %415 = tpu.matmul %414, %116, %cst_124 {dimension_numbers = #tpu.dot_dimension_numbers<[1], [0], [0], [1], [0, 0, 1, 1], [], []>} : vector<8x32xbf16>, vector<32x128xbf16>, vector<8x128xf32> -> vector<8x128xf32>
    %416 = arith.addf %413, %415 : vector<8x128xf32>
    %417 = vector.extract_strided_slice %416 {offsets = [0, 0], sizes = [8, 32], strides = [1, 1]} : vector<8x128xf32> to vector<8x32xf32>
    %418 = arith.negf %417 : vector<8x32xf32>
    %419 = math.exp %418 : vector<8x32xf32>
    %cst_125 = arith.constant 1.000000e+00 : f32
    %420 = vector.broadcast %cst_125 : f32 to vector<8x32xf32>
    %421 = arith.addf %420, %419 : vector<8x32xf32>
    %422 = arith.divf %420, %421 : vector<8x32xf32>
    %423 = vector.extract_strided_slice %416 {offsets = [0, 32], sizes = [8, 32], strides = [1, 1]} : vector<8x128xf32> to vector<8x32xf32>
    %424 = arith.negf %423 : vector<8x32xf32>
    %425 = math.exp %424 : vector<8x32xf32>
    %cst_126 = arith.constant 1.000000e+00 : f32
    %426 = vector.broadcast %cst_126 : f32 to vector<8x32xf32>
    %427 = arith.addf %426, %425 : vector<8x32xf32>
    %428 = arith.divf %426, %427 : vector<8x32xf32>
    %429 = vector.extract_strided_slice %416 {offsets = [0, 64], sizes = [8, 32], strides = [1, 1]} : vector<8x128xf32> to vector<8x32xf32>
    %430 = math.tanh %429 : vector<8x32xf32>
    %431 = vector.extract_strided_slice %416 {offsets = [0, 96], sizes = [8, 32], strides = [1, 1]} : vector<8x128xf32> to vector<8x32xf32>
    %432 = arith.negf %431 : vector<8x32xf32>
    %433 = math.exp %432 : vector<8x32xf32>
    %cst_127 = arith.constant 1.000000e+00 : f32
    %434 = vector.broadcast %cst_127 : f32 to vector<8x32xf32>
    %435 = arith.addf %434, %433 : vector<8x32xf32>
    %436 = arith.divf %434, %435 : vector<8x32xf32>
    %437 = arith.mulf %428, %369 : vector<8x32xf32>
    %438 = arith.mulf %422, %430 : vector<8x32xf32>
    %439 = arith.addf %437, %438 : vector<8x32xf32>
    %440 = math.tanh %439 : vector<8x32xf32>
    %441 = arith.mulf %436, %440 : vector<8x32xf32>
    %442 = arith.truncf %441 : vector<8x32xf32> to vector<8x32xbf16>
    %cst_128 = arith.constant dense<0.000000e+00> : vector<8x128xf32>
    %443 = tpu.matmul %442, %115, %cst_128 {dimension_numbers = #tpu.dot_dimension_numbers<[1], [0], [0], [1], [0, 0, 1, 1], [], []>} : vector<8x32xbf16>, vector<32x128xbf16>, vector<8x128xf32> -> vector<8x128xf32>
    %444 = arith.addf %443, %111 : vector<8x128xf32>
    %445 = arith.addf %444, %403 : vector<8x128xf32>
    %446 = vector.extract_strided_slice %445 {offsets = [0, 0], sizes = [8, 32], strides = [1, 1]} : vector<8x128xf32> to vector<8x32xf32>
    %447 = arith.negf %446 : vector<8x32xf32>
    %448 = math.exp %447 : vector<8x32xf32>
    %cst_129 = arith.constant 1.000000e+00 : f32
    %449 = vector.broadcast %cst_129 : f32 to vector<8x32xf32>
    %450 = arith.addf %449, %448 : vector<8x32xf32>
    %451 = arith.divf %449, %450 : vector<8x32xf32>
    %452 = vector.extract_strided_slice %445 {offsets = [0, 32], sizes = [8, 32], strides = [1, 1]} : vector<8x128xf32> to vector<8x32xf32>
    %453 = arith.negf %452 : vector<8x32xf32>
    %454 = math.exp %453 : vector<8x32xf32>
    %cst_130 = arith.constant 1.000000e+00 : f32
    %455 = vector.broadcast %cst_130 : f32 to vector<8x32xf32>
    %456 = arith.addf %455, %454 : vector<8x32xf32>
    %457 = arith.divf %455, %456 : vector<8x32xf32>
    %458 = vector.extract_strided_slice %445 {offsets = [0, 64], sizes = [8, 32], strides = [1, 1]} : vector<8x128xf32> to vector<8x32xf32>
    %459 = math.tanh %458 : vector<8x32xf32>
    %460 = vector.extract_strided_slice %445 {offsets = [0, 96], sizes = [8, 32], strides = [1, 1]} : vector<8x128xf32> to vector<8x32xf32>
    %461 = arith.negf %460 : vector<8x32xf32>
    %462 = math.exp %461 : vector<8x32xf32>
    %cst_131 = arith.constant 1.000000e+00 : f32
    %463 = vector.broadcast %cst_131 : f32 to vector<8x32xf32>
    %464 = arith.addf %463, %462 : vector<8x32xf32>
    %465 = arith.divf %463, %464 : vector<8x32xf32>
    %466 = arith.mulf %457, %398 : vector<8x32xf32>
    %467 = arith.mulf %451, %459 : vector<8x32xf32>
    %468 = arith.addf %466, %467 : vector<8x32xf32>
    %469 = math.tanh %468 : vector<8x32xf32>
    %470 = arith.mulf %465, %469 : vector<8x32xf32>
    %471 = arith.truncf %470 : vector<8x32xf32> to vector<8x32xbf16>
    %cst_132 = arith.constant dense<0.000000e+00> : vector<8x256xf32>
    %472 = tpu.matmul %471, %117, %cst_132 {dimension_numbers = #tpu.dot_dimension_numbers<[1], [0], [0], [1], [0, 0, 1, 1], [], []>} : vector<8x32xbf16>, vector<32x256xbf16>, vector<8x256xf32> -> vector<8x256xf32>
    %473 = vector.extract_strided_slice %472 {offsets = [0, 0], sizes = [8, 128], strides = [1, 1]} : vector<8x256xf32> to vector<8x128xf32>
    %474 = vector.extract_strided_slice %472 {offsets = [0, 128], sizes = [8, 128], strides = [1, 1]} : vector<8x256xf32> to vector<8x128xf32>
    %475 = arith.addf %474, %114 : vector<8x128xf32>
    %c4 = arith.constant 4 : index
    %c0_133 = arith.constant 0 : index
    %c0_134 = arith.constant 0 : index
    %476 = vector.load %arg20[%c4, %c0_133, %c0_134] : memref<8x8x128xf32, #tpu.memory_space<vmem>>, vector<1x8x128xf32>
    %477 = vector.shape_cast %476 : vector<1x8x128xf32> to vector<8x128xf32>
    %478 = vector.shape_cast %475 : vector<8x128xf32> to vector<1x8x128xf32>
    tpu.vector_store %arg20[%c4, %c0_133, %c0_134], %478 {strides = array<i32>} : memref<8x8x128xf32, #tpu.memory_space<vmem>>, vector<1x8x128xf32>,
    %479 = vector.extract_strided_slice %105 {offsets = [4, 0], sizes = [2, 128], strides = [1, 1]} : vector<8x128xf32> to vector<2x128xf32>
    %480 = tpu.concatenate %479, %479, %479, %479 in 0 : vector<2x128xf32>, vector<2x128xf32>, vector<2x128xf32>, vector<2x128xf32> -> vector<8x128xf32>
    %481 = vector.extract_strided_slice %102 {offsets = [40, 0], sizes = [8, 128], strides = [1, 1]} : vector<64x128xf32> to vector<8x128xf32>
    %482 = arith.addf %481, %480 : vector<8x128xf32>
    %483 = arith.addf %482, %108 : vector<8x128xf32>
    %484 = arith.truncf %441 : vector<8x32xf32> to vector<8x32xbf16>
    %cst_135 = arith.constant dense<0.000000e+00> : vector<8x128xf32>
    %485 = tpu.matmul %484, %116, %cst_135 {dimension_numbers = #tpu.dot_dimension_numbers<[1], [0], [0], [1], [0, 0, 1, 1], [], []>} : vector<8x32xbf16>, vector<32x128xbf16>, vector<8x128xf32> -> vector<8x128xf32>
    %486 = arith.addf %483, %485 : vector<8x128xf32>
    %487 = vector.extract_strided_slice %486 {offsets = [0, 0], sizes = [8, 32], strides = [1, 1]} : vector<8x128xf32> to vector<8x32xf32>
    %488 = arith.negf %487 : vector<8x32xf32>
    %489 = math.exp %488 : vector<8x32xf32>
    %cst_136 = arith.constant 1.000000e+00 : f32
    %490 = vector.broadcast %cst_136 : f32 to vector<8x32xf32>
    %491 = arith.addf %490, %489 : vector<8x32xf32>
    %492 = arith.divf %490, %491 : vector<8x32xf32>
    %493 = vector.extract_strided_slice %486 {offsets = [0, 32], sizes = [8, 32], strides = [1, 1]} : vector<8x128xf32> to vector<8x32xf32>
    %494 = arith.negf %493 : vector<8x32xf32>
    %495 = math.exp %494 : vector<8x32xf32>
    %cst_137 = arith.constant 1.000000e+00 : f32
    %496 = vector.broadcast %cst_137 : f32 to vector<8x32xf32>
    %497 = arith.addf %496, %495 : vector<8x32xf32>
    %498 = arith.divf %496, %497 : vector<8x32xf32>
    %499 = vector.extract_strided_slice %486 {offsets = [0, 64], sizes = [8, 32], strides = [1, 1]} : vector<8x128xf32> to vector<8x32xf32>
    %500 = math.tanh %499 : vector<8x32xf32>
    %501 = vector.extract_strided_slice %486 {offsets = [0, 96], sizes = [8, 32], strides = [1, 1]} : vector<8x128xf32> to vector<8x32xf32>
    %502 = arith.negf %501 : vector<8x32xf32>
    %503 = math.exp %502 : vector<8x32xf32>
    %cst_138 = arith.constant 1.000000e+00 : f32
    %504 = vector.broadcast %cst_138 : f32 to vector<8x32xf32>
    %505 = arith.addf %504, %503 : vector<8x32xf32>
    %506 = arith.divf %504, %505 : vector<8x32xf32>
    %507 = arith.mulf %498, %439 : vector<8x32xf32>
    %508 = arith.mulf %492, %500 : vector<8x32xf32>
    %509 = arith.addf %507, %508 : vector<8x32xf32>
    %510 = math.tanh %509 : vector<8x32xf32>
    %511 = arith.mulf %506, %510 : vector<8x32xf32>
    %512 = arith.truncf %511 : vector<8x32xf32> to vector<8x32xbf16>
    %cst_139 = arith.constant dense<0.000000e+00> : vector<8x128xf32>
    %513 = tpu.matmul %512, %115, %cst_139 {dimension_numbers = #tpu.dot_dimension_numbers<[1], [0], [0], [1], [0, 0, 1, 1], [], []>} : vector<8x32xbf16>, vector<32x128xbf16>, vector<8x128xf32> -> vector<8x128xf32>
    %514 = arith.addf %513, %111 : vector<8x128xf32>
    %515 = arith.addf %514, %473 : vector<8x128xf32>
    %516 = vector.extract_strided_slice %515 {offsets = [0, 0], sizes = [8, 32], strides = [1, 1]} : vector<8x128xf32> to vector<8x32xf32>
    %517 = arith.negf %516 : vector<8x32xf32>
    %518 = math.exp %517 : vector<8x32xf32>
    %cst_140 = arith.constant 1.000000e+00 : f32
    %519 = vector.broadcast %cst_140 : f32 to vector<8x32xf32>
    %520 = arith.addf %519, %518 : vector<8x32xf32>
    %521 = arith.divf %519, %520 : vector<8x32xf32>
    %522 = vector.extract_strided_slice %515 {offsets = [0, 32], sizes = [8, 32], strides = [1, 1]} : vector<8x128xf32> to vector<8x32xf32>
    %523 = arith.negf %522 : vector<8x32xf32>
    %524 = math.exp %523 : vector<8x32xf32>
    %cst_141 = arith.constant 1.000000e+00 : f32
    %525 = vector.broadcast %cst_141 : f32 to vector<8x32xf32>
    %526 = arith.addf %525, %524 : vector<8x32xf32>
    %527 = arith.divf %525, %526 : vector<8x32xf32>
    %528 = vector.extract_strided_slice %515 {offsets = [0, 64], sizes = [8, 32], strides = [1, 1]} : vector<8x128xf32> to vector<8x32xf32>
    %529 = math.tanh %528 : vector<8x32xf32>
    %530 = vector.extract_strided_slice %515 {offsets = [0, 96], sizes = [8, 32], strides = [1, 1]} : vector<8x128xf32> to vector<8x32xf32>
    %531 = arith.negf %530 : vector<8x32xf32>
    %532 = math.exp %531 : vector<8x32xf32>
    %cst_142 = arith.constant 1.000000e+00 : f32
    %533 = vector.broadcast %cst_142 : f32 to vector<8x32xf32>
    %534 = arith.addf %533, %532 : vector<8x32xf32>
    %535 = arith.divf %533, %534 : vector<8x32xf32>
    %536 = arith.mulf %527, %468 : vector<8x32xf32>
    %537 = arith.mulf %521, %529 : vector<8x32xf32>
    %538 = arith.addf %536, %537 : vector<8x32xf32>
    %539 = math.tanh %538 : vector<8x32xf32>
    %540 = arith.mulf %535, %539 : vector<8x32xf32>
    %541 = arith.truncf %540 : vector<8x32xf32> to vector<8x32xbf16>
    %cst_143 = arith.constant dense<0.000000e+00> : vector<8x256xf32>
    %542 = tpu.matmul %541, %117, %cst_143 {dimension_numbers = #tpu.dot_dimension_numbers<[1], [0], [0], [1], [0, 0, 1, 1], [], []>} : vector<8x32xbf16>, vector<32x256xbf16>, vector<8x256xf32> -> vector<8x256xf32>
    %543 = vector.extract_strided_slice %542 {offsets = [0, 0], sizes = [8, 128], strides = [1, 1]} : vector<8x256xf32> to vector<8x128xf32>
    %544 = vector.extract_strided_slice %542 {offsets = [0, 128], sizes = [8, 128], strides = [1, 1]} : vector<8x256xf32> to vector<8x128xf32>
    %545 = arith.addf %544, %114 : vector<8x128xf32>
    %c5 = arith.constant 5 : index
    %c0_144 = arith.constant 0 : index
    %c0_145 = arith.constant 0 : index
    %546 = vector.load %arg20[%c5, %c0_144, %c0_145] : memref<8x8x128xf32, #tpu.memory_space<vmem>>, vector<1x8x128xf32>
    %547 = vector.shape_cast %546 : vector<1x8x128xf32> to vector<8x128xf32>
    %548 = vector.shape_cast %545 : vector<8x128xf32> to vector<1x8x128xf32>
    tpu.vector_store %arg20[%c5, %c0_144, %c0_145], %548 {strides = array<i32>} : memref<8x8x128xf32, #tpu.memory_space<vmem>>, vector<1x8x128xf32>,
    %549 = vector.extract_strided_slice %105 {offsets = [6, 0], sizes = [2, 128], strides = [1, 1]} : vector<8x128xf32> to vector<2x128xf32>
    %550 = tpu.concatenate %549, %549, %549, %549 in 0 : vector<2x128xf32>, vector<2x128xf32>, vector<2x128xf32>, vector<2x128xf32> -> vector<8x128xf32>
    %551 = vector.extract_strided_slice %102 {offsets = [48, 0], sizes = [8, 128], strides = [1, 1]} : vector<64x128xf32> to vector<8x128xf32>
    %552 = arith.addf %551, %550 : vector<8x128xf32>
    %553 = arith.addf %552, %108 : vector<8x128xf32>
    %554 = arith.truncf %511 : vector<8x32xf32> to vector<8x32xbf16>
    %cst_146 = arith.constant dense<0.000000e+00> : vector<8x128xf32>
    %555 = tpu.matmul %554, %116, %cst_146 {dimension_numbers = #tpu.dot_dimension_numbers<[1], [0], [0], [1], [0, 0, 1, 1], [], []>} : vector<8x32xbf16>, vector<32x128xbf16>, vector<8x128xf32> -> vector<8x128xf32>
    %556 = arith.addf %553, %555 : vector<8x128xf32>
    %557 = vector.extract_strided_slice %556 {offsets = [0, 0], sizes = [8, 32], strides = [1, 1]} : vector<8x128xf32> to vector<8x32xf32>
    %558 = arith.negf %557 : vector<8x32xf32>
    %559 = math.exp %558 : vector<8x32xf32>
    %cst_147 = arith.constant 1.000000e+00 : f32
    %560 = vector.broadcast %cst_147 : f32 to vector<8x32xf32>
    %561 = arith.addf %560, %559 : vector<8x32xf32>
    %562 = arith.divf %560, %561 : vector<8x32xf32>
    %563 = vector.extract_strided_slice %556 {offsets = [0, 32], sizes = [8, 32], strides = [1, 1]} : vector<8x128xf32> to vector<8x32xf32>
    %564 = arith.negf %563 : vector<8x32xf32>
    %565 = math.exp %564 : vector<8x32xf32>
    %cst_148 = arith.constant 1.000000e+00 : f32
    %566 = vector.broadcast %cst_148 : f32 to vector<8x32xf32>
    %567 = arith.addf %566, %565 : vector<8x32xf32>
    %568 = arith.divf %566, %567 : vector<8x32xf32>
    %569 = vector.extract_strided_slice %556 {offsets = [0, 64], sizes = [8, 32], strides = [1, 1]} : vector<8x128xf32> to vector<8x32xf32>
    %570 = math.tanh %569 : vector<8x32xf32>
    %571 = vector.extract_strided_slice %556 {offsets = [0, 96], sizes = [8, 32], strides = [1, 1]} : vector<8x128xf32> to vector<8x32xf32>
    %572 = arith.negf %571 : vector<8x32xf32>
    %573 = math.exp %572 : vector<8x32xf32>
    %cst_149 = arith.constant 1.000000e+00 : f32
    %574 = vector.broadcast %cst_149 : f32 to vector<8x32xf32>
    %575 = arith.addf %574, %573 : vector<8x32xf32>
    %576 = arith.divf %574, %575 : vector<8x32xf32>
    %577 = arith.mulf %568, %509 : vector<8x32xf32>
    %578 = arith.mulf %562, %570 : vector<8x32xf32>
    %579 = arith.addf %577, %578 : vector<8x32xf32>
    %580 = math.tanh %579 : vector<8x32xf32>
    %581 = arith.mulf %576, %580 : vector<8x32xf32>
    %582 = arith.truncf %581 : vector<8x32xf32> to vector<8x32xbf16>
    %cst_150 = arith.constant dense<0.000000e+00> : vector<8x128xf32>
    %583 = tpu.matmul %582, %115, %cst_150 {dimension_numbers = #tpu.dot_dimension_numbers<[1], [0], [0], [1], [0, 0, 1, 1], [], []>} : vector<8x32xbf16>, vector<32x128xbf16>, vector<8x128xf32> -> vector<8x128xf32>
    %584 = arith.addf %583, %111 : vector<8x128xf32>
    %585 = arith.addf %584, %543 : vector<8x128xf32>
    %586 = vector.extract_strided_slice %585 {offsets = [0, 0], sizes = [8, 32], strides = [1, 1]} : vector<8x128xf32> to vector<8x32xf32>
    %587 = arith.negf %586 : vector<8x32xf32>
    %588 = math.exp %587 : vector<8x32xf32>
    %cst_151 = arith.constant 1.000000e+00 : f32
    %589 = vector.broadcast %cst_151 : f32 to vector<8x32xf32>
    %590 = arith.addf %589, %588 : vector<8x32xf32>
    %591 = arith.divf %589, %590 : vector<8x32xf32>
    %592 = vector.extract_strided_slice %585 {offsets = [0, 32], sizes = [8, 32], strides = [1, 1]} : vector<8x128xf32> to vector<8x32xf32>
    %593 = arith.negf %592 : vector<8x32xf32>
    %594 = math.exp %593 : vector<8x32xf32>
    %cst_152 = arith.constant 1.000000e+00 : f32
    %595 = vector.broadcast %cst_152 : f32 to vector<8x32xf32>
    %596 = arith.addf %595, %594 : vector<8x32xf32>
    %597 = arith.divf %595, %596 : vector<8x32xf32>
    %598 = vector.extract_strided_slice %585 {offsets = [0, 64], sizes = [8, 32], strides = [1, 1]} : vector<8x128xf32> to vector<8x32xf32>
    %599 = math.tanh %598 : vector<8x32xf32>
    %600 = vector.extract_strided_slice %585 {offsets = [0, 96], sizes = [8, 32], strides = [1, 1]} : vector<8x128xf32> to vector<8x32xf32>
    %601 = arith.negf %600 : vector<8x32xf32>
    %602 = math.exp %601 : vector<8x32xf32>
    %cst_153 = arith.constant 1.000000e+00 : f32
    %603 = vector.broadcast %cst_153 : f32 to vector<8x32xf32>
    %604 = arith.addf %603, %602 : vector<8x32xf32>
    %605 = arith.divf %603, %604 : vector<8x32xf32>
    %606 = arith.mulf %597, %538 : vector<8x32xf32>
    %607 = arith.mulf %591, %599 : vector<8x32xf32>
    %608 = arith.addf %606, %607 : vector<8x32xf32>
    %609 = math.tanh %608 : vector<8x32xf32>
    %610 = arith.mulf %605, %609 : vector<8x32xf32>
    %611 = arith.truncf %610 : vector<8x32xf32> to vector<8x32xbf16>
    %cst_154 = arith.constant dense<0.000000e+00> : vector<8x256xf32>
    %612 = tpu.matmul %611, %117, %cst_154 {dimension_numbers = #tpu.dot_dimension_numbers<[1], [0], [0], [1], [0, 0, 1, 1], [], []>} : vector<8x32xbf16>, vector<32x256xbf16>, vector<8x256xf32> -> vector<8x256xf32>
    %613 = vector.extract_strided_slice %612 {offsets = [0, 0], sizes = [8, 128], strides = [1, 1]} : vector<8x256xf32> to vector<8x128xf32>
    %614 = vector.extract_strided_slice %612 {offsets = [0, 128], sizes = [8, 128], strides = [1, 1]} : vector<8x256xf32> to vector<8x128xf32>
    %615 = arith.addf %614, %114 : vector<8x128xf32>
    %c6 = arith.constant 6 : index
    %c0_155 = arith.constant 0 : index
    %c0_156 = arith.constant 0 : index
    %616 = vector.load %arg20[%c6, %c0_155, %c0_156] : memref<8x8x128xf32, #tpu.memory_space<vmem>>, vector<1x8x128xf32>
    %617 = vector.shape_cast %616 : vector<1x8x128xf32> to vector<8x128xf32>
    %618 = vector.shape_cast %615 : vector<8x128xf32> to vector<1x8x128xf32>
    tpu.vector_store %arg20[%c6, %c0_155, %c0_156], %618 {strides = array<i32>} : memref<8x8x128xf32, #tpu.memory_space<vmem>>, vector<1x8x128xf32>,
    %619 = vector.extract_strided_slice %105 {offsets = [6, 0], sizes = [2, 128], strides = [1, 1]} : vector<8x128xf32> to vector<2x128xf32>
    %620 = tpu.concatenate %619, %619, %619, %619 in 0 : vector<2x128xf32>, vector<2x128xf32>, vector<2x128xf32>, vector<2x128xf32> -> vector<8x128xf32>
    %621 = vector.extract_strided_slice %102 {offsets = [56, 0], sizes = [8, 128], strides = [1, 1]} : vector<64x128xf32> to vector<8x128xf32>
    %622 = arith.addf %621, %620 : vector<8x128xf32>
    %623 = arith.addf %622, %108 : vector<8x128xf32>
    %624 = arith.truncf %581 : vector<8x32xf32> to vector<8x32xbf16>
    %cst_157 = arith.constant dense<0.000000e+00> : vector<8x128xf32>
    %625 = tpu.matmul %624, %116, %cst_157 {dimension_numbers = #tpu.dot_dimension_numbers<[1], [0], [0], [1], [0, 0, 1, 1], [], []>} : vector<8x32xbf16>, vector<32x128xbf16>, vector<8x128xf32> -> vector<8x128xf32>
    %626 = arith.addf %623, %625 : vector<8x128xf32>
    %627 = vector.extract_strided_slice %626 {offsets = [0, 0], sizes = [8, 32], strides = [1, 1]} : vector<8x128xf32> to vector<8x32xf32>
    %628 = arith.negf %627 : vector<8x32xf32>
    %629 = math.exp %628 : vector<8x32xf32>
    %cst_158 = arith.constant 1.000000e+00 : f32
    %630 = vector.broadcast %cst_158 : f32 to vector<8x32xf32>
    %631 = arith.addf %630, %629 : vector<8x32xf32>
    %632 = arith.divf %630, %631 : vector<8x32xf32>
    %633 = vector.extract_strided_slice %626 {offsets = [0, 32], sizes = [8, 32], strides = [1, 1]} : vector<8x128xf32> to vector<8x32xf32>
    %634 = arith.negf %633 : vector<8x32xf32>
    %635 = math.exp %634 : vector<8x32xf32>
    %cst_159 = arith.constant 1.000000e+00 : f32
    %636 = vector.broadcast %cst_159 : f32 to vector<8x32xf32>
    %637 = arith.addf %636, %635 : vector<8x32xf32>
    %638 = arith.divf %636, %637 : vector<8x32xf32>
    %639 = vector.extract_strided_slice %626 {offsets = [0, 64], sizes = [8, 32], strides = [1, 1]} : vector<8x128xf32> to vector<8x32xf32>
    %640 = math.tanh %639 : vector<8x32xf32>
    %641 = vector.extract_strided_slice %626 {offsets = [0, 96], sizes = [8, 32], strides = [1, 1]} : vector<8x128xf32> to vector<8x32xf32>
    %642 = arith.negf %641 : vector<8x32xf32>
    %643 = math.exp %642 : vector<8x32xf32>
    %cst_160 = arith.constant 1.000000e+00 : f32
    %644 = vector.broadcast %cst_160 : f32 to vector<8x32xf32>
    %645 = arith.addf %644, %643 : vector<8x32xf32>
    %646 = arith.divf %644, %645 : vector<8x32xf32>
    %647 = arith.mulf %638, %579 : vector<8x32xf32>
    %648 = arith.mulf %632, %640 : vector<8x32xf32>
    %649 = arith.addf %647, %648 : vector<8x32xf32>
    %650 = math.tanh %649 : vector<8x32xf32>
    %651 = arith.mulf %646, %650 : vector<8x32xf32>
    %652 = arith.truncf %651 : vector<8x32xf32> to vector<8x32xbf16>
    %cst_161 = arith.constant dense<0.000000e+00> : vector<8x128xf32>
    %653 = tpu.matmul %652, %115, %cst_161 {dimension_numbers = #tpu.dot_dimension_numbers<[1], [0], [0], [1], [0, 0, 1, 1], [], []>} : vector<8x32xbf16>, vector<32x128xbf16>, vector<8x128xf32> -> vector<8x128xf32>
    %654 = arith.addf %653, %111 : vector<8x128xf32>
    %655 = arith.addf %654, %613 : vector<8x128xf32>
    %656 = vector.extract_strided_slice %655 {offsets = [0, 0], sizes = [8, 32], strides = [1, 1]} : vector<8x128xf32> to vector<8x32xf32>
    %657 = arith.negf %656 : vector<8x32xf32>
    %658 = math.exp %657 : vector<8x32xf32>
    %cst_162 = arith.constant 1.000000e+00 : f32
    %659 = vector.broadcast %cst_162 : f32 to vector<8x32xf32>
    %660 = arith.addf %659, %658 : vector<8x32xf32>
    %661 = arith.divf %659, %660 : vector<8x32xf32>
    %662 = vector.extract_strided_slice %655 {offsets = [0, 32], sizes = [8, 32], strides = [1, 1]} : vector<8x128xf32> to vector<8x32xf32>
    %663 = arith.negf %662 : vector<8x32xf32>
    %664 = math.exp %663 : vector<8x32xf32>
    %cst_163 = arith.constant 1.000000e+00 : f32
    %665 = vector.broadcast %cst_163 : f32 to vector<8x32xf32>
    %666 = arith.addf %665, %664 : vector<8x32xf32>
    %667 = arith.divf %665, %666 : vector<8x32xf32>
    %668 = vector.extract_strided_slice %655 {offsets = [0, 64], sizes = [8, 32], strides = [1, 1]} : vector<8x128xf32> to vector<8x32xf32>
    %669 = math.tanh %668 : vector<8x32xf32>
    %670 = vector.extract_strided_slice %655 {offsets = [0, 96], sizes = [8, 32], strides = [1, 1]} : vector<8x128xf32> to vector<8x32xf32>
    %671 = arith.negf %670 : vector<8x32xf32>
    %672 = math.exp %671 : vector<8x32xf32>
    %cst_164 = arith.constant 1.000000e+00 : f32
    %673 = vector.broadcast %cst_164 : f32 to vector<8x32xf32>
    %674 = arith.addf %673, %672 : vector<8x32xf32>
    %675 = arith.divf %673, %674 : vector<8x32xf32>
    %676 = arith.mulf %667, %608 : vector<8x32xf32>
    %677 = arith.mulf %661, %669 : vector<8x32xf32>
    %678 = arith.addf %676, %677 : vector<8x32xf32>
    %679 = math.tanh %678 : vector<8x32xf32>
    %680 = arith.mulf %675, %679 : vector<8x32xf32>
    %681 = arith.truncf %680 : vector<8x32xf32> to vector<8x32xbf16>
    %cst_165 = arith.constant dense<0.000000e+00> : vector<8x256xf32>
    %682 = tpu.matmul %681, %117, %cst_165 {dimension_numbers = #tpu.dot_dimension_numbers<[1], [0], [0], [1], [0, 0, 1, 1], [], []>} : vector<8x32xbf16>, vector<32x256xbf16>, vector<8x256xf32> -> vector<8x256xf32>
    %683 = vector.extract_strided_slice %682 {offsets = [0, 128], sizes = [8, 128], strides = [1, 1]} : vector<8x256xf32> to vector<8x128xf32>
    %684 = arith.addf %683, %114 : vector<8x128xf32>
    %c7 = arith.constant 7 : index
    %c0_166 = arith.constant 0 : index
    %c0_167 = arith.constant 0 : index
    %685 = vector.load %arg20[%c7, %c0_166, %c0_167] : memref<8x8x128xf32, #tpu.memory_space<vmem>>, vector<1x8x128xf32>
    %686 = vector.shape_cast %685 : vector<1x8x128xf32> to vector<8x128xf32>
    %687 = vector.shape_cast %684 : vector<8x128xf32> to vector<1x8x128xf32>
    tpu.vector_store %arg20[%c7, %c0_166, %c0_167], %687 {strides = array<i32>} : memref<8x8x128xf32, #tpu.memory_space<vmem>>, vector<1x8x128xf32>,
    %c0_168 = arith.constant 0 : index
    %c0_169 = arith.constant 0 : index
    %c0_170 = arith.constant 0 : index
    %688 = vector.load %arg23[%c0_168, %c0_169, %c0_170] : memref<2x8x32xf32, #tpu.memory_space<vmem>>, vector<1x8x32xf32>
    %689 = vector.shape_cast %688 : vector<1x8x32xf32> to vector<8x32xf32>
    %690 = vector.shape_cast %651 : vector<8x32xf32> to vector<1x8x32xf32>
    tpu.vector_store %arg23[%c0_168, %c0_169, %c0_170], %690 {strides = array<i32>} : memref<2x8x32xf32, #tpu.memory_space<vmem>>, vector<1x8x32xf32>,
    %c0_171 = arith.constant 0 : index
    %c0_172 = arith.constant 0 : index
    %c0_173 = arith.constant 0 : index
    %691 = vector.load %arg24[%c0_171, %c0_172, %c0_173] : memref<2x8x32xf32, #tpu.memory_space<vmem>>, vector<1x8x32xf32>
    %692 = vector.shape_cast %691 : vector<1x8x32xf32> to vector<8x32xf32>
    %693 = vector.shape_cast %649 : vector<8x32xf32> to vector<1x8x32xf32>
    tpu.vector_store %arg24[%c0_171, %c0_172, %c0_173], %693 {strides = array<i32>} : memref<2x8x32xf32, #tpu.memory_space<vmem>>, vector<1x8x32xf32>,
    %c1_174 = arith.constant 1 : index
    %c0_175 = arith.constant 0 : index
    %c0_176 = arith.constant 0 : index
    %694 = vector.load %arg23[%c1_174, %c0_175, %c0_176] : memref<2x8x32xf32, #tpu.memory_space<vmem>>, vector<1x8x32xf32>
    %695 = vector.shape_cast %694 : vector<1x8x32xf32> to vector<8x32xf32>
    %696 = vector.shape_cast %680 : vector<8x32xf32> to vector<1x8x32xf32>
    tpu.vector_store %arg23[%c1_174, %c0_175, %c0_176], %696 {strides = array<i32>} : memref<2x8x32xf32, #tpu.memory_space<vmem>>, vector<1x8x32xf32>,
    %c1_177 = arith.constant 1 : index
    %c0_178 = arith.constant 0 : index
    %c0_179 = arith.constant 0 : index
    %697 = vector.load %arg24[%c1_177, %c0_178, %c0_179] : memref<2x8x32xf32, #tpu.memory_space<vmem>>, vector<1x8x32xf32>
    %698 = vector.shape_cast %697 : vector<1x8x32xf32> to vector<8x32xf32>
    %699 = vector.shape_cast %678 : vector<8x32xf32> to vector<1x8x32xf32>
    tpu.vector_store %arg24[%c1_177, %c0_178, %c0_179], %699 {strides = array<i32>} : memref<2x8x32xf32, #tpu.memory_space<vmem>>, vector<1x8x32xf32>,
    return
  }
}

</mosaic_0001>

<bundles_post_ra>
// kernel: encoder_forward.1
= control target key start
LH: loop header
LB: loop body
LE: loop exit
PB: predicated region body
PF: predicated region fallthrough
CT: control target
= control target key end

     0   :  { %s3700_s0 = inlined_call_operand.vmem [shape: f32[8,16], index: 0, kind: input, shape index: {}]   ;;  %s3701_s1 = inlined_call_operand.vmem [shape: f32[2,2,32], index: 1, kind: input, shape index: {}]   ;;  %s3702_s2 = inlined_call_operand.vmem [shape: f32[2,2,32], index: 2, kind: input, shape index: {}]   ;;  %s3703_s3 = inlined_call_operand.vmem [shape: f32[64,8], index: 3, kind: input, shape index: {}]   ;;  %s3704_s4 = inlined_call_operand.vmem [shape: f32[2,8,32], index: 4, kind: input, shape index: {}]   ;;  %s3705_s5 = inlined_call_operand.vmem [shape: f32[2,8,32], index: 5, kind: input, shape index: {}]   ;;  %s3706_s6 = inlined_call_operand.vmem [shape: bf16[16,128], index: 6, kind: input, shape index: {}]   ;;  %s3707_s7 = inlined_call_operand.vmem [shape: bf16[32,128], index: 7, kind: input, shape index: {}]   ;;  %s3708_s8 = inlined_call_operand.vmem [shape: bf16[32,128], index: 8, kind: input, shape index: {}]   ;;  %s3709_s9 = inlined_call_operand.vmem [shape: bf16[32,128], index: 9, kind: input, shape index: {}]   ;;  %s3710_s10 = inlined_call_operand.vmem [shape: f32[1,128], index: 10, kind: input, shape index: {}]   ;;  %s3711_s11 = inlined_call_operand.vmem [shape: f32[1,128], index: 11, kind: input, shape index: {}]   ;;  %s3712_s12 = inlined_call_operand.vmem [shape: bf16[8,128], index: 12, kind: input, shape index: {}]   ;;  %s3713_s13 = inlined_call_operand.vmem [shape: bf16[32,128], index: 13, kind: input, shape index: {}]   ;;  %s3714_s14 = inlined_call_operand.vmem [shape: bf16[32,128], index: 14, kind: input, shape index: {}]   ;;  %s3715_s15 = inlined_call_operand.vmem [shape: bf16[32,128], index: 15, kind: input, shape index: {}]   ;;  %s3716_s16 = inlined_call_operand.vmem [shape: bf16[32,256], index: 16, kind: input, shape index: {}]   ;;  %s3717_s17 = inlined_call_operand.vmem [shape: f32[1,128], index: 17, kind: input, shape index: {}]   ;;  %s3718_s18 = inlined_call_operand.vmem [shape: f32[1,128], index: 18, kind: input, shape index: {}]   ;;  %s3719_s19 = inlined_call_operand.vmem [shape: f32[1,128], index: 19, kind: input, shape index: {}]   ;;  %s3720_s20 = inlined_call_operand.vmem [shape: f32[8,8,128], index: 20, kind: output, shape index: {0}]   ;;  %s3721_s21 = inlined_call_operand.hbm [shape: f32[2,2,32], index: 21, kind: output, shape index: {1}]   ;;  %s3722_s22 = inlined_call_operand.hbm [shape: f32[2,2,32], index: 22, kind: output, shape index: {2}]   ;;  %s3723_s23 = inlined_call_operand.vmem [shape: f32[2,8,32], index: 23, kind: output, shape index: {3}]   ;;  %s3724_s24 = inlined_call_operand.vmem [shape: f32[2,8,32], index: 24, kind: output, shape index: {4}]  }
   0x1   :  { %3732 = sst [smem:[#allocation8_spill]] %s3700_s0 }
   0x2   :  { %3733 = sst [smem:[#allocation9_spill]] %s3701_s1 }
   0x3   :  { %3734 = sst [smem:[#allocation10_spill]] %s3702_s2 }
   0x4   :  { %3735 = sst [smem:[#allocation11_spill]] %s3703_s3 }
   0x5   :  { %3736 = sst [smem:[#allocation12_spill]] %s3704_s4 }
   0x6   :  { %3737 = sst [smem:[#allocation13_spill]] %s3705_s5 }
   0x7   :  { %3738 = sst [smem:[#allocation14_spill]] %s3706_s6 }
   0x8   :  { %3739 = sst [smem:[#allocation15_spill]] %s3707_s7 }
   0x9   :  { %3740 = sst [smem:[#allocation16_spill]] %s3708_s8 }
   0xa   :  { %30 = vsyncpa [#allocation3], 0  ;;  %s3741_s27 = sld [smem:[#allocation16_spill]]  ;;  %v2918_v1 = vmov 0.0   ;;  %vm2919_vm0 = vmmov 0   ;;  %s3742_s0 = sld [smem:[#allocation9_spill]] }
   0xb   :  { %2506 = vmatprep.subr.bf16.mxu0 %v2918_v1  ;;  %2514 = vmatprep.subr.bf16.mxu1 %v2918_v1  ;;  %s3743_s3 = sld [smem:[#allocation14_spill]]  ;;  %vm99_vm1 = vcmask 261120   ;;  %s3744_s4 = sld [smem:[#allocation8_spill]]  ;;  %vm165_vm2 = vcmask 130048  }
   0xc   :  { %2510 = vmatprep.mubr.msk.bf16.mxu0 %vm2919_vm0, %v2918_v1  ;;  %2516 = vmatprep.mubr.msk.bf16.mxu1 %vm2919_vm0, %v2918_v1 }
  0x10   :  { %v2697_v0 = vld [vmem:[%s3741_s27] sm:$0xff]   ;;  %v2698_v2 = vld [vmem:[%s3741_s27 + $0x8] sm:$0xff]  }
  0x11   :  { %2507 = vmatpush3.bf16.msra.mxu0 %v2697_v0  ;;  %v74_v3 = vld [vmem:[%s3742_s0] sm:$0x3] }
  0x12   :  { %v2699_v4 = vld [vmem:[%s3743_s3] sm:$0xff]   ;;  %2508 = vmatprep.subr.bf16.mxu0 %v2918_v1  ;;  %v75_v7 = vpack.c.bf16 %v74_v3, %v74_v3 }
  0x13   :  { %v73_v5 = vld [vmem:[%s3744_s4] sm:$0xff]  ;;  %2515 = vmatpush3.bf16.msra.mxu1 %v2699_v4 }
  0x14   :  { %v143_v6 = vpack.c.bf16 %v73_v5, %v73_v5  ;;  %2520 = vmatprep.subr.bf16.mxu1 %v2918_v1 }
  0x15   :  { %2509 = vmatpush3.bf16.msra.mxu0 %v2698_v2 }
  0x16   :  { %2517 = vmatmul.mubr.msk.bf16.vlgmr.msra.gmra.mrb[0].mxu1 %vm165_vm2, %v143_v6  ;;  %2528 = vmatprep.subr.bf16.mxu0 %v2918_v1 }
  0x17   :  { %2524 = vmatprep.mubr.msk.bf16.mxu1 %vm2919_vm0, %v2918_v1 }
  0x18   :  { %2511 = vmatmul.mubr.msk.bf16.vlgmr.msra.gmra.mrb[0].mxu0 %vm99_vm1, %v75_v7 }
  0x19   :  { %2532 = vmatprep.mubr.msk.bf16.mxu0 %vm2919_vm0, %v2918_v1 }
  0x1a   :  { %31 = vsyncpa [#allocation5], 0  ;;  %v2352_v8 = vld [vmem:[%s3710_s10] ss:$0 sm:$0xff]  ;;  %vm153_vm3 = vcmask 1041408   ;;  %vm155_vm4 = vcmask 1043456  }
  0x1b   :  { %vm157_vm5 = vcmask 1045504   ;;  %s3745_s27 = sld [smem:[#allocation10_spill]]  ;;  %s2920_s28 = smov 64   ;;  %v2700_v43 = vld [vmem:[%s3709_s9] sm:$0xff]   ;;  %v2701_v45 = vld [vmem:[%s3709_s9 + $0x8] sm:$0xff]   ;;  %vm466_vm6 = vcmask 64512  }
  0x1c   :  { %s2921_s6 = smov 32   ;;  %s3746_s3 = sld [smem:[#allocation15_spill]]  ;;  %2521 = vmatpush3.bf16.msra.mxu1 %v2700_v43  ;;  %v2359_v46 = vld [vmem:[%s3742_s0 + $0x2] sm:$0x3]  ;;  %v2360_v2 = vld [vmem:[%s3711_s11] ss:$0 sm:$0xff] }
  0x1d   :  { %2522 = vmatprep.subr.bf16.mxu1 %v2918_v1  ;;  %v261_v48 = vpack.c.bf16 %v2359_v46, %v2359_v46  ;;  %s3747_s30 = sld [smem:[#allocation11_spill]]  ;;  %s3749_s0 = sld [smem:[#allocation13_spill]]  ;;  %vm252_vm7 = vcmask 261126  }
  0x20   :  { %2523 = vmatpush3.bf16.msra.mxu1 %v2701_v45  ;;  %v3199_v45 = vld [vmem:[%s3715_s15 + $0x8] sm:$0xff]  }
  0x21   :  { %v216_v25 = vld [vmem:[%s3745_s27] sm:$0x3]  ;;  %v2368_v50 = vld [vmem:[%s3745_s27 + $0x2] sm:$0x3] }
  0x22   :  { %v218_v26 = vrot.slane %v216_v25, 6  ;;  %v220_v27 = vrot.slane %v216_v25, 4  ;;  %v222_v29 = vrot.slane %v216_v25, 2  ;;  %v2702_v44 = vld [vmem:[%s3746_s3] sm:$0xff]   ;;  %v2703_v47 = vld [vmem:[%s3746_s3 + $0x8] sm:$0xff]   ;;  %v411_v51 = vrot.slane %v2368_v50, 6 }
  0x23   :  { %2529 = vmatpush3.bf16.msra.mxu0 %v2702_v44  ;;  %2525 = vmatmul.mubr.msk.bf16.vlgmr.msra.gmra.mrb[4].mxu1 %vm99_vm1, %v261_v48  ;;  %v413_v52 = vrot.slane %v2368_v50, 4  ;;  %v415_v56 = vrot.slane %v2368_v50, 2 }
  0x24   :  { %v224_v28 = vsel %vm153_vm3, %v216_v25, %v218_v26  ;;  %2530 = vmatprep.subr.bf16.mxu0 %v2918_v1  ;;  %v417_v54 = vsel %vm153_vm3, %v2368_v50, %v411_v51  ;;  %v465_v26 = vld [vmem:[%s3712_s12] sm:$0xf] }
  0x25   :  { %v225_v30 = vsel %vm155_vm4, %v224_v28, %v220_v27  ;;  %v418_v58 = vsel %vm155_vm4, %v417_v54, %v413_v52  ;;  %v453_v27 = vld [vmem:[%s3747_s30] sm:$0xff]  ;;  %v454_v28 = vld [vmem:[%s3747_s30 + $0x8] sm:$0xff]  ;;  %2687 = vmatprep.subr.msk.bf16.mxu1 %vm155_vm4, %v465_v26 }
  0x26   :  { %v226_v32 = vsel %vm157_vm5, %v225_v30, %v222_v29  ;;  %v419_v59 = vsel %vm157_vm5, %v418_v58, %v415_v56  ;;  %v480_v29 = vsel %vm155_vm4, %v465_v26, 0  ;;  %v461_v30 = vpack.c.bf16 %v454_v28, %v453_v27  ;;  %v646_v51 = vld [vmem:[%s3749_s0] sm:$0xff] }
  0x27   :  { %2531 = vmatpush3.bf16.msra.mxu0 %v2703_v47  ;;  %2537 = vmatpush3.bf16.msra.mxu1 %v480_v29 }
  0x28   :  { %2546 = vmatprep.subr.bf16.mxu0 %v2918_v1  ;;  %2538 = vmatprep.mubr.msk.bf16.mxu1 %vm466_vm6, %v461_v30 }
  0x29   :  { %2554 = vmatprep.subr.bf16.mxu1 %v2918_v1 }
  0xe9   :  { %v203_v9 = vpop.f32.mrb[0].mxu1 }
  0xea   :  { %v2518_v10 = vpop.f32.mrb[1].mxu1 }
  0xeb   :  { %v137_v11 = vpop.f32.mrb[0].mxu0  ;;  %v206_v12 = vpop.f32.mrb[2].mxu1 }
  0xec   :  { %v138_v13 = vadd.f32 %v2352_v8, %v137_v11  ;;  %v2512_v14 = vpop.f32.mrb[1].mxu0  ;;  %v2519_v15 = vpop.f32.mrb[3].mxu1 }
  0xed   :  { %v140_v16 = vpop.f32.mrb[2].mxu0 }
  0xee   :  { %v147_v17 = vrot.slane %v138_v13, 6  ;;  %v2513_v18 = vpop.f32.mrb[3].mxu0  ;;  %v149_v19 = vrot.slane %v138_v13, 4  ;;  %v151_v20 = vrot.slane %v138_v13, 2 }
  0xf0   :  { %v154_v21 = vsel %vm153_vm3, %v138_v13, %v147_v17 }
  0xf1   :  { %v156_v22 = vsel %vm155_vm4, %v154_v21, %v149_v19 }
  0xf2   :  { %v158_v23 = vsel %vm157_vm5, %v156_v22, %v151_v20 }
  0xf3   :  { %v204_v24 = vadd.f32 %v203_v9, %v158_v23 }
  0xf5   :  { %2716 = vtanh.f32 %v204_v24  ;;  %v2358_v33 = vmul.f32 -1.442695, %v204_v24 }
  0xf6   :  { %v322_v60 = vpop.f32.mrb[4].mxu1 }
  0xf7   :  { %2718 = vpow2.f32 %v2358_v33  ;;  %v2526_v61 = vpop.f32.mrb[5].mxu1  ;;  %v323_v3 = vadd.f32 %v2360_v2, %v322_v60  ;;  %v2704_v33 = vld [vmem:[%s3713_s13] sm:$0xff]  }
  0xf8   :  { %v325_v62 = vpop.f32.mrb[6].mxu1 }
  0xf9   :  { %v2527_v63 = vpop.f32.mrb[7].mxu1  ;;  %v334_v4 = vrot.slane %v323_v3, 6  ;;  %v336_v5 = vrot.slane %v323_v3, 4  ;;  %v338_v7 = vrot.slane %v323_v3, 2 }
  0xfb   :  { %v340_v6 = vsel %vm153_vm3, %v323_v3, %v334_v4 }
  0xfc   :  { %v341_v8 = vsel %vm155_vm4, %v340_v6, %v336_v5 }
  0xfd   :  { %v342_v9 = vsel %vm157_vm5, %v341_v8, %v338_v7 }
  0xff   :  { %v2717_v31 = vpop.eup %2716 }
 0x100   :  { %233 = vrot.lane.b32.xlu0 %v2717_v31, %s2920_s28  ;;  %v455_v31 = vld [vmem:[%s3747_s30 + $0x10] sm:$0xff] }
 0x101   :  { %v2719_v34 = vpop.eup %2718 }
 0x102   :  { %v212_v35 = vadd.f32 1.0, %v2719_v34 }
 0x104   :  { %228 = vrot.lane.b32.xlu0 %v226_v32, %s2921_s6  ;;  %2720 = vrcp.f32 %v212_v35  ;;  %v456_v32 = vld [vmem:[%s3747_s30 + $0x18] sm:$0xff]  ;;  %v3168_v35 = vld [vmem:[%s3715_s15] sm:$0xff]  }
 0x105   :  { %v462_v34 = vpack.c.bf16 %v456_v32, %v455_v31 }
 0x107   :  { %2539 = vmatmul.mubr.msk.bf16.vlgmr.msra.gmra.mrb[8].mxu1 %vm466_vm6, %v462_v34 }
 0x108   :  { %2555 = vmatpush3.bf16.msra.mxu1 %v3168_v35 }
 0x109   :  { %2556 = vmatprep.subr.bf16.mxu1 %v2918_v1 }
 0x10c   :  { %2557 = vmatpush3.bf16.msra.mxu1 %v3199_v45 }
 0x10e   :  { %v2721_v36 = vpop.eup %2720 }
 0x172   :  { %v234_v37 = vpop.permute.xlu0 %233 }
 0x173   :  { %v236_v38 = vmul.f32 %v2721_v36, %v234_v37  ;;  %v2706_v37 = vld [vmem:[%s3713_s13 + $0x8] sm:$0xff]  }
 0x175   :  { %238 = vrot.lane.b32.xlu1 %v236_v38, %s2921_s6  ;;  %v458_v38 = vld [vmem:[%s3747_s30 + $0x28] sm:$0xff] }
 0x176   :  { %v229_v39 = vpop.permute.xlu0 %228 }
 0x177   :  { %v231_v40 = vmul.f32 %v2721_v36, %v229_v39 }
 0x1da   :  { %v2540_v52 = vpop.f32.mrb[8].mxu1 }
 0x1e7   :  { %v239_v41 = vpop.permute.xlu1 %238 }
 0x1e8   :  { %v3096_v42 = vadd.f32 %v239_v41, %v231_v40  ;;  %v459_v40 = vld [vmem:[%s3747_s30 + $0x30] sm:$0xff]  ;;  %v460_v41 = vld [vmem:[%s3747_s30 + $0x38] sm:$0xff] }
 0x1e9   :  { %v464_v44 = vpack.c.bf16 %v460_v41, %v459_v40 }
 0x1ea   :  { %2722 = vtanh.f32 %v3096_v42 }
 0x1f4   :  { %v2723_v49 = vpop.eup %2722 }
 0x1f5   :  { %244 = vrot.lane.b32.xlu1 %v2723_v49, %s2920_s28 }
 0x267   :  { %v245_v53 = vpop.permute.xlu1 %244 }
 0x268   :  { %v3123_v55 = vmul.f32 %v2721_v36, %v245_v53  ;;  %v457_v36 = vld [vmem:[%s3747_s30 + $0x20] sm:$0xff]  ;;  %s3748_s30 = sld [smem:[#allocation12_spill]]  ;;  %v516_v53 = vpop.f32.mrb[9].mxu1 }
 0x269   :  { %v463_v39 = vpack.c.bf16 %v458_v38, %v457_v36  ;;  %v2541_v54 = vpop.f32.mrb[10].mxu1 }
 0x26a   :  { %v328_v57 = vpack.c.bf16 %v3123_v55, %v3123_v55  ;;  %v519_v56 = vpop.f32.mrb[11].mxu1 }
 0x26b   :  { %2542 = vmatprep.mubr.msk.bf16.mxu1 %vm466_vm6, %v463_v39 }
 0x26c   :  { %344 = vrot.lane.b32.xlu0 %v328_v57, %s2921_s6  ;;  %2543 = vmatmul.mubr.msk.bf16.gmra.mrb[12].mxu1 %vm466_vm6, %v464_v44 }
 0x26d   :  { %2558 = vmatprep.mubr.msk.bf16.mxu1 %vm2919_vm0, %v2918_v1 }
 0x26e   :  { %v643_v46 = vld [vmem:[%s3748_s30] sm:$0xff] }
 0x26f   :  { %v725_v47 = vpack.c.bf16 %v643_v46, %v643_v46 }
 0x270   :  { %421 = vrot.lane.b32.xlu0 %v419_v59, %s2921_s6 }
 0x274   :  { %2559 = vmatmul.mubr.msk.bf16.vlgmr.msra.gmra.mrb[16].mxu1 %vm99_vm1, %v725_v47 }
 0x2de   :  { %v345_v0 = vpop.permute.xlu0 %344 }
 0x2df   :  { %2533 = vmatmul.mubr.msk.bf16.vlgmr.msra.gmra.mrb[4].mxu0 %vm99_vm1, %v345_v0 }
 0x2e0   :  { %2550 = vmatprep.mubr.msk.bf16.mxu0 %vm2919_vm0, %v2918_v1  ;;  %2547 = vmatpush3.bf16.msra.mxu0 %v2704_v33 }
 0x2e1   :  { %2548 = vmatprep.subr.bf16.mxu0 %v2918_v1 }
 0x2e2   :  { %v422_v22 = vpop.permute.xlu0 %421 }
 0x2e4   :  { %2549 = vmatpush3.bf16.msra.mxu0 %v2706_v37 }
 0x33f   :  { %v2544_v57 = vpop.f32.mrb[12].mxu1 }
 0x340   :  { %v532_v58 = vpop.f32.mrb[13].mxu1 }
 0x341   :  { %v2545_v59 = vpop.f32.mrb[14].mxu1 }
 0x342   :  { %v535_v61 = vpop.f32.mrb[15].mxu1 }
 0x347   :  { %v775_v62 = vpop.f32.mrb[16].mxu1 }
 0x348   :  { %v2560_v63 = vpop.f32.mrb[17].mxu1 }
 0x349   :  { %v778_v0 = vpop.f32.mrb[18].mxu1 }
 0x34a   :  { %v2561_v2 = vpop.f32.mrb[19].mxu1  ;;  %v3285_v0 = vld [vmem:[%s3714_s14] sm:$0xff]  }
 0x3b2   :  { %v395_v10 = vpop.f32.mrb[4].mxu0 }
 0x3b3   :  { %v396_v11 = vadd.f32 %v395_v10, %v342_v9  ;;  %v2534_v12 = vpop.f32.mrb[5].mxu0 }
 0x3b4   :  { %v398_v13 = vpop.f32.mrb[6].mxu0 }
 0x3b5   :  { %2724 = vtanh.f32 %v396_v11  ;;  %v2535_v14 = vpop.f32.mrb[7].mxu0  ;;  %v2367_v16 = vmul.f32 -1.442695, %v396_v11 }
 0x3b7   :  { %2726 = vpow2.f32 %v2367_v16 }
 0x3bf   :  { %v2725_v15 = vpop.eup %2724 }
 0x3c0   :  { %426 = vrot.lane.b32.xlu1 %v2725_v15, %s2920_s28 }
 0x3c1   :  { %v2727_v17 = vpop.eup %2726 }
 0x3c2   :  { %v404_v18 = vadd.f32 1.0, %v2727_v17 }
 0x3c4   :  { %2728 = vrcp.f32 %v404_v18 }
 0x3ce   :  { %v2729_v19 = vpop.eup %2728 }
 0x3cf   :  { %v424_v23 = vmul.f32 %v2729_v19, %v422_v22 }
 0x432   :  { %v427_v20 = vpop.permute.xlu1 %426 }
 0x433   :  { %v429_v21 = vmul.f32 %v2729_v19, %v427_v20 }
 0x435   :  { %431 = vrot.lane.b32.xlu1 %v429_v21, %s2921_s6 }
 0x4a7   :  { %v432_v24 = vpop.permute.xlu1 %431 }
 0x4a8   :  { %v3142_v25 = vadd.f32 %v432_v24, %v424_v23 }
 0x4aa   :  { %2730 = vtanh.f32 %v3142_v25 }
 0x4b4   :  { %v2731_v43 = vpop.eup %2730 }
 0x4b5   :  { %437 = vrot.lane.b32.xlu0 %v2731_v43, %s2920_s28 }
 0x527   :  { %v438_v48 = vpop.permute.xlu0 %437 }
 0x528   :  { %v3206_v49 = vmul.f32 %v2729_v19, %v438_v48  ;;  %v2376_v19 = vld [vmem:[%s3717_s17] ss:$0 sm:$0xff] }
 0x52a   :  { %v547_v50 = vpack.c.bf16 %v3206_v49, %v3206_v49 }
 0x52c   :  { %553 = vrot.lane.b32.xlu1 %v547_v50, %s2921_s6 }
 0x530   :  { %790 = vrot.lane.b32.xlu1 %v646_v51, %s2921_s6 }
 0x59e   :  { %v554_v60 = vpop.permute.xlu1 %553 }
 0x59f   :  { %2551 = vmatmul.mubr.msk.bf16.vlgmr.msra.gmra.mrb[8].mxu0 %vm99_vm1, %v554_v60  ;;  %v2922_v60 = vmov 0  }
 0x5a0   :  { %705 = vmatprep.mubr.bf16.mxu0 %v2922_v60  ;;  %937 = vmatprep.mubr.bf16.mxu1 %v2922_v60 }
 0x672   :  { %v604_v3 = vpop.f32.mrb[8].mxu0 }
 0x673   :  { %v714_v4 = vrot.slane %v604_v3, 6  ;;  %v716_v5 = vrot.slane %v604_v3, 4  ;;  %v718_v6 = vrot.slane %v604_v3, 2  ;;  %v2552_v7 = vpop.f32.mrb[9].mxu0 }
 0x674   :  { %v607_v8 = vpop.f32.mrb[10].mxu0 }
 0x675   :  { %v1521_v9 = vsel %vm153_vm3, %v716_v5, %v718_v6  ;;  %v2553_v10 = vpop.f32.mrb[11].mxu0  ;;  %v720_v11 = vsel %vm153_vm3, %v604_v3, %v714_v4  ;;  %v1138_v12 = vsel %vm153_vm3, %v718_v6, %v604_v3  ;;  %v1904_v13 = vsel %vm153_vm3, %v714_v4, %v716_v5  ;;  %v3320_v8 = vld [vmem:[%s3718_s18] ss:$0 sm:$0xff] }
 0x676   :  { %v1522_v14 = vsel %vm155_vm4, %v1521_v9, %v604_v3  ;;  %v721_v15 = vsel %vm155_vm4, %v720_v11, %v716_v5  ;;  %v1139_v16 = vsel %vm155_vm4, %v1138_v12, %v714_v4  ;;  %v1905_v17 = vsel %vm155_vm4, %v1904_v13, %v718_v6 }
 0x677   :  { %v1523_v18 = vsel %vm157_vm5, %v1522_v14, %v714_v4  ;;  %v722_v20 = vsel %vm157_vm5, %v721_v15, %v718_v6  ;;  %v1140_v21 = vsel %vm157_vm5, %v1139_v16, %v716_v5  ;;  %v1906_v22 = vsel %vm157_vm5, %v1905_v17, %v604_v3  ;;  %v3296_v3 = vld [vmem:[%s3714_s14 + $0x8] sm:$0xff]  }
 0x678   :  { %v1524_v23 = vadd.f32 %v1523_v18, %v532_v58  ;;  %v1714_v24 = vadd.f32 %v1523_v18, %v535_v61  ;;  %v723_v26 = vadd.f32 %v722_v20, %v516_v53  ;;  %v948_v27 = vadd.f32 %v722_v20, %v519_v56  ;;  %v3258_v58 = vld [vmem:[%s3716_s16] ss:$8 sps:$4 sm:$0xff]   ;;  %v3271_v61 = vld [vmem:[%s3716_s16 + $0x10] ss:$8 sps:$4 sm:$0xff]  }
 0x679   :  { %v1141_v28 = vadd.f32 %v2540_v52, %v1140_v21  ;;  %v1331_v29 = vadd.f32 %v2541_v54, %v1140_v21  ;;  %v1907_v30 = vadd.f32 %v2544_v57, %v1906_v22  ;;  %v2097_v31 = vadd.f32 %v2545_v59, %v1906_v22  ;;  %v791_v52 = vpop.permute.xlu1 %790  ;;  %v3253_v57 = vld [vmem:[%s3716_s16 + $0x4] ss:$8 sps:$4 sm:$0xff]   ;;  %v3263_v59 = vld [vmem:[%s3716_s16 + $0x14] ss:$8 sps:$4 sm:$0xff]  }
 0x67a   :  { %v724_v32 = vadd.f32 %v2376_v19, %v723_v26  ;;  %v3231_v33 = vadd.f32 %v2376_v19, %v948_v27  ;;  %v3233_v34 = vadd.f32 %v2376_v19, %v1524_v23  ;;  %v3235_v36 = vadd.f32 %v2376_v19, %v1714_v24  ;;  %673 = vmatprep.subr.bf16.mxu0 %v3253_v57  ;;  %v2380_v20 = vld [vmem:[%s3749_s0 + $0x8] sm:$0xff]  ;;  %s2925_s0 = smov [#allocation4]  }
 0x67b   :  { %v3237_v37 = vadd.f32 %v2376_v19, %v1141_v28  ;;  %v3239_v38 = vadd.f32 %v2376_v19, %v1331_v29  ;;  %v3241_v39 = vadd.f32 %v2376_v19, %v1907_v30  ;;  %v3243_v40 = vadd.f32 %v2376_v19, %v2097_v31  ;;  %674 = vmatpush1.bf16.msra.mxu0 %v3258_v58  ;;  %s2327_s17 = sshll.u32 %s2925_s0, 4  ;;  %s2328_s17 = int_to_ptr.vmem [resolvable:$true] %s2327_s17 }
 0x67c   :  { %v781_v41 = vadd.f32 %v775_v62, %v724_v32  ;;  %v2379_v62 = vld [vmem:[%s3748_s30 + $0x8] sm:$0xff]  ;;  %905 = vmatprep.subr.bf16.mxu1 %v3253_v57  ;;  %675 = vmatprep.subr.bf16.mxu0 %v3263_v59 }
 0x67d   :  { %906 = vmatpush1.bf16.msra.mxu1 %v3258_v58  ;;  %v649_v63 = vpack.c.bf16 %v2379_v62, %v2379_v62 }
 0x67e   :  { %2732 = vtanh.f32 %v781_v41  ;;  %v2389_v44 = vmul.f32 -1.442695, %v781_v41  ;;  %907 = vmatprep.subr.bf16.mxu1 %v3263_v59 }
 0x67f   :  { %676 = vmatpush1.bf16.msra.mxu0 %v3271_v61 }
 0x680   :  { %2734 = vpow2.f32 %v2389_v44  ;;  %2562 = vmatprep.subr.bf16.mxu0 %v2918_v1 }
 0x681   :  { %908 = vmatpush1.bf16.msra.mxu1 %v3271_v61 }
 0x682   :  { %2578 = vmatprep.subr.bf16.mxu1 %v2918_v1  ;;  %2385 = vmatmul.mubr.msk.bf16.vlgmr.msra.gmra.mrb[12].mxu0 %vm99_vm1, %v649_v63 }
 0x683   :  { %2563 = vmatpush3.bf16.msra.mxu0 %v3285_v0  ;;  %2566 = vmatprep.mubr.msk.bf16.mxu0 %vm2919_vm0, %v2918_v1 }
 0x684   :  { %2564 = vmatprep.subr.bf16.mxu0 %v2918_v1 }
 0x687   :  { %2565 = vmatpush3.bf16.msra.mxu0 %v3296_v3 }
 0x688   :  { %v2733_v43 = vpop.eup %2732  ;;  %2570 = vmatprep.subr.bf16.mxu0 %v2918_v1 }
 0x689   :  { %795 = vrot.lane.b32.xlu0 %v2733_v43, %s2920_s28 }
 0x68a   :  { %v2735_v46 = vpop.eup %2734 }
 0x68b   :  { %v785_v47 = vadd.f32 1.0, %v2735_v46 }
 0x68d   :  { %2736 = vrcp.f32 %v785_v47 }
 0x697   :  { %v2737_v48 = vpop.eup %2736 }
 0x698   :  { %v793_v53 = vmul.f32 %v2737_v48, %v791_v52 }
 0x6fb   :  { %v796_v50 = vpop.permute.xlu0 %795 }
 0x6fc   :  { %v798_v51 = vmul.f32 %v2737_v48, %v796_v50 }
 0x6fe   :  { %800 = vrot.lane.b32.xlu0 %v798_v51, %s2921_s6 }
 0x770   :  { %v801_v54 = vpop.permute.xlu0 %800 }
 0x771   :  { %v3247_v56 = vadd.f32 %v801_v54, %v793_v53 }
 0x773   :  { %2738 = vtanh.f32 %v3247_v56 }
 0x77d   :  { %v2739_v2 = vpop.eup %2738 }
 0x77e   :  { %806 = vrot.lane.b32.xlu1 %v2739_v2, %s2920_s28 }
 0x7f0   :  { %v807_v4 = vpop.permute.xlu1 %806 }
 0x7f1   :  { %v809_v5 = vmul.f32 %v2737_v48, %v807_v4 }
 0x7f3   :  { %v810_v6 = vpack.c.bf16 %v809_v5, %v809_v5 }
 0x7f5   :  { %812 = vrot.lane.b32.xlu0 %v810_v6, %s2921_s6 }
 0x867   :  { %v813_v7 = vpop.permute.xlu0 %812 }
 0x868   :  { %2567 = vmatmul.mubr.msk.bf16.vlgmr.msra.gmra.mrb[12].mxu0 %vm99_vm1, %v813_v7 }
 0x869   :  { %2571 = vmatpush3.bf16.msra.mxu0 %v3168_v35  ;;  %2574 = vmatprep.mubr.msk.bf16.mxu0 %vm2919_vm0, %v2918_v1 }
 0x86a   :  { %2572 = vmatprep.subr.bf16.mxu0 %v2918_v1 }
 0x86d   :  { %2573 = vmatpush3.bf16.msra.mxu0 %v3199_v45 }
 0x86e   :  { %1094 = vmatprep.subr.bf16.mxu0 %v3253_v57 }
 0x870   :  { %2575 = vmatmul.mubr.msk.bf16.vlgmr.msra.gmra.mrb[16].mxu0 %vm99_vm1, %v813_v7  ;;  %v3366_v7 = vld [vmem:[%s3719_s19] ss:$0 sm:$0xff] }
 0x871   :  { %1095 = vmatpush1.bf16.msra.mxu0 %v3258_v58  ;;  %1126 = vmatprep.mubr.bf16.mxu0 %v2922_v60 }
 0x872   :  { %1096 = vmatprep.subr.bf16.mxu0 %v3263_v59 }
 0x875   :  { %1097 = vmatpush1.bf16.msra.mxu0 %v3271_v61 }
 0x876   :  { %2594 = vmatprep.subr.bf16.mxu0 %v2918_v1 }
 0x93b   :  { %v863_v9 = vpop.f32.mrb[12].mxu0 }
 0x93c   :  { %v864_v10 = vadd.f32 %v3320_v8, %v863_v9  ;;  %v2568_v11 = vpop.f32.mrb[13].mxu0 }
 0x93d   :  { %v866_v12 = vpop.f32.mrb[14].mxu0 }
 0x93e   :  { %2740 = vtanh.f32 %v864_v10  ;;  %v2569_v13 = vpop.f32.mrb[15].mxu0  ;;  %v2393_v22 = vmul.f32 -1.442695, %v864_v10 }
 0x943   :  { %v984_v14 = vpop.f32.mrb[16].mxu0 }
 0x944   :  { %v990_v15 = vadd.f32 %v984_v14, %v3231_v33  ;;  %v2576_v16 = vpop.f32.mrb[17].mxu0 }
 0x945   :  { %v987_v17 = vpop.f32.mrb[18].mxu0 }
 0x946   :  { %2742 = vtanh.f32 %v990_v15  ;;  %v2577_v18 = vpop.f32.mrb[19].mxu0  ;;  %v2396_v23 = vmul.f32 -1.442695, %v990_v15 }
 0x947   :  { %2744 = vpow2.f32 %v2393_v22 }
 0x948   :  { %v2741_v19 = vpop.eup %2740  ;;  %2746 = vpow2.f32 %v2396_v23 }
 0x949   :  { %883 = vrot.lane.b32.xlu1 %v2741_v19, %s2920_s28 }
 0x94d   :  { %878 = vrot.lane.b32.xlu1 %v2380_v20, %s2921_s6 }
 0x950   :  { %v2743_v21 = vpop.eup %2742 }
 0x951   :  { %1000 = vrot.lane.b32.xlu0 %v2743_v21, %s2920_s28  ;;  %v2745_v24 = vpop.eup %2744 }
 0x952   :  { %v873_v26 = vadd.f32 1.0, %v2745_v24  ;;  %v2747_v27 = vpop.eup %2746 }
 0x953   :  { %v994_v28 = vadd.f32 1.0, %v2747_v27 }
 0x954   :  { %2748 = vrcp.f32 %v873_v26 }
 0x955   :  { %2750 = vrcp.f32 %v994_v28 }
 0x95e   :  { %v2749_v29 = vpop.eup %2748 }
 0x95f   :  { %v2751_v32 = vpop.eup %2750 }
 0x960   :  { %v998_v48 = vmul.f32 %v2751_v32, %v3247_v56 }
 0x9bb   :  { %v884_v30 = vpop.permute.xlu1 %883 }
 0x9bc   :  { %v886_v31 = vmul.f32 %v2749_v29, %v884_v30 }
 0x9be   :  { %888 = vrot.lane.b32.xlu0 %v886_v31, %s2921_s6 }
 0x9bf   :  { %v879_v43 = vpop.permute.xlu1 %878 }
 0x9c0   :  { %v881_v44 = vmul.f32 %v2749_v29, %v879_v43 }
 0x9c3   :  { %v1001_v33 = vpop.permute.xlu0 %1000 }
 0x9c4   :  { %v1003_v41 = vmul.f32 %v2751_v32, %v1001_v33 }
 0x9c6   :  { %1005 = vrot.lane.b32.xlu1 %v1003_v41, %s2921_s6 }
 0xa30   :  { %v889_v46 = vpop.permute.xlu0 %888 }
 0xa31   :  { %v3332_v47 = vadd.f32 %v889_v46, %v881_v44 }
 0xa33   :  { %2752 = vtanh.f32 %v3332_v47 }
 0xa38   :  { %v1006_v50 = vpop.permute.xlu1 %1005 }
 0xa39   :  { %v3336_v51 = vadd.f32 %v1006_v50, %v998_v48 }
 0xa3b   :  { %2754 = vtanh.f32 %v3336_v51 }
 0xa3d   :  { %v2753_v52 = vpop.eup %2752 }
 0xa3e   :  { %894 = vrot.lane.b32.xlu0 %v2753_v52, %s2920_s28 }
 0xa45   :  { %v2755_v53 = vpop.eup %2754 }
 0xa46   :  { %1011 = vrot.lane.b32.xlu1 %v2755_v53, %s2920_s28 }
 0xab0   :  { %v895_v54 = vpop.permute.xlu0 %894 }
 0xab1   :  { %v897_v62 = vmul.f32 %v2749_v29, %v895_v54 }
 0xab3   :  { %v898_v63 = vpack.c.bf16 %v897_v62, %v897_v62 }
 0xab5   :  { %900 = vrot.lane.b32.xlu0 %v898_v63, %s2921_s6 }
 0xab8   :  { %v1012_v2 = vpop.permute.xlu1 %1011 }
 0xab9   :  { %v1014_v4 = vmul.f32 %v2751_v32, %v1012_v2 }
 0xabb   :  { %v1015_v5 = vpack.c.bf16 %v1014_v4, %v1014_v4 }
 0xabd   :  { %1017 = vrot.lane.b32.xlu1 %v1015_v5, %s2921_s6 }
 0xb27   :  { %v901_v56 = vpop.permute.xlu0 %900 }
 0xb28   :  { %2394 = vmatmul.mubr.msk.bf16.vlgmr.msra.gmra.mrb[20].mxu1 %vm99_vm1, %v901_v56 }
 0xb29   :  { %2579 = vmatpush3.bf16.msra.mxu1 %v3285_v0  ;;  %2582 = vmatprep.mubr.msk.bf16.mxu1 %vm2919_vm0, %v2918_v1 }
 0xb2a   :  { %2580 = vmatprep.subr.bf16.mxu1 %v2918_v1 }
 0xb2d   :  { %2581 = vmatpush3.bf16.msra.mxu1 %v3296_v3 }
 0xb2e   :  { %2586 = vmatprep.subr.bf16.mxu1 %v2918_v1 }
 0xb2f   :  { %v1018_v6 = vpop.permute.xlu1 %1017 }
 0xb30   :  { %2583 = vmatmul.mubr.msk.bf16.vlgmr.msra.gmra.mrb[24].mxu1 %vm99_vm1, %v1018_v6 }
 0xb31   :  { %2587 = vmatpush3.bf16.msra.mxu1 %v3168_v35  ;;  %2590 = vmatprep.mubr.msk.bf16.mxu1 %vm2919_vm0, %v2918_v1 }
 0xb32   :  { %2588 = vmatprep.subr.bf16.mxu1 %v2918_v1 }
 0xb35   :  { %2589 = vmatpush3.bf16.msra.mxu1 %v3199_v45 }
 0xb36   :  { %1287 = vmatprep.subr.bf16.mxu1 %v3253_v57 }
 0xb38   :  { %2591 = vmatmul.mubr.msk.bf16.vlgmr.msra.gmra.mrb[28].mxu1 %vm99_vm1, %v1018_v6 }
 0xb39   :  { %1288 = vmatpush1.bf16.msra.mxu1 %v3258_v58  ;;  %1319 = vmatprep.mubr.bf16.mxu1 %v2922_v60 }
 0xb3a   :  { %1289 = vmatprep.subr.bf16.mxu1 %v3263_v59 }
 0xb3d   :  { %1290 = vmatpush1.bf16.msra.mxu1 %v3271_v61 }
 0xb3e   :  { %2610 = vmatprep.subr.bf16.mxu1 %v2918_v1 }
 0xbfb   :  { %v939_v9 = vpop.f32.mrb[20].mxu1 }
 0xbfc   :  { %v941_v10 = vpop.f32.mrb[21].mxu1 }
 0xbfd   :  { %v946_v11 = vadd.f32 %v3366_v7, %v941_v10  ;;  %v943_v12 = vpop.f32.mrb[22].mxu1 }
 0xbfe   :  { %v944_v13 = vpop.f32.mrb[23].mxu1 }
 0xbff   :  { %947 = vst [vmem:[%s3720_s20] sm:$0xff] %v946_v11 }
 0xc03   :  { %v1056_v14 = vpop.f32.mrb[24].mxu1 }
 0xc04   :  { %v1057_v15 = vadd.f32 %v3320_v8, %v1056_v14  ;;  %v2584_v16 = vpop.f32.mrb[25].mxu1 }
 0xc05   :  { %v1059_v17 = vpop.f32.mrb[26].mxu1 }
 0xc06   :  { %v1062_v18 = vadd.f32 %v1057_v15, %v939_v9  ;;  %v2585_v19 = vpop.f32.mrb[27].mxu1 }
 0xc08   :  { %2756 = vtanh.f32 %v1062_v18  ;;  %v2398_v28 = vmul.f32 -1.442695, %v1062_v18 }
 0xc0b   :  { %v1177_v20 = vpop.f32.mrb[28].mxu1 }
 0xc0c   :  { %v1183_v21 = vadd.f32 %v1177_v20, %v3237_v37  ;;  %v2592_v22 = vpop.f32.mrb[29].mxu1 }
 0xc0d   :  { %v1180_v23 = vpop.f32.mrb[30].mxu1 }
 0xc0e   :  { %2758 = vtanh.f32 %v1183_v21  ;;  %v2593_v24 = vpop.f32.mrb[31].mxu1  ;;  %v2402_v29 = vmul.f32 -1.442695, %v1183_v21 }
 0xc0f   :  { %2760 = vpow2.f32 %v2398_v28 }
 0xc10   :  { %2762 = vpow2.f32 %v2402_v29 }
 0xc12   :  { %v2757_v26 = vpop.eup %2756 }
 0xc13   :  { %1072 = vrot.lane.b32.xlu0 %v2757_v26, %s2920_s28 }
 0xc18   :  { %v2759_v27 = vpop.eup %2758 }
 0xc19   :  { %1193 = vrot.lane.b32.xlu1 %v2759_v27, %s2920_s28  ;;  %v2761_v30 = vpop.eup %2760 }
 0xc1a   :  { %v1066_v31 = vadd.f32 1.0, %v2761_v30  ;;  %v2763_v32 = vpop.eup %2762 }
 0xc1b   :  { %v1187_v33 = vadd.f32 1.0, %v2763_v32 }
 0xc1c   :  { %2764 = vrcp.f32 %v1066_v31 }
 0xc1d   :  { %2766 = vrcp.f32 %v1187_v33 }
 0xc26   :  { %v2765_v37 = vpop.eup %2764 }
 0xc27   :  { %v2767_v44 = vpop.eup %2766  ;;  %v1070_v50 = vmul.f32 %v2765_v37, %v3332_v47 }
 0xc28   :  { %v1191_v54 = vmul.f32 %v2767_v44, %v3336_v51 }
 0xc85   :  { %v1073_v41 = vpop.permute.xlu0 %1072 }
 0xc86   :  { %v1075_v43 = vmul.f32 %v2765_v37, %v1073_v41 }
 0xc88   :  { %1077 = vrot.lane.b32.xlu0 %v1075_v43, %s2921_s6 }
 0xc8b   :  { %v1194_v46 = vpop.permute.xlu1 %1193 }
 0xc8c   :  { %v1196_v48 = vmul.f32 %v2767_v44, %v1194_v46 }
 0xc8e   :  { %1198 = vrot.lane.b32.xlu1 %v1196_v48, %s2921_s6 }
 0xcfa   :  { %v1078_v52 = vpop.permute.xlu0 %1077 }
 0xcfb   :  { %v3379_v53 = vadd.f32 %v1078_v52, %v1070_v50 }
 0xcfd   :  { %2768 = vtanh.f32 %v3379_v53 }
 0xd00   :  { %v1199_v62 = vpop.permute.xlu1 %1198 }
 0xd01   :  { %v3383_v63 = vadd.f32 %v1199_v62, %v1191_v54 }
 0xd03   :  { %2770 = vtanh.f32 %v3383_v63 }
 0xd07   :  { %v2769_v2 = vpop.eup %2768 }
 0xd08   :  { %1083 = vrot.lane.b32.xlu0 %v2769_v2, %s2920_s28 }
 0xd0d   :  { %v2771_v4 = vpop.eup %2770 }
 0xd0e   :  { %1204 = vrot.lane.b32.xlu1 %v2771_v4, %s2920_s28 }
 0xd7a   :  { %v1084_v5 = vpop.permute.xlu0 %1083 }
 0xd7b   :  { %v1086_v47 = vmul.f32 %v2765_v37, %v1084_v5 }
 0xd7d   :  { %v1087_v56 = vpack.c.bf16 %v1086_v47, %v1086_v47 }
 0xd7f   :  { %1089 = vrot.lane.b32.xlu0 %v1087_v56, %s2921_s6 }
 0xd80   :  { %v1205_v6 = vpop.permute.xlu1 %1204 }
 0xd81   :  { %v1207_v9 = vmul.f32 %v2767_v44, %v1205_v6 }
 0xd83   :  { %v1208_v10 = vpack.c.bf16 %v1207_v9, %v1207_v9 }
 0xd85   :  { %1210 = vrot.lane.b32.xlu1 %v1208_v10, %s2921_s6 }
 0xdf1   :  { %v1090_v51 = vpop.permute.xlu0 %1089 }
 0xdf2   :  { %2399 = vmatmul.mubr.msk.bf16.vlgmr.msra.gmra.mrb[20].mxu0 %vm99_vm1, %v1090_v51 }
 0xdf3   :  { %2595 = vmatpush3.bf16.msra.mxu0 %v3285_v0  ;;  %2598 = vmatprep.mubr.msk.bf16.mxu0 %vm2919_vm0, %v2918_v1 }
 0xdf4   :  { %2596 = vmatprep.subr.bf16.mxu0 %v2918_v1 }
 0xdf7   :  { %2597 = vmatpush3.bf16.msra.mxu0 %v3296_v3  ;;  %v1211_v11 = vpop.permute.xlu1 %1210 }
 0xdf8   :  { %2602 = vmatprep.subr.bf16.mxu0 %v2918_v1 }
 0xdfa   :  { %2599 = vmatmul.mubr.msk.bf16.vlgmr.msra.gmra.mrb[24].mxu0 %vm99_vm1, %v1211_v11 }
 0xdfb   :  { %2603 = vmatpush3.bf16.msra.mxu0 %v3168_v35  ;;  %2606 = vmatprep.mubr.msk.bf16.mxu0 %vm2919_vm0, %v2918_v1 }
 0xdfc   :  { %2604 = vmatprep.subr.bf16.mxu0 %v2918_v1 }
 0xdff   :  { %2605 = vmatpush3.bf16.msra.mxu0 %v3199_v45 }
 0xe00   :  { %1477 = vmatprep.subr.bf16.mxu0 %v3253_v57 }
 0xe02   :  { %2607 = vmatmul.mubr.msk.bf16.vlgmr.msra.gmra.mrb[28].mxu0 %vm99_vm1, %v1211_v11 }
 0xe03   :  { %1478 = vmatpush1.bf16.msra.mxu0 %v3258_v58  ;;  %1509 = vmatprep.mubr.bf16.mxu0 %v2922_v60 }
 0xe04   :  { %1479 = vmatprep.subr.bf16.mxu0 %v3263_v59 }
 0xe07   :  { %1480 = vmatpush1.bf16.msra.mxu0 %v3271_v61 }
 0xe08   :  { %2626 = vmatprep.subr.bf16.mxu0 %v2918_v1 }
 0xec5   :  { %v1128_v12 = vpop.f32.mrb[20].mxu0 }
 0xec6   :  { %v1130_v13 = vpop.f32.mrb[21].mxu0 }
 0xec7   :  { %v1135_v14 = vadd.f32 %v3366_v7, %v1130_v13  ;;  %v1132_v15 = vpop.f32.mrb[22].mxu0 }
 0xec8   :  { %v1133_v16 = vpop.f32.mrb[23].mxu0 }
 0xec9   :  { %2400 = vst [vmem:[%s3720_s20 + $0x8] sm:$0xff] %v1135_v14 }
 0xecd   :  { %v1249_v17 = vpop.f32.mrb[24].mxu0 }
 0xece   :  { %v1250_v18 = vadd.f32 %v3320_v8, %v1249_v17  ;;  %v2600_v19 = vpop.f32.mrb[25].mxu0 }
 0xecf   :  { %v1252_v20 = vpop.f32.mrb[26].mxu0 }
 0xed0   :  { %v1255_v21 = vadd.f32 %v1250_v18, %v1128_v12  ;;  %v2601_v22 = vpop.f32.mrb[27].mxu0 }
 0xed2   :  { %2772 = vtanh.f32 %v1255_v21  ;;  %v2404_v31 = vmul.f32 -1.442695, %v1255_v21 }
 0xed5   :  { %v1367_v23 = vpop.f32.mrb[28].mxu0 }
 0xed6   :  { %v1373_v24 = vadd.f32 %v1367_v23, %v3239_v38  ;;  %v2608_v26 = vpop.f32.mrb[29].mxu0 }
 0xed7   :  { %v1370_v27 = vpop.f32.mrb[30].mxu0 }
 0xed8   :  { %2774 = vtanh.f32 %v1373_v24  ;;  %v2609_v28 = vpop.f32.mrb[31].mxu0  ;;  %v2408_v32 = vmul.f32 -1.442695, %v1373_v24 }
 0xed9   :  { %2776 = vpow2.f32 %v2404_v31 }
 0xeda   :  { %2778 = vpow2.f32 %v2408_v32 }
 0xedc   :  { %v2773_v29 = vpop.eup %2772 }
 0xedd   :  { %1265 = vrot.lane.b32.xlu0 %v2773_v29, %s2920_s28 }
 0xee2   :  { %v2775_v30 = vpop.eup %2774 }
 0xee3   :  { %1383 = vrot.lane.b32.xlu1 %v2775_v30, %s2920_s28  ;;  %v2777_v33 = vpop.eup %2776 }
 0xee4   :  { %v1259_v37 = vadd.f32 1.0, %v2777_v33  ;;  %v2779_v41 = vpop.eup %2778 }
 0xee5   :  { %v1377_v43 = vadd.f32 1.0, %v2779_v41 }
 0xee6   :  { %2780 = vrcp.f32 %v1259_v37 }
 0xee7   :  { %2782 = vrcp.f32 %v1377_v43 }
 0xef0   :  { %v2781_v38 = vpop.eup %2780 }
 0xef1   :  { %v2783_v48 = vpop.eup %2782  ;;  %v1263_v54 = vmul.f32 %v2781_v38, %v3379_v53 }
 0xef2   :  { %v1381_v4 = vmul.f32 %v2783_v48, %v3383_v63 }
 0xf4f   :  { %v1266_v44 = vpop.permute.xlu0 %1265 }
 0xf50   :  { %v1268_v46 = vmul.f32 %v2781_v38, %v1266_v44 }
 0xf52   :  { %1270 = vrot.lane.b32.xlu0 %v1268_v46, %s2921_s6 }
 0xf55   :  { %v1384_v50 = vpop.permute.xlu1 %1383 }
 0xf56   :  { %v1386_v52 = vmul.f32 %v2783_v48, %v1384_v50 }
 0xf58   :  { %1388 = vrot.lane.b32.xlu1 %v1386_v52, %s2921_s6 }
 0xfc4   :  { %v1271_v62 = vpop.permute.xlu0 %1270 }
 0xfc5   :  { %v3421_v2 = vadd.f32 %v1271_v62, %v1263_v54 }
 0xfc7   :  { %2784 = vtanh.f32 %v3421_v2 }
 0xfca   :  { %v1389_v5 = vpop.permute.xlu1 %1388 }
 0xfcb   :  { %v3425_v47 = vadd.f32 %v1389_v5, %v1381_v4 }
 0xfcd   :  { %2786 = vtanh.f32 %v3425_v47 }
 0xfd1   :  { %v2785_v56 = vpop.eup %2784 }
 0xfd2   :  { %1276 = vrot.lane.b32.xlu0 %v2785_v56, %s2920_s28 }
 0xfd7   :  { %v2787_v6 = vpop.eup %2786 }
 0xfd8   :  { %1394 = vrot.lane.b32.xlu1 %v2787_v6, %s2920_s28 }
0x1044   :  { %v1277_v9 = vpop.permute.xlu0 %1276 }
0x1045   :  { %v1279_v53 = vmul.f32 %v2781_v38, %v1277_v9 }
0x1047   :  { %v1280_v10 = vpack.c.bf16 %v1279_v53, %v1279_v53 }
0x1049   :  { %1282 = vrot.lane.b32.xlu0 %v1280_v10, %s2921_s6 }
0x104a   :  { %v1395_v51 = vpop.permute.xlu1 %1394 }
0x104b   :  { %v1397_v11 = vmul.f32 %v2783_v48, %v1395_v51 }
0x104d   :  { %v1398_v12 = vpack.c.bf16 %v1397_v11, %v1397_v11 }
0x104f   :  { %1400 = vrot.lane.b32.xlu1 %v1398_v12, %s2921_s6 }
0x10bb   :  { %v1283_v63 = vpop.permute.xlu0 %1282 }
0x10bc   :  { %2405 = vmatmul.mubr.msk.bf16.vlgmr.msra.gmra.mrb[32].mxu1 %vm99_vm1, %v1283_v63 }
0x10bd   :  { %2611 = vmatpush3.bf16.msra.mxu1 %v3285_v0  ;;  %2614 = vmatprep.mubr.msk.bf16.mxu1 %vm2919_vm0, %v2918_v1 }
0x10be   :  { %2612 = vmatprep.subr.bf16.mxu1 %v2918_v1 }
0x10c1   :  { %2613 = vmatpush3.bf16.msra.mxu1 %v3296_v3  ;;  %v1401_v13 = vpop.permute.xlu1 %1400 }
0x10c2   :  { %2618 = vmatprep.subr.bf16.mxu1 %v2918_v1 }
0x10c4   :  { %2615 = vmatmul.mubr.msk.bf16.vlgmr.msra.gmra.mrb[36].mxu1 %vm99_vm1, %v1401_v13 }
0x10c5   :  { %2619 = vmatpush3.bf16.msra.mxu1 %v3168_v35  ;;  %2622 = vmatprep.mubr.msk.bf16.mxu1 %vm2919_vm0, %v2918_v1 }
0x10c6   :  { %2620 = vmatprep.subr.bf16.mxu1 %v2918_v1 }
0x10c9   :  { %2621 = vmatpush3.bf16.msra.mxu1 %v3199_v45 }
0x10ca   :  { %1670 = vmatprep.subr.bf16.mxu1 %v3253_v57 }
0x10cc   :  { %2623 = vmatmul.mubr.msk.bf16.vlgmr.msra.gmra.mrb[40].mxu1 %vm99_vm1, %v1401_v13 }
0x10cd   :  { %1671 = vmatpush1.bf16.msra.mxu1 %v3258_v58  ;;  %1702 = vmatprep.mubr.bf16.mxu1 %v2922_v60 }
0x10ce   :  { %1672 = vmatprep.subr.bf16.mxu1 %v3263_v59 }
0x10d1   :  { %1673 = vmatpush1.bf16.msra.mxu1 %v3271_v61 }
0x10d2   :  { %2642 = vmatprep.subr.bf16.mxu1 %v2918_v1 }
0x118f   :  { %v1321_v14 = vpop.f32.mrb[32].mxu1 }
0x1190   :  { %v1323_v15 = vpop.f32.mrb[33].mxu1 }
0x1191   :  { %v1328_v16 = vadd.f32 %v3366_v7, %v1323_v15  ;;  %v1325_v17 = vpop.f32.mrb[34].mxu1 }
0x1192   :  { %v1326_v18 = vpop.f32.mrb[35].mxu1 }
0x1193   :  { %2406 = vst [vmem:[%s3720_s20 + $0x10] sm:$0xff] %v1328_v16 }
0x1197   :  { %v1439_v19 = vpop.f32.mrb[36].mxu1 }
0x1198   :  { %v1440_v20 = vadd.f32 %v3320_v8, %v1439_v19  ;;  %v2616_v21 = vpop.f32.mrb[37].mxu1 }
0x1199   :  { %v1442_v22 = vpop.f32.mrb[38].mxu1 }
0x119a   :  { %v1445_v23 = vadd.f32 %v1440_v20, %v1321_v14  ;;  %v2617_v24 = vpop.f32.mrb[39].mxu1 }
0x119c   :  { %2788 = vtanh.f32 %v1445_v23  ;;  %v2410_v33 = vmul.f32 -1.442695, %v1445_v23 }
0x119f   :  { %v1560_v26 = vpop.f32.mrb[40].mxu1 }
0x11a0   :  { %v1566_v27 = vadd.f32 %v1560_v26, %v3233_v34  ;;  %v2624_v28 = vpop.f32.mrb[41].mxu1 }
0x11a1   :  { %v1563_v29 = vpop.f32.mrb[42].mxu1 }
0x11a2   :  { %2790 = vtanh.f32 %v1566_v27  ;;  %v2625_v30 = vpop.f32.mrb[43].mxu1  ;;  %v2414_v37 = vmul.f32 -1.442695, %v1566_v27 }
0x11a3   :  { %2792 = vpow2.f32 %v2410_v33 }
0x11a4   :  { %2794 = vpow2.f32 %v2414_v37 }
0x11a6   :  { %v2789_v31 = vpop.eup %2788 }
0x11a7   :  { %1455 = vrot.lane.b32.xlu0 %v2789_v31, %s2920_s28 }
0x11ac   :  { %v2791_v32 = vpop.eup %2790 }
0x11ad   :  { %1576 = vrot.lane.b32.xlu1 %v2791_v32, %s2920_s28  ;;  %v2793_v41 = vpop.eup %2792 }
0x11ae   :  { %v1449_v43 = vadd.f32 1.0, %v2793_v41  ;;  %v2795_v38 = vpop.eup %2794 }
0x11af   :  { %v1570_v44 = vadd.f32 1.0, %v2795_v38 }
0x11b0   :  { %2796 = vrcp.f32 %v1449_v43 }
0x11b1   :  { %2798 = vrcp.f32 %v1570_v44 }
0x11ba   :  { %v2797_v34 = vpop.eup %2796 }
0x11bb   :  { %v2799_v50 = vpop.eup %2798  ;;  %v1453_v62 = vmul.f32 %v2797_v34, %v3421_v2 }
0x11bc   :  { %v1574_v56 = vmul.f32 %v2799_v50, %v3425_v47 }
0x1219   :  { %v1456_v46 = vpop.permute.xlu0 %1455 }
0x121a   :  { %v1458_v48 = vmul.f32 %v2797_v34, %v1456_v46 }
0x121c   :  { %1460 = vrot.lane.b32.xlu0 %v1458_v48, %s2921_s6 }
0x121f   :  { %v1577_v52 = vpop.permute.xlu1 %1576 }
0x1220   :  { %v1579_v54 = vmul.f32 %v2799_v50, %v1577_v52 }
0x1222   :  { %1581 = vrot.lane.b32.xlu1 %v1579_v54, %s2921_s6 }
0x128e   :  { %v1461_v4 = vpop.permute.xlu0 %1460 }
0x128f   :  { %v3463_v5 = vadd.f32 %v1461_v4, %v1453_v62 }
0x1291   :  { %2800 = vtanh.f32 %v3463_v5 }
0x1294   :  { %v1582_v6 = vpop.permute.xlu1 %1581 }
0x1295   :  { %v3467_v9 = vadd.f32 %v1582_v6, %v1574_v56 }
0x1297   :  { %2802 = vtanh.f32 %v3467_v9 }
0x129b   :  { %v2801_v53 = vpop.eup %2800 }
0x129c   :  { %1466 = vrot.lane.b32.xlu0 %v2801_v53, %s2920_s28 }
0x12a1   :  { %v2803_v10 = vpop.eup %2802 }
0x12a2   :  { %1587 = vrot.lane.b32.xlu1 %v2803_v10, %s2920_s28 }
0x130e   :  { %v1467_v51 = vpop.permute.xlu0 %1466 }
0x130f   :  { %v1469_v2 = vmul.f32 %v2797_v34, %v1467_v51 }
0x1311   :  { %v1470_v11 = vpack.c.bf16 %v1469_v2, %v1469_v2 }
0x1313   :  { %1472 = vrot.lane.b32.xlu0 %v1470_v11, %s2921_s6 }
0x1314   :  { %v1588_v12 = vpop.permute.xlu1 %1587 }
0x1315   :  { %v1590_v63 = vmul.f32 %v2799_v50, %v1588_v12 }
0x1317   :  { %v1591_v13 = vpack.c.bf16 %v1590_v63, %v1590_v63 }
0x1319   :  { %1593 = vrot.lane.b32.xlu1 %v1591_v13, %s2921_s6 }
0x1385   :  { %v1473_v47 = vpop.permute.xlu0 %1472 }
0x1386   :  { %2411 = vmatmul.mubr.msk.bf16.vlgmr.msra.gmra.mrb[32].mxu0 %vm99_vm1, %v1473_v47  ;;  %v3527_v47 = vld [vmem:[%s3715_s15] sm:$0xff]  }
0x1387   :  { %2627 = vmatpush3.bf16.msra.mxu0 %v3285_v0  ;;  %2630 = vmatprep.mubr.msk.bf16.mxu0 %vm2919_vm0, %v2918_v1 }
0x1388   :  { %2628 = vmatprep.subr.bf16.mxu0 %v2918_v1 }
0x138b   :  { %2629 = vmatpush3.bf16.msra.mxu0 %v3296_v3  ;;  %v1594_v14 = vpop.permute.xlu1 %1593 }
0x138c   :  { %2634 = vmatprep.subr.bf16.mxu0 %v2918_v1 }
0x138e   :  { %2631 = vmatmul.mubr.msk.bf16.vlgmr.msra.gmra.mrb[36].mxu0 %vm99_vm1, %v1594_v14 }
0x138f   :  { %2635 = vmatpush3.bf16.msra.mxu0 %v3168_v35  ;;  %2638 = vmatprep.mubr.msk.bf16.mxu0 %vm2919_vm0, %v2918_v1 }
0x1390   :  { %2636 = vmatprep.subr.bf16.mxu0 %v2918_v1 }
0x1393   :  { %2637 = vmatpush3.bf16.msra.mxu0 %v3199_v45 }
0x1394   :  { %1860 = vmatprep.subr.bf16.mxu0 %v3253_v57 }
0x1396   :  { %2639 = vmatmul.mubr.msk.bf16.vlgmr.msra.gmra.mrb[40].mxu0 %vm99_vm1, %v1594_v14  ;;  %v3536_v14 = vld [vmem:[%s3715_s15 + $0x8] sm:$0xff]  }
0x1397   :  { %1861 = vmatpush1.bf16.msra.mxu0 %v3258_v58  ;;  %1892 = vmatprep.mubr.bf16.mxu0 %v2922_v60 }
0x1398   :  { %1862 = vmatprep.subr.bf16.mxu0 %v3263_v59 }
0x139b   :  { %1863 = vmatpush1.bf16.msra.mxu0 %v3271_v61 }
0x139c   :  { %2658 = vmatprep.subr.bf16.mxu0 %v2918_v1 }
0x1459   :  { %v1511_v35 = vpop.f32.mrb[32].mxu0 }
0x145a   :  { %v1513_v15 = vpop.f32.mrb[33].mxu0 }
0x145b   :  { %v1518_v16 = vadd.f32 %v3366_v7, %v1513_v15  ;;  %v1515_v17 = vpop.f32.mrb[34].mxu0 }
0x145c   :  { %v1516_v45 = vpop.f32.mrb[35].mxu0 }
0x145d   :  { %2412 = vst [vmem:[%s3720_s20 + $0x18] sm:$0xff] %v1518_v16 }
0x1461   :  { %v1632_v18 = vpop.f32.mrb[36].mxu0 }
0x1462   :  { %v1633_v19 = vadd.f32 %v3320_v8, %v1632_v18  ;;  %v2632_v20 = vpop.f32.mrb[37].mxu0 }
0x1463   :  { %v1635_v21 = vpop.f32.mrb[38].mxu0 }
0x1464   :  { %v1638_v22 = vadd.f32 %v1633_v19, %v1511_v35  ;;  %v2633_v23 = vpop.f32.mrb[39].mxu0 }
0x1466   :  { %2804 = vtanh.f32 %v1638_v22  ;;  %v2416_v32 = vmul.f32 -1.442695, %v1638_v22 }
0x1469   :  { %v1750_v24 = vpop.f32.mrb[40].mxu0 }
0x146a   :  { %v1756_v26 = vadd.f32 %v1750_v24, %v3235_v36  ;;  %v2640_v27 = vpop.f32.mrb[41].mxu0 }
0x146b   :  { %v1753_v28 = vpop.f32.mrb[42].mxu0 }
0x146c   :  { %2806 = vtanh.f32 %v1756_v26  ;;  %v2641_v29 = vpop.f32.mrb[43].mxu0  ;;  %v2420_v33 = vmul.f32 -1.442695, %v1756_v26 }
0x146d   :  { %2808 = vpow2.f32 %v2416_v32 }
0x146e   :  { %2810 = vpow2.f32 %v2420_v33 }
0x1470   :  { %v2805_v30 = vpop.eup %2804 }
0x1471   :  { %1648 = vrot.lane.b32.xlu0 %v2805_v30, %s2920_s28 }
0x1476   :  { %v2807_v31 = vpop.eup %2806 }
0x1477   :  { %1766 = vrot.lane.b32.xlu1 %v2807_v31, %s2920_s28  ;;  %v2809_v37 = vpop.eup %2808 }
0x1478   :  { %v1642_v41 = vadd.f32 1.0, %v2809_v37  ;;  %v2811_v43 = vpop.eup %2810 }
0x1479   :  { %v1760_v38 = vadd.f32 1.0, %v2811_v43 }
0x147a   :  { %2812 = vrcp.f32 %v1642_v41 }
0x147b   :  { %2814 = vrcp.f32 %v1760_v38 }
0x1484   :  { %v2813_v36 = vpop.eup %2812 }
0x1485   :  { %v2815_v46 = vpop.eup %2814  ;;  %v1646_v52 = vmul.f32 %v2813_v36, %v3463_v5 }
0x1486   :  { %v1764_v4 = vmul.f32 %v2815_v46, %v3467_v9 }
0x14e3   :  { %v1649_v44 = vpop.permute.xlu0 %1648 }
0x14e4   :  { %v1651_v34 = vmul.f32 %v2813_v36, %v1649_v44 }
0x14e6   :  { %1653 = vrot.lane.b32.xlu0 %v1651_v34, %s2921_s6 }
0x14e9   :  { %v1767_v48 = vpop.permute.xlu1 %1766 }
0x14ea   :  { %v1769_v50 = vmul.f32 %v2815_v46, %v1767_v48 }
0x14ec   :  { %1771 = vrot.lane.b32.xlu1 %v1769_v50, %s2921_s6 }
0x1558   :  { %v1654_v54 = vpop.permute.xlu0 %1653 }
0x1559   :  { %v3505_v62 = vadd.f32 %v1654_v54, %v1646_v52 }
0x155b   :  { %2816 = vtanh.f32 %v3505_v62 }
0x155e   :  { %v1772_v56 = vpop.permute.xlu1 %1771 }
0x155f   :  { %v3509_v6 = vadd.f32 %v1772_v56, %v1764_v4 }
0x1561   :  { %2818 = vtanh.f32 %v3509_v6 }
0x1565   :  { %v2817_v53 = vpop.eup %2816 }
0x1566   :  { %1659 = vrot.lane.b32.xlu0 %v2817_v53, %s2920_s28 }
0x156b   :  { %v2819_v10 = vpop.eup %2818 }
0x156c   :  { %1777 = vrot.lane.b32.xlu1 %v2819_v10, %s2920_s28 }
0x15d8   :  { %v1660_v51 = vpop.permute.xlu0 %1659 }
0x15d9   :  { %v1662_v5 = vmul.f32 %v2813_v36, %v1660_v51 }
0x15db   :  { %v1663_v2 = vpack.c.bf16 %v1662_v5, %v1662_v5 }
0x15dd   :  { %1665 = vrot.lane.b32.xlu0 %v1663_v2, %s2921_s6 }
0x15de   :  { %v1778_v11 = vpop.permute.xlu1 %1777 }
0x15df   :  { %v1780_v12 = vmul.f32 %v2815_v46, %v1778_v11  ;;  %v2864_v11 = vld [vmem:[%s3716_s16 + $0x14] ss:$8 sps:$4 sm:$0xff]  }
0x15e1   :  { %v1781_v63 = vpack.c.bf16 %v1780_v12, %v1780_v12  ;;  %v2865_v12 = vld [vmem:[%s3716_s16 + $0x10] ss:$8 sps:$4 sm:$0xff]  }
0x15e3   :  { %1783 = vrot.lane.b32.xlu1 %v1781_v63, %s2921_s6 }
0x164f   :  { %v1666_v9 = vpop.permute.xlu0 %1665 }
0x1650   :  { %2417 = vmatmul.mubr.msk.bf16.vlgmr.msra.gmra.mrb[44].mxu1 %vm99_vm1, %v1666_v9 }
0x1651   :  { %2643 = vmatpush3.bf16.msra.mxu1 %v3285_v0  ;;  %2646 = vmatprep.mubr.msk.bf16.mxu1 %vm2919_vm0, %v2918_v1 }
0x1652   :  { %2644 = vmatprep.subr.bf16.mxu1 %v2918_v1 }
0x1655   :  { %2645 = vmatpush3.bf16.msra.mxu1 %v3296_v3  ;;  %v1784_v13 = vpop.permute.xlu1 %1783 }
0x1656   :  { %2650 = vmatprep.subr.bf16.mxu1 %v2918_v1 }
0x1658   :  { %2647 = vmatmul.mubr.msk.bf16.vlgmr.msra.gmra.mrb[48].mxu1 %vm99_vm1, %v1784_v13 }
0x1659   :  { %2651 = vmatpush3.bf16.msra.mxu1 %v3527_v47  ;;  %2654 = vmatprep.mubr.msk.bf16.mxu1 %vm2919_vm0, %v2918_v1 }
0x165a   :  { %2652 = vmatprep.subr.bf16.mxu1 %v2918_v1 }
0x165d   :  { %2653 = vmatpush3.bf16.msra.mxu1 %v3536_v14 }
0x165e   :  { %2053 = vmatprep.subr.bf16.mxu1 %v3253_v57 }
0x1660   :  { %2655 = vmatmul.mubr.msk.bf16.vlgmr.msra.gmra.mrb[52].mxu1 %vm99_vm1, %v1784_v13 }
0x1661   :  { %2054 = vmatpush1.bf16.msra.mxu1 %v3258_v58  ;;  %2085 = vmatprep.mubr.bf16.mxu1 %v2922_v60 }
0x1662   :  { %2055 = vmatprep.subr.bf16.mxu1 %v3263_v59 }
0x1665   :  { %2056 = vmatpush1.bf16.msra.mxu1 %v3271_v61 }
0x1666   :  { %2674 = vmatprep.subr.bf16.mxu1 %v2918_v1 }
0x1723   :  { %v1704_v35 = vpop.f32.mrb[44].mxu1 }
0x1724   :  { %v1706_v15 = vpop.f32.mrb[45].mxu1 }
0x1725   :  { %v1711_v16 = vadd.f32 %v3366_v7, %v1706_v15  ;;  %v1708_v17 = vpop.f32.mrb[46].mxu1 }
0x1726   :  { %v1709_v45 = vpop.f32.mrb[47].mxu1 }
0x1727   :  { %2418 = vst [vmem:[%s3720_s20 + $0x20] sm:$0xff] %v1711_v16 }
0x172b   :  { %v1822_v57 = vpop.f32.mrb[48].mxu1 }
0x172c   :  { %v1823_v58 = vadd.f32 %v3320_v8, %v1822_v57  ;;  %v2648_v18 = vpop.f32.mrb[49].mxu1 }
0x172d   :  { %v1825_v19 = vpop.f32.mrb[50].mxu1 }
0x172e   :  { %v1828_v59 = vadd.f32 %v1823_v58, %v1704_v35  ;;  %v2649_v20 = vpop.f32.mrb[51].mxu1 }
0x1730   :  { %2820 = vtanh.f32 %v1828_v59  ;;  %v2422_v28 = vmul.f32 -1.442695, %v1828_v59 }
0x1733   :  { %v1943_v61 = vpop.f32.mrb[52].mxu1 }
0x1734   :  { %v1949_v21 = vadd.f32 %v1943_v61, %v3241_v39  ;;  %v2656_v22 = vpop.f32.mrb[53].mxu1 }
0x1735   :  { %v1946_v23 = vpop.f32.mrb[54].mxu1 }
0x1736   :  { %2822 = vtanh.f32 %v1949_v21  ;;  %v2657_v24 = vpop.f32.mrb[55].mxu1  ;;  %v2426_v29 = vmul.f32 -1.442695, %v1949_v21 }
0x1737   :  { %2824 = vpow2.f32 %v2422_v28 }
0x1738   :  { %2826 = vpow2.f32 %v2426_v29 }
0x173a   :  { %v2821_v26 = vpop.eup %2820 }
0x173b   :  { %1838 = vrot.lane.b32.xlu0 %v2821_v26, %s2920_s28 }
0x1740   :  { %v2823_v27 = vpop.eup %2822 }
0x1741   :  { %1959 = vrot.lane.b32.xlu1 %v2823_v27, %s2920_s28  ;;  %v2825_v30 = vpop.eup %2824 }
0x1742   :  { %v1832_v31 = vadd.f32 1.0, %v2825_v30  ;;  %v2827_v32 = vpop.eup %2826 }
0x1743   :  { %v1953_v33 = vadd.f32 1.0, %v2827_v32 }
0x1744   :  { %2828 = vrcp.f32 %v1832_v31 }
0x1745   :  { %2830 = vrcp.f32 %v1953_v33 }
0x174e   :  { %v2829_v39 = vpop.eup %2828 }
0x174f   :  { %v2831_v43 = vpop.eup %2830  ;;  %v1836_v44 = vmul.f32 %v2829_v39, %v3505_v62 }
0x1750   :  { %v1957_v48 = vmul.f32 %v2831_v43, %v3509_v6 }
0x17ad   :  { %v1839_v37 = vpop.permute.xlu0 %1838 }
0x17ae   :  { %v1841_v41 = vmul.f32 %v2829_v39, %v1839_v37 }
0x17b0   :  { %1843 = vrot.lane.b32.xlu0 %v1841_v41, %s2921_s6 }
0x17b3   :  { %v1960_v38 = vpop.permute.xlu1 %1959 }
0x17b4   :  { %v1962_v36 = vmul.f32 %v2831_v43, %v1960_v38 }
0x17b6   :  { %1964 = vrot.lane.b32.xlu1 %v1962_v36, %s2921_s6 }
0x1822   :  { %v1844_v34 = vpop.permute.xlu0 %1843 }
0x1823   :  { %v3557_v46 = vadd.f32 %v1844_v34, %v1836_v44 }
0x1825   :  { %2832 = vtanh.f32 %v3557_v46 }
0x1828   :  { %v1965_v50 = vpop.permute.xlu1 %1964 }
0x1829   :  { %v3561_v52 = vadd.f32 %v1965_v50, %v1957_v48 }
0x182b   :  { %2834 = vtanh.f32 %v3561_v52 }
0x182f   :  { %v2833_v54 = vpop.eup %2832 }
0x1830   :  { %1849 = vrot.lane.b32.xlu0 %v2833_v54, %s2920_s28 }
0x1835   :  { %v2835_v4 = vpop.eup %2834 }
0x1836   :  { %1970 = vrot.lane.b32.xlu1 %v2835_v4, %s2920_s28  ;;  %v2866_v4 = vld [vmem:[%s3714_s14] sm:$0xff]  }
0x18a2   :  { %v1850_v56 = vpop.permute.xlu0 %1849 }
0x18a3   :  { %v1852_v62 = vmul.f32 %v2829_v39, %v1850_v56  ;;  %v2867_v56 = vld [vmem:[%s3714_s14 + $0x8] sm:$0xff]   ;;  %s2923_s14 = smov 96  }
0x18a5   :  { %v1853_v53 = vpack.c.bf16 %v1852_v62, %v1852_v62 }
0x18a7   :  { %1855 = vrot.lane.b32.xlu0 %v1853_v53, %s2921_s6 }
0x18a8   :  { %v1971_v10 = vpop.permute.xlu1 %1970 }
0x18a9   :  { %v1973_v51 = vmul.f32 %v2831_v43, %v1971_v10 }
0x18ab   :  { %v1974_v5 = vpack.c.bf16 %v1973_v51, %v1973_v51 }
0x18ad   :  { %1976 = vrot.lane.b32.xlu1 %v1974_v5, %s2921_s6 }
0x1919   :  { %v1856_v6 = vpop.permute.xlu0 %1855 }
0x191a   :  { %2423 = vmatmul.mubr.msk.bf16.vlgmr.msra.gmra.mrb[44].mxu0 %vm99_vm1, %v1856_v6 }
0x191b   :  { %2659 = vmatpush3.bf16.msra.mxu0 %v3285_v0  ;;  %2662 = vmatprep.mubr.msk.bf16.mxu0 %vm2919_vm0, %v2918_v1  ;;  %v2862_v0 = vld [vmem:[%s3716_s16 + $0x4] ss:$8 sps:$4 sm:$0xff]  }
0x191c   :  { %2660 = vmatprep.subr.bf16.mxu0 %v2918_v1 }
0x191f   :  { %2661 = vmatpush3.bf16.msra.mxu0 %v3296_v3  ;;  %v1977_v2 = vpop.permute.xlu1 %1976  ;;  %v2863_v3 = vld [vmem:[%s3716_s16] ss:$8 sps:$4 sm:$0xff]  }
0x1920   :  { %2666 = vmatprep.subr.bf16.mxu0 %v2918_v1 }
0x1922   :  { %2663 = vmatmul.mubr.msk.bf16.vlgmr.msra.gmra.mrb[48].mxu0 %vm99_vm1, %v1977_v2 }
0x1923   :  { %2667 = vmatpush3.bf16.msra.mxu0 %v3527_v47  ;;  %2670 = vmatprep.mubr.msk.bf16.mxu0 %vm2919_vm0, %v2918_v1 }
0x1924   :  { %2668 = vmatprep.subr.bf16.mxu0 %v2918_v1 }
0x1927   :  { %2669 = vmatpush3.bf16.msra.mxu0 %v3536_v14 }
0x1928   :  { %2243 = vmatprep.subr.bf16.mxu0 %v2862_v0 }
0x192a   :  { %2671 = vmatmul.mubr.msk.bf16.vlgmr.msra.gmra.mrb[52].mxu0 %vm99_vm1, %v1977_v2 }
0x192b   :  { %2244 = vmatpush1.bf16.msra.mxu0 %v2863_v3  ;;  %2275 = vmatprep.mubr.bf16.mxu0 %v2922_v60 }
0x192c   :  { %2245 = vmatprep.subr.bf16.mxu0 %v2864_v11 }
0x192f   :  { %2246 = vmatpush1.bf16.msra.mxu0 %v2865_v12 }
0x19ed   :  { %v1894_v63 = vpop.f32.mrb[44].mxu0 }
0x19ee   :  { %v1896_v9 = vpop.f32.mrb[45].mxu0 }
0x19ef   :  { %v1901_v13 = vadd.f32 %v3366_v7, %v1896_v9  ;;  %v1898_v47 = vpop.f32.mrb[46].mxu0 }
0x19f0   :  { %v1899_v14 = vpop.f32.mrb[47].mxu0 }
0x19f1   :  { %2424 = vst [vmem:[%s3720_s20 + $0x28] sm:$0xff] %v1901_v13 }
0x19f5   :  { %v2015_v60 = vpop.f32.mrb[48].mxu0 }
0x19f6   :  { %v2016_v35 = vadd.f32 %v3320_v8, %v2015_v60  ;;  %v2664_v15 = vpop.f32.mrb[49].mxu0 }
0x19f7   :  { %v2018_v16 = vpop.f32.mrb[50].mxu0 }
0x19f8   :  { %v2021_v17 = vadd.f32 %v2016_v35, %v1894_v63  ;;  %v2665_v45 = vpop.f32.mrb[51].mxu0 }
0x19fa   :  { %2836 = vtanh.f32 %v2021_v17  ;;  %v2428_v21 = vmul.f32 -1.442695, %v2021_v17 }
0x19fd   :  { %v2133_v57 = vpop.f32.mrb[52].mxu0 }
0x19fe   :  { %v2139_v58 = vadd.f32 %v2133_v57, %v3243_v40  ;;  %v2672_v18 = vpop.f32.mrb[53].mxu0 }
0x19ff   :  { %v2136_v19 = vpop.f32.mrb[54].mxu0 }
0x1a00   :  { %2838 = vtanh.f32 %v2139_v58  ;;  %v2673_v59 = vpop.f32.mrb[55].mxu0  ;;  %v2432_v8 = vmul.f32 -1.442695, %v2139_v58 }
0x1a01   :  { %2840 = vpow2.f32 %v2428_v21 }
0x1a02   :  { %2842 = vpow2.f32 %v2432_v8 }
0x1a04   :  { %v2837_v20 = vpop.eup %2836 }
0x1a05   :  { %2031 = vrot.lane.b32.xlu0 %v2837_v20, %s2920_s28 }
0x1a0a   :  { %v2839_v61 = vpop.eup %2838 }
0x1a0b   :  { %2149 = vrot.lane.b32.xlu1 %v2839_v61, %s2920_s28  ;;  %v2841_v22 = vpop.eup %2840 }
0x1a0c   :  { %v2025_v23 = vadd.f32 1.0, %v2841_v22  ;;  %v2843_v24 = vpop.eup %2842 }
0x1a0d   :  { %v2143_v26 = vadd.f32 1.0, %v2843_v24 }
0x1a0e   :  { %2844 = vrcp.f32 %v2025_v23 }
0x1a0f   :  { %2846 = vrcp.f32 %v2143_v26 }
0x1a18   :  { %v2845_v40 = vpop.eup %2844 }
0x1a19   :  { %v2847_v29 = vpop.eup %2846  ;;  %v2029_v32 = vmul.f32 %v2845_v40, %v3557_v46 }
0x1a1a   :  { %v2147_v37 = vmul.f32 %v2847_v29, %v3561_v52 }
0x1a77   :  { %v2032_v27 = vpop.permute.xlu0 %2031 }
0x1a78   :  { %v2034_v28 = vmul.f32 %v2845_v40, %v2032_v27 }
0x1a7a   :  { %2036 = vrot.lane.b32.xlu0 %v2034_v28, %s2921_s6 }
0x1a7d   :  { %v2150_v30 = vpop.permute.xlu1 %2149 }
0x1a7e   :  { %v2152_v31 = vmul.f32 %v2847_v29, %v2150_v30 }
0x1a80   :  { %2154 = vrot.lane.b32.xlu1 %v2152_v31, %s2921_s6 }
0x1aec   :  { %v2037_v33 = vpop.permute.xlu0 %2036 }
0x1aed   :  { %v2039_v39 = vadd.f32 %v2037_v33, %v2029_v32 }
0x1aef   :  { %2848 = vtanh.f32 %v2039_v39 }
0x1af2   :  { %v2155_v41 = vpop.permute.xlu1 %2154 }
0x1af3   :  { %v3607_v43 = vadd.f32 %v2155_v41, %v2147_v37 }
0x1af5   :  { %2850 = vtanh.f32 %v3607_v43 }
0x1af9   :  { %v2849_v38 = vpop.eup %2848 }
0x1afa   :  { %2042 = vrot.lane.b32.xlu0 %v2849_v38, %s2920_s28 }
0x1aff   :  { %v2851_v36 = vpop.eup %2850 }
0x1b00   :  { %2160 = vrot.lane.b32.xlu1 %v2851_v36, %s2920_s28 }
0x1b6c   :  { %v2043_v44 = vpop.permute.xlu0 %2042 }
0x1b6d   :  { %v2045_v34 = vmul.f32 %v2845_v40, %v2043_v44 }
0x1b6f   :  { %v2046_v48 = vpack.c.bf16 %v2045_v34, %v2045_v34 }
0x1b71   :  { %2048 = vrot.lane.b32.xlu0 %v2046_v48, %s2921_s6 }
0x1b72   :  { %v2161_v46 = vpop.permute.xlu1 %2160 }
0x1b73   :  { %v2163_v50 = vmul.f32 %v2847_v29, %v2161_v46 }
0x1b75   :  { %v2164_v54 = vpack.c.bf16 %v2163_v50, %v2163_v50 }
0x1b77   :  { %2166 = vrot.lane.b32.xlu1 %v2164_v54, %s2921_s6 }
0x1be3   :  { %v2049_v52 = vpop.permute.xlu0 %2048 }
0x1be4   :  { %2429 = vmatmul.mubr.msk.bf16.vlgmr.msra.gmra.mrb[56].mxu1 %vm99_vm1, %v2049_v52 }
0x1be5   :  { %2675 = vmatpush3.bf16.msra.mxu1 %v2866_v4  ;;  %2678 = vmatprep.mubr.msk.bf16.mxu1 %vm2919_vm0, %v2918_v1 }
0x1be6   :  { %2676 = vmatprep.subr.bf16.mxu1 %v2918_v1  ;;  %v2868_v1 = vld [vmem:[%s3718_s18] ss:$0 sm:$0xff] }
0x1be9   :  { %2677 = vmatpush3.bf16.msra.mxu1 %v2867_v56  ;;  %v2167_v62 = vpop.permute.xlu1 %2166 }
0x1bec   :  { %2679 = vmatmul.mubr.msk.bf16.vlgmr.msra.gmra.mrb[60].mxu1 %vm99_vm1, %v2167_v62 }
0x1cb7   :  { %v2087_v53 = vpop.f32.mrb[56].mxu1 }
0x1cb8   :  { %v2089_v10 = vpop.f32.mrb[57].mxu1 }
0x1cb9   :  { %v2094_v51 = vadd.f32 %v3366_v7, %v2089_v10  ;;  %v2091_v5 = vpop.f32.mrb[58].mxu1 }
0x1cba   :  { %v2092_v6 = vpop.f32.mrb[59].mxu1 }
0x1cbb   :  { %2430 = vst [vmem:[%s3720_s20 + $0x30] sm:$0xff] %v2094_v51 }
0x1cbf   :  { %v2205_v2 = vpop.f32.mrb[60].mxu1 }
0x1cc0   :  { %v2206_v0 = vadd.f32 %v2868_v1, %v2205_v2  ;;  %v2680_v3 = vpop.f32.mrb[61].mxu1 }
0x1cc1   :  { %v2208_v11 = vpop.f32.mrb[62].mxu1 }
0x1cc2   :  { %v2211_v12 = vadd.f32 %v2206_v0, %v2087_v53  ;;  %v2681_v63 = vpop.f32.mrb[63].mxu1 }
0x1cc4   :  { %2852 = vtanh.f32 %v2211_v12  ;;  %v2434_v7 = vmul.f32 -1.442695, %v2211_v12 }
0x1cc6   :  { %2854 = vpow2.f32 %v2434_v7 }
0x1cce   :  { %v2853_v9 = vpop.eup %2852 }
0x1ccf   :  { %2221 = vrot.lane.b32.xlu0 %v2853_v9, %s2920_s28 }
0x1cd0   :  { %v2855_v13 = vpop.eup %2854 }
0x1cd1   :  { %v2215_v47 = vadd.f32 1.0, %v2855_v13 }
0x1cd3   :  { %2856 = vrcp.f32 %v2215_v47 }
0x1cdd   :  { %v2857_v14 = vpop.eup %2856 }
0x1cde   :  { %v2219_v15 = vmul.f32 %v2857_v14, %v2039_v39 }
0x1d41   :  { %v2222_v60 = vpop.permute.xlu0 %2221 }
0x1d42   :  { %v2224_v35 = vmul.f32 %v2857_v14, %v2222_v60 }
0x1d44   :  { %2226 = vrot.lane.b32.xlu1 %v2224_v35, %s2921_s6 }
0x1db6   :  { %v2227_v16 = vpop.permute.xlu1 %2226 }
0x1db7   :  { %v2229_v17 = vadd.f32 %v2227_v16, %v2219_v15 }
0x1db9   :  { %2858 = vtanh.f32 %v2229_v17 }
0x1dc3   :  { %v2859_v45 = vpop.eup %2858 }
0x1dc4   :  { %2232 = vrot.lane.b32.xlu0 %v2859_v45, %s2920_s28 }
0x1dc8   :  { %249 = vrot.lane.b32.xlu0 %v3123_v55, %s2921_s6 }
0x1dcc   :  { %442 = vrot.lane.b32.xlu0 %v3206_v49, %s2921_s6 }
0x1dd0   :  { %2287 = vrot.lane.b32.xlu0 %v2163_v50, %s2921_s6 }
0x1e36   :  { %v2233_v57 = vpop.permute.xlu0 %2232 }
0x1e37   :  { %v2235_v58 = vmul.f32 %v2857_v14, %v2233_v57 }
0x1e39   :  { %v2236_v18 = vpack.c.bf16 %v2235_v58, %v2235_v58  ;;  %2297 = vrot.lane.b32.xlu0 %v2235_v58, %s2921_s6 }
0x1e3a   :  { %v250_v19 = vpop.permute.xlu0 %249 }
0x1e3b   :  { %253 = vst.msk [vmem:[#allocation2 - $0x6] sm:$0xc0] %vm252_vm7, %v250_v19  ;;  %2238 = vrot.lane.b32.xlu1 %v2236_v18, %s2921_s6 }
0x1e3e   :  { %v443_v59 = vpop.permute.xlu0 %442 }
0x1e3f   :  { %446 = vst.msk [vmem:[#allocation2 - $0x4] sm:$0xc0] %vm252_vm7, %v443_v59  ;;  %255 = vrot.lane.b32.xlu1 %v3096_v42, %s2923_s14 }
0x1e42   :  { %v2288_v55 = vpop.permute.xlu0 %2287 }
0x1e43   :  { %2290 = vst.msk [vmem:[%s3723_s23] sm:$0xff] %vm99_vm1, %v2288_v55  ;;  %448 = vrot.lane.b32.xlu1 %v3142_v25, %s2923_s14 }
0x1e47   :  { %2292 = vrot.lane.b32.xlu1 %v3607_v43, %s2923_s14 }
0x1e4b   :  { %2303 = vrot.lane.b32.xlu1 %v2229_v17, %s2923_s14 }
0x1eab   :  { %v2298_v49 = vpop.permute.xlu0 %2297 }
0x1eac   :  { %2437 = vst.msk [vmem:[%s3723_s23 + $0x8] sm:$0xff] %vm99_vm1, %v2298_v49  ;;  %s2924_s23 = smov [#allocation2]  }
0x1ead   :  { %v2239_v20 = vpop.permute.xlu1 %2238  ;;  %s2315_s27 = sshll.u32 %s2924_s23, 4  ;;  %s2316_s27 = int_to_ptr.vmem [resolvable:$true] %s2315_s27 }
0x1eae   :  { %2435 = vmatmul.mubr.msk.bf16.vlgmr.msra.gmra.mrb[56].mxu0 %vm99_vm1, %v2239_v20  ;;  %s2870_s11 = scalar_lea.vmem %s2316_s27, 64  ;;  %p2875_p1 = scmp.lt.s32.totalorder %s2316_s27, %s2316_s27 }
0x1eaf   :  { %p2871_p0 = scmp.ne.s32.totalorder %s2316_s27, %s2870_s11  ;;  %p2876_p2 = scmp.lt.s32.totalorder %s2870_s11, %s2870_s11 }
0x1eb1   :  { %v256_v42 = vpop.permute.xlu1 %255  ;;  %p2877_p3 = por %p2876_p2, %p2875_p1 }
0x1eb2   :  { %258 = vst.msk [vmem:[#allocation4 - $0x6] sm:$0xc0] %vm252_vm7, %v256_v42 }
0x1eb3   :  { %p2878_p4 = pnand %p2877_p3, %p2871_p0 }
0x1eb5   :  { %v449_v61 = vpop.permute.xlu1 %448 }
0x1eb6   :  { %452 = vst.msk [vmem:[#allocation4 - $0x4] sm:$0xc0] %vm252_vm7, %v449_v61 }
0x1eb9   :  { %v2293_v21 = vpop.permute.xlu1 %2292 }
0x1eba   :  { %2295 = vst.msk [vmem:[%s3724_s24] sm:$0xff] %vm99_vm1, %v2293_v21 }
0x1ebd   :  { %v2304_v25 = vpop.permute.xlu1 %2303 }
0x1ebe   :  { %2438 = vst.msk [vmem:[%s3724_s24 + $0x8] sm:$0xff] %vm99_vm1, %v2304_v25 }
0x1ebf   :  { %2881 = shalt.err (!%p2878_p4)
}
0x1ec0   :  { %s2882_s7 = scalar_lea.hbm %s3721_s21, 64 }
0x1ec1   :  { %p2883_p5 = scmp.ne.s32.totalorder %s3721_s21, %s2882_s7  ;;  %p2886_p6 = scmp.lt.u32.totalorder %s2882_s7, %s3721_s21 }
0x1ec3   :  { %p2888_p7 = pnand %p2886_p6, %p2883_p5 }
0x1ec5   :  { %2891 = shalt.err (!%p2888_p7)
}
0x1ec6   :  { %s2926_s13 = smov 2   ;;  %s2892_s1 = scalar_lea.vmem %s2328_s17, 64 }
0x1ec7   :  { %2321 = dma.vmem_to_hbm [thread:$0]  %s2316_s27, 64, %s3721_s21, [#allocation3], %s2921_s6, %s2921_s6, %s2926_s13  }
0x1ec8   :  { %p2893_p8 = scmp.ne.s32.totalorder %s2328_s17, %s2892_s1  ;;  %p2897_p9 = scmp.lt.s32.totalorder %s2328_s17, %s2328_s17 }
0x1ec9   :  { %p2898_p10 = scmp.lt.s32.totalorder %s2892_s1, %s2892_s1 }
0x1ecb   :  { %p2899_p11 = por %p2898_p10, %p2897_p9 }
0x1ecd   :  { %p2900_p12 = pnand %p2899_p11, %p2893_p8 }
0x1ecf   :  { %2903 = shalt.err (!%p2900_p12)
}
0x1ed0   :  { %s2904_s18 = scalar_lea.hbm %s3722_s22, 64 }
0x1ed1   :  { %p2905_p13 = scmp.ne.s32.totalorder %s3722_s22, %s2904_s18  ;;  %p2908_p0 = scmp.lt.u32.totalorder %s2904_s18, %s3722_s22 }
0x1ed3   :  { %p2910_p1 = pnand %p2908_p0, %p2905_p13 }
0x1ed5   :  { %2913 = shalt.err (!%p2910_p1)
}
0x1ed6   :  { %2333 = dma.vmem_to_hbm [thread:$0]  %s2328_s17, 64, %s3722_s22, [#allocation5], %s2921_s6, %s2921_s6, %s2926_s13  }
0x1ed7   :  { %v2869_v23 = vld [vmem:[%s3719_s19] ss:$0 sm:$0xff] }
0x1f81   :  { %v2277_v8 = vpop.f32.mrb[56].mxu0 }
0x1f82   :  { %v2278_v22 = vpop.f32.mrb[57].mxu0 }
0x1f83   :  { %v2283_v24 = vadd.f32 %v2869_v23, %v2278_v22  ;;  %v2280_v26 = vpop.f32.mrb[58].mxu0 }
0x1f84   :  { %v2281_v40 = vpop.f32.mrb[59].mxu0 }
0x1f85   :  { %2436 = vst [vmem:[%s3720_s20 + $0x38] sm:$0xff] %v2283_v24 }
0x1f86   :  { %2914 = dma.done.wait [#allocation3], 64  }
0x1f87   :  { %2915 = vsyncadd [#allocation3], 4294967232 }
0x1f88   :  { %2916 = dma.done.wait [#allocation5], 64  }
0x1f89   :  { %2917 = vsyncadd [#allocation5], 4294967232 }
0x1f8a   :  { %2350 = vsyncpa [#allocation3], 1 }
0x1f8b   :  { %2351 = vsyncpa [#allocation5], 1 }

</bundles_post_ra>
